<compile_context>
chip_gen: v6e
topology: v6e:2x2x1
jax: 0.10.0
libtpu: 0.0.40
codegen_flags: <defaults>
</compile_context>

<pallas_src>
import functools
import math

import numpy as np

import jax
import jax.numpy as jnp
from jax.experimental import pallas as pl
from jax.experimental.pallas import tpu as pltpu


# ---------------------------------------------------------------------------
# Pallas kernel 1: fused LayerNorm + window multi-head self-attention
# ---------------------------------------------------------------------------
def _wmsa_kernel(x_ref, lng_ref, lnb_ref, wqkv_ref, bqkv_ref, bias_ref, mask_ref,
                 wproj_ref, bproj_ref, out_ref, *, num_heads, head_dim, scale, wb, n):
    c = x_ref.shape[-1]
    x = x_ref[0]                                            # (wb*n, c) tokens of wb windows

    # norm1 fused in-kernel (LayerNorm is per-token, so it commutes with roll/partition).
    mu = jnp.mean(x, axis=-1, keepdims=True)
    var = jnp.mean((x - mu) * (x - mu), axis=-1, keepdims=True)
    xn = (x - mu) * jax.lax.rsqrt(var + 1e-5) * lng_ref[...] + lnb_ref[...]

    # Single wide QKV projection: bf16 operands, f32 accumulation on the MXU.
    qkv = jnp.dot(xn.astype(jnp.bfloat16), wqkv_ref[...].astype(jnp.bfloat16),
                  preferred_element_type=jnp.float32) + bqkv_ref[...]   # (wb*n, 3c)

    heads = []
    for h in range(num_heads):                              # static, short loop
        lo = h * head_dim
        q = qkv[:, lo:lo + head_dim].reshape(wb, n, head_dim).astype(jnp.bfloat16)
        k = qkv[:, c + lo:c + lo + head_dim].reshape(wb, n, head_dim).astype(jnp.bfloat16)
        v = qkv[:, 2 * c + lo:2 * c + lo + head_dim].reshape(wb, n, head_dim).astype(jnp.bfloat16)

        s = jnp.einsum("wnd,wmd->wnm", q, k,
                       preferred_element_type=jnp.float32) * scale      # (wb, n, n)
        s = s + bias_ref[h] + mask_ref[...]                 # rel-pos bias + shift mask
        s = s - jnp.max(s, axis=-1, keepdims=True)
        p = jnp.exp(s)
        p = p * pl.reciprocal(jnp.sum(p, axis=-1, keepdims=True), approx=True)
        heads.append(jnp.einsum("wnm,wmd->wnd", p.astype(jnp.bfloat16), v,
                                preferred_element_type=jnp.float32))    # (wb, n, dh)

    # Single output projection over the concatenated heads (no per-head tiny matmuls).
    y = jnp.concatenate(heads, axis=-1).reshape(wb * n, c)
    out = jnp.dot(y.astype(jnp.bfloat16), wproj_ref[...].astype(jnp.bfloat16),
                  preferred_element_type=jnp.float32) + bproj_ref[...]
    out_ref[0] = out.astype(out_ref.dtype)


def window_attention(x_win, rel_bias, mask, p, num_heads, windows_per_block=None):
    """x_win: (B, nW, N, C) windows. rel_bias: (nH, N, N). mask: (nW, N, N)."""
    B, nW, N, C = x_win.shape
    dh = C // num_heads
    wb = windows_per_block or nW
    assert nW % wb == 0
    xf = x_win.reshape(B, nW * N, C)                        # lane-dense, window-major tokens

    kernel = functools.partial(_wmsa_kernel, num_heads=num_heads, head_dim=dh,
                               scale=dh ** -0.5, wb=wb, n=N)
    out = pl.pallas_call(
        kernel,
        out_shape=jax.ShapeDtypeStruct((B, nW * N, C), jnp.float32),
        grid=(B, nW // wb),
        in_specs=[
            pl.BlockSpec((1, wb * N, C), lambda b, w: (b, w, 0)),
            pl.BlockSpec((1, C), lambda b, w: (0, 0)),              # ln gamma
            pl.BlockSpec((1, C), lambda b, w: (0, 0)),              # ln beta
            pl.BlockSpec((C, 3 * C), lambda b, w: (0, 0)),          # fused qkv weight
            pl.BlockSpec((1, 3 * C), lambda b, w: (0, 0)),          # fused qkv bias
            pl.BlockSpec((num_heads, N, N), lambda b, w: (0, 0, 0)),  # rel-pos bias
            pl.BlockSpec((wb, N, N), lambda b, w: (w, 0, 0)),       # shift mask
            pl.BlockSpec((C, C), lambda b, w: (0, 0)),              # proj weight
            pl.BlockSpec((1, C), lambda b, w: (0, 0)),              # proj bias
        ],
        out_specs=pl.BlockSpec((1, wb * N, C), lambda b, w: (b, w, 0)),
        compiler_params=pltpu.CompilerParams(
            dimension_semantics=("parallel", "parallel")),
    )(xf, p["ln_g"], p["ln_b"], p["wqkv"], p["bqkv"], rel_bias, mask,
      p["wproj"], p["bproj"])
    return out.reshape(B, nW, N, C)


# ---------------------------------------------------------------------------
# Pallas kernel 2: fused LayerNorm + MLP (fc1 -> GELU -> fc2)
# ---------------------------------------------------------------------------
def _gelu_tanh(x):
    # TODO(synk): PyTorch nn.GELU default is the exact erf form; tanh approximation here.
    c = 0.7978845608028654  # sqrt(2/pi)
    return 0.5 * x * (1.0 + jnp.tanh(c * (x + 0.044715 * x * x * x)))


def _ln_mlp_kernel(x_ref, lng_ref, lnb_ref, w1_ref, b1_ref, w2_ref, b2_ref, out_ref):
    x = x_ref[0]                                            # (Lt, C)
    mu = jnp.mean(x, axis=-1, keepdims=True)
    var = jnp.mean((x - mu) * (x - mu), axis=-1, keepdims=True)
    xn = (x - mu) * jax.lax.rsqrt(var + 1e-5) * lng_ref[...] + lnb_ref[...]
    h = jnp.dot(xn.astype(jnp.bfloat16), w1_ref[...].astype(jnp.bfloat16),
                preferred_element_type=jnp.float32) + b1_ref[...]
    h = _gelu_tanh(h)
    y = jnp.dot(h.astype(jnp.bfloat16), w2_ref[...].astype(jnp.bfloat16),
                preferred_element_type=jnp.float32) + b2_ref[...]
    out_ref[0] = y.astype(out_ref.dtype)


def ln_mlp(x, p, tokens_per_block=None):
    B, L, C = x.shape
    Hd = p["w1"].shape[1]
    lt = tokens_per_block or L
    assert L % lt == 0
    return pl.pallas_call(
        _ln_mlp_kernel,
        out_shape=jax.ShapeDtypeStruct((B, L, C), jnp.float32),
        grid=(B, L // lt),
        in_specs=[
            pl.BlockSpec((1, lt, C), lambda b, t: (b, t, 0)),
            pl.BlockSpec((1, C), lambda b, t: (0, 0)),
            pl.BlockSpec((1, C), lambda b, t: (0, 0)),
            pl.BlockSpec((C, Hd), lambda b, t: (0, 0)),
            pl.BlockSpec((1, Hd), lambda b, t: (0, 0)),
            pl.BlockSpec((Hd, C), lambda b, t: (0, 0)),
            pl.BlockSpec((1, C), lambda b, t: (0, 0)),
        ],
        out_specs=pl.BlockSpec((1, lt, C), lambda b, t: (b, t, 0)),
        compiler_params=pltpu.CompilerParams(
            dimension_semantics=("parallel", "parallel")),
    )(x, p["ln_g"], p["ln_b"], p["w1"], p["b1"], p["w2"], p["b2"])


# ---------------------------------------------------------------------------
# Plain-JAX glue (channels-last / NHWC throughout)
# ---------------------------------------------------------------------------
def conv2d(x, w, b, padding=1):
    y = jax.lax.conv_general_dilated(
        x, w, window_strides=(1, 1),
        padding=[(padding, padding), (padding, padding)],
        dimension_numbers=("NHWC", "HWIO", "NHWC"))
    return y + b


def layer_norm(x, g, b, eps=1e-5):
    mu = x.mean(axis=-1, keepdims=True)
    var = ((x - mu) ** 2).mean(axis=-1, keepdims=True)
    return (x - mu) * jax.lax.rsqrt(var + eps) * g + b


def window_partition(x, ws):
    B, H, W, C = x.shape
    x = x.reshape(B, H // ws, ws, W // ws, ws, C).transpose(0, 1, 3, 2, 4, 5)
    return x.reshape(B, (H // ws) * (W // ws), ws * ws, C)


def window_reverse(xw, ws, H, W):
    B, C = xw.shape[0], xw.shape[-1]
    x = xw.reshape(B, H // ws, W // ws, ws, ws, C).transpose(0, 1, 3, 2, 4, 5)
    return x.reshape(B, H, W, C)


def pixel_shuffle(x, r):
    B, H, W, Cr2 = x.shape
    C = Cr2 // (r * r)
    x = x.reshape(B, H, W, C, r, r).transpose(0, 1, 4, 2, 5, 3)
    return x.reshape(B, H * r, W * r, C)


def relative_position_index(ws):
    coords = np.stack(np.meshgrid(np.arange(ws), np.arange(ws), indexing="ij"))
    coords = coords.reshape(2, -1)
    rel = (coords[:, :, None] - coords[:, None, :]).transpose(1, 2, 0)
    rel[:, :, 0] += ws - 1
    rel[:, :, 1] += ws - 1
    rel[:, :, 0] *= 2 * ws - 1
    return rel.sum(-1)                                      # (N, N) int


def shift_attn_mask(H, W, ws, shift):
    img = np.zeros((1, H, W, 1), np.float32)
    cnt = 0
    for hs in (slice(0, -ws), slice(-ws, -shift), slice(-shift, None)):
        for wsl in (slice(0, -ws), slice(-ws, -shift), slice(-shift, None)):
            img[:, hs, wsl, :] = cnt
            cnt += 1
    m = img.reshape(1, H // ws, ws, W // ws, ws, 1).transpose(0, 1, 3, 2, 4, 5)
    m = m.reshape(-1, ws * ws)                              # (nW, N)
    attn = m[:, None, :] - m[:, :, None]
    return jnp.asarray(np.where(attn != 0, -100.0, 0.0).astype(np.float32))


# ---------------------------------------------------------------------------
# Swin transformer block / RSTB / FaceSwinIR forward
# ---------------------------------------------------------------------------
def swin_block(x, x_size, blk, cfg, shift, rel_index, attn_mask):
    H, W = x_size
    B, L, C = x.shape
    ws = cfg["window_size"]
    nH = cfg["num_heads"]
    N = ws * ws

    shortcut = x
    xs = x.reshape(B, H, W, C)
    if shift > 0:
        xs = jnp.roll(xs, (-shift, -shift), axis=(1, 2))
    xw = window_partition(xs, ws)                           # (B, nW, N, C)

    table = blk["attn"]["rpb_table"]                        # ((2ws-1)^2, nH)
    bias = jnp.take(table, rel_index.reshape(-1), axis=0)
    bias = bias.reshape(N, N, nH).transpose(2, 0, 1)        # (nH, N, N)

    aw = window_attention(xw, bias, attn_mask, blk["attn"], nH,
                          cfg["windows_per_block"])
    xs = window_reverse(aw, ws, H, W)
    if shift > 0:
        xs = jnp.roll(xs, (shift, shift), axis=(1, 2))
    x = shortcut + xs.reshape(B, L, C)                      # drop_path == identity (eval)
    x = x + ln_mlp(x, blk["mlp"], cfg["tokens_per_block"])
    return x


def rstb(x, x_size, layer, cfg, rel_index, attn_mask, zero_mask):
    H, W = x_size
    B, L, C = x.shape
    res = x
    ws = cfg["window_size"]
    for i, blk in enumerate(layer["blocks"]):
        shift = 0 if i % 2 == 0 else ws // 2
        mask = attn_mask if shift > 0 else zero_mask
        x = swin_block(x, x_size, blk, cfg, shift, rel_index, mask)
    xi = conv2d(x.reshape(B, H, W, C), layer["conv_w"], layer["conv_b"])
    return xi.reshape(B, L, C) + res


def face_swinir_forward(x_nchw, params, cfg):
    ws = cfg["window_size"]
    B, _, H, W = x_nchw.shape
    assert H % ws == 0 and W % ws == 0, "err_padding.,"
    C = cfg["embed_dim"]
    img_range = cfg["img_range"]
    rgb_mean = jnp.asarray([0.4488, 0.4371, 0.404], jnp.float32).reshape(1, 1, 1, 3)

    x = jnp.transpose(x_nchw, (0, 2, 3, 1))                 # NCHW -> NHWC once (boundary)
    x = (x - rgb_mean) * img_range
    feat = conv2d(x, params["conv_first_w"], params["conv_first_b"])

    # forward_features
    t = feat.reshape(B, H * W, C)
    t = layer_norm(t, params["patch_norm_g"], params["patch_norm_b"])   # patch_embed norm
    rel_index = cfg["rel_index"]
    attn_mask = cfg["attn_mask"]
    zero_mask = jnp.zeros_like(attn_mask)
    for layer in params["layers"]:
        t = rstb(t, (H, W), layer, cfg, rel_index, attn_mask, zero_mask)
    t = layer_norm(t, params["norm_g"], params["norm_b"])
    body = t.reshape(B, H, W, C)

    body = conv2d(body, params["conv_after_body_w"], params["conv_after_body_b"]) + feat
    up = conv2d(body, params["up_w"], params["up_b"])
    out = pixel_shuffle(up, cfg["upscale"])                 # UpsampleOneStep(8, ...)
    out = out / img_range + rgb_mean
    return jnp.transpose(out, (0, 3, 1, 2))                 # back to NCHW (interface only)


# ---------------------------------------------------------------------------
# Deterministic parameter init (Linear: trunc_normal std=0.02, bias 0; LN: 1/0)
# ---------------------------------------------------------------------------
def init_params(key, cfg):
    C = cfg["embed_dim"]
    nH = cfg["num_heads"]
    ws = cfg["window_size"]
    hidden = int(C * cfg["mlp_ratio"])
    keys = iter(jax.random.split(key, 8 + 8 * sum(cfg["depths"]) + 2 * len(cfg["depths"])))

    def normal(shape, std):
        return std * jax.random.normal(next(keys), shape, jnp.float32)

    def dense(cin, cout, std=0.02):
        return normal((cin, cout), std), jnp.zeros((1, cout), jnp.float32)

    def conv(cin, cout, k=3):
        return (normal((k, k, cin, cout), 1.0 / math.sqrt(cin * k * k)),
                jnp.zeros((cout,), jnp.float32))

    params = {}
    params["conv_first_w"], params["conv_first_b"] = conv(3, C)
    params["patch_norm_g"] = jnp.ones((C,), jnp.float32)
    params["patch_norm_b"] = jnp.zeros((C,), jnp.float32)

    layers = []
    for depth in cfg["depths"]:
        blocks = []
        for _ in range(depth):
            wqkv, bqkv = dense(C, 3 * C)
            wproj, bproj = dense(C, C)
            w1, b1 = dense(C, hidden)
            w2, b2 = dense(hidden, C)
            blocks.append({
                "attn": {"ln_g": jnp.ones((1, C), jnp.float32),
                         "ln_b": jnp.zeros((1, C), jnp.float32),
                         "wqkv": wqkv, "bqkv": bqkv,
                         "wproj": wproj, "bproj": bproj,
                         "rpb_table": normal(((2 * ws - 1) ** 2, nH), 0.02)},
                "mlp": {"ln_g": jnp.ones((1, C), jnp.float32),
                        "ln_b": jnp.zeros((1, C), jnp.float32),
                        "w1": w1, "b1": b1, "w2": w2, "b2": b2},
            })
        cw, cb = conv(C, C)
        layers.append({"blocks": blocks, "conv_w": cw, "conv_b": cb})
    params["layers"] = layers

    params["norm_g"] = jnp.ones((C,), jnp.float32)
    params["norm_b"] = jnp.zeros((C,), jnp.float32)
    params["conv_after_body_w"], params["conv_after_body_b"] = conv(C, C)
    params["up_w"], params["up_b"] = conv(C, 3 * cfg["upscale"] ** 2)
    return params


if __name__ == "__main__":
    key = jax.random.PRNGKey(0)
    B = 2
    H = W = 16                       # opts.face_load_size (multiple of window_size)
    ws = 4                           # window_size
    cfg = {
        "embed_dim": 32,
        "num_heads": 2,              # num_heads=[2, 2]
        "depths": (2, 2),
        "mlp_ratio": 2.0,
        "window_size": ws,
        "img_range": 1.0,
        "upscale": 8,                # UpsampleOneStep(8, ...)
        "windows_per_block": 8,      # window tile for the attention kernel grid
        "tokens_per_block": 128,     # token tile for the MLP kernel grid
        "rel_index": relative_position_index(ws),
        "attn_mask": shift_attn_mask(H, W, ws, ws // 2),
    }
    kp, kx = jax.random.split(key)
    params = init_params(kp, cfg)
    x = jax.random.normal(kx, (B, 3, H, W), jnp.float32)

    fwd = jax.jit(lambda xx, pp: face_swinir_forward(xx, pp, cfg))
    out = fwd(x, params)
    jax.block_until_ready(out)
    assert out.shape == (B, 3, H * cfg["upscale"], W * cfg["upscale"])
    assert bool(jnp.isfinite(out).all())
    print("KERNEL_OK")
</pallas_src>

<mosaic_0001>
module attributes {stable_mosaic.version = 11 : i64} {
  func.func @_wmsa_kernel(%arg0: i32, %arg1: i32, %arg2: memref<1x128x32xf32, #tpu.memory_space<vmem>>, %arg3: memref<1x32xf32, #tpu.memory_space<vmem>>, %arg4: memref<1x32xf32, #tpu.memory_space<vmem>>, %arg5: memref<32x96xf32, #tpu.memory_space<vmem>>, %arg6: memref<1x96xf32, #tpu.memory_space<vmem>>, %arg7: memref<2x16x16xf32, #tpu.memory_space<vmem>>, %arg8: memref<8x16x16xf32, #tpu.memory_space<vmem>>, %arg9: memref<32x32xf32, #tpu.memory_space<vmem>>, %arg10: memref<1x32xf32, #tpu.memory_space<vmem>>, %arg11: memref<1x128x32xf32, #tpu.memory_space<vmem>>) attributes {dimension_semantics = [#tpu.dimension_semantics<parallel>, #tpu.dimension_semantics<parallel>], iteration_bounds = array<i64: 2, 2>, scalar_prefetch = 0 : i64, scratch_operands = 0 : i64, tpu.core_type = #tpu.core_type<tc>, window_params = [{transform_indices = @transform_0, window_bounds = array<i64: 1, 128, 32>}, {pipeline_mode = #tpu.pipeline_mode<synchronous>, transform_indices = @transform_1, window_bounds = array<i64: 1, 32>}, {pipeline_mode = #tpu.pipeline_mode<synchronous>, transform_indices = @transform_2, window_bounds = array<i64: 1, 32>}, {pipeline_mode = #tpu.pipeline_mode<synchronous>, transform_indices = @transform_3, window_bounds = array<i64: 32, 96>}, {pipeline_mode = #tpu.pipeline_mode<synchronous>, transform_indices = @transform_4, window_bounds = array<i64: 1, 96>}, {pipeline_mode = #tpu.pipeline_mode<synchronous>, transform_indices = @transform_5, window_bounds = array<i64: 2, 16, 16>}, {transform_indices = @transform_6, window_bounds = array<i64: 8, 16, 16>}, {pipeline_mode = #tpu.pipeline_mode<synchronous>, transform_indices = @transform_7, window_bounds = array<i64: 32, 32>}, {pipeline_mode = #tpu.pipeline_mode<synchronous>, transform_indices = @transform_8, window_bounds = array<i64: 1, 32>}, {transform_indices = @transform_9, window_bounds = array<i64: 1, 128, 32>}]} {
    %c0 = arith.constant 0 : index
    %c0_0 = arith.constant 0 : index
    %c0_1 = arith.constant 0 : index
    %0 = vector.load %arg2[%c0, %c0_0, %c0_1] : memref<1x128x32xf32, #tpu.memory_space<vmem>>, vector<1x128x32xf32>
    %1 = vector.shape_cast %0 : vector<1x128x32xf32> to vector<128x32xf32>
    %cst = arith.constant dense<0.000000e+00> : vector<128xf32>
    %2 = vector.multi_reduction <add>, %1, %cst [1] : vector<128x32xf32> to vector<128xf32>
    %3 = vector.shape_cast %2 : vector<128xf32> to vector<128x1xf32>
    %cst_2 = arith.constant 3.200000e+01 : f32
    %4 = vector.broadcast %cst_2 : f32 to vector<128x1xf32>
    %5 = arith.divf %3, %4 : vector<128x1xf32>
    %6 = vector.broadcast %5 : vector<128x1xf32> to vector<128x32xf32>
    %7 = arith.subf %1, %6 : vector<128x32xf32>
    %8 = vector.broadcast %5 : vector<128x1xf32> to vector<128x32xf32>
    %9 = arith.subf %1, %8 : vector<128x32xf32>
    %10 = arith.mulf %7, %9 : vector<128x32xf32>
    %cst_3 = arith.constant dense<0.000000e+00> : vector<128xf32>
    %11 = vector.multi_reduction <add>, %10, %cst_3 [1] : vector<128x32xf32> to vector<128xf32>
    %12 = vector.shape_cast %11 : vector<128xf32> to vector<128x1xf32>
    %cst_4 = arith.constant 3.200000e+01 : f32
    %13 = vector.broadcast %cst_4 : f32 to vector<128x1xf32>
    %14 = arith.divf %12, %13 : vector<128x1xf32>
    %15 = vector.broadcast %5 : vector<128x1xf32> to vector<128x32xf32>
    %16 = arith.subf %1, %15 : vector<128x32xf32>
    %cst_5 = arith.constant 9.99999974E-6 : f32
    %17 = vector.broadcast %cst_5 : f32 to vector<128x1xf32>
    %18 = arith.addf %14, %17 : vector<128x1xf32>
    %19 = math.rsqrt %18 : vector<128x1xf32>
    %20 = vector.broadcast %19 : vector<128x1xf32> to vector<128x32xf32>
    %21 = arith.mulf %16, %20 : vector<128x32xf32>
    %c0_6 = arith.constant 0 : index
    %c0_7 = arith.constant 0 : index
    %22 = vector.load %arg3[%c0_6, %c0_7] : memref<1x32xf32, #tpu.memory_space<vmem>>, vector<1x32xf32>
    %23 = vector.broadcast %22 : vector<1x32xf32> to vector<128x32xf32>
    %24 = arith.mulf %21, %23 : vector<128x32xf32>
    %c0_8 = arith.constant 0 : index
    %c0_9 = arith.constant 0 : index
    %25 = vector.load %arg4[%c0_8, %c0_9] : memref<1x32xf32, #tpu.memory_space<vmem>>, vector<1x32xf32>
    %26 = vector.broadcast %25 : vector<1x32xf32> to vector<128x32xf32>
    %27 = arith.addf %24, %26 : vector<128x32xf32>
    %28 = arith.truncf %27 : vector<128x32xf32> to vector<128x32xbf16>
    %c0_10 = arith.constant 0 : index
    %c0_11 = arith.constant 0 : index
    %29 = vector.load %arg5[%c0_10, %c0_11] : memref<32x96xf32, #tpu.memory_space<vmem>>, vector<32x96xf32>
    %30 = arith.truncf %29 : vector<32x96xf32> to vector<32x96xbf16>
    %cst_12 = arith.constant dense<0.000000e+00> : vector<128x96xf32>
    %31 = tpu.matmul %28, %30, %cst_12 {dimension_numbers = #tpu.dot_dimension_numbers<[1], [0], [0], [1], [0, 0, 1, 1], [], []>} : vector<128x32xbf16>, vector<32x96xbf16>, vector<128x96xf32> -> vector<128x96xf32>
    %c0_13 = arith.constant 0 : index
    %c0_14 = arith.constant 0 : index
    %32 = vector.load %arg6[%c0_13, %c0_14] : memref<1x96xf32, #tpu.memory_space<vmem>>, vector<1x96xf32>
    %33 = vector.broadcast %32 : vector<1x96xf32> to vector<128x96xf32>
    %34 = arith.addf %31, %33 : vector<128x96xf32>
    %35 = vector.extract_strided_slice %34 {offsets = [0, 0], sizes = [128, 16], strides = [1, 1]} : vector<128x96xf32> to vector<128x16xf32>
    %36 = vector.shape_cast %35 : vector<128x16xf32> to vector<8x16x16xf32>
    %37 = arith.truncf %36 : vector<8x16x16xf32> to vector<8x16x16xbf16>
    %38 = vector.extract_strided_slice %34 {offsets = [0, 32], sizes = [128, 16], strides = [1, 1]} : vector<128x96xf32> to vector<128x16xf32>
    %39 = vector.shape_cast %38 : vector<128x16xf32> to vector<8x16x16xf32>
    %40 = arith.truncf %39 : vector<8x16x16xf32> to vector<8x16x16xbf16>
    %41 = vector.extract_strided_slice %34 {offsets = [0, 64], sizes = [128, 16], strides = [1, 1]} : vector<128x96xf32> to vector<128x16xf32>
    %42 = vector.shape_cast %41 : vector<128x16xf32> to vector<8x16x16xf32>
    %43 = arith.truncf %42 : vector<8x16x16xf32> to vector<8x16x16xbf16>
    "tpu.trace_start"() <{level = 10 : i32, message = "wnd,wmd->wnm"}> : () -> ()
    %cst_15 = arith.constant dense<0.000000e+00> : vector<8x16x16xf32>
    %44 = tpu.matmul %37, %40, %cst_15 {dimension_numbers = #tpu.dot_dimension_numbers<[2], [2], [1], [1], [0, 0, 0, 1, 1, 1], [0], [0]>} : vector<8x16x16xbf16>, vector<8x16x16xbf16>, vector<8x16x16xf32> -> vector<8x16x16xf32>
    "tpu.trace_stop"() : () -> ()
    %cst_16 = arith.constant 2.500000e-01 : f32
    %45 = vector.broadcast %cst_16 : f32 to vector<8x16x16xf32>
    %46 = arith.mulf %44, %45 : vector<8x16x16xf32>
    %c0_17 = arith.constant 0 : index
    %c0_18 = arith.constant 0 : index
    %c0_19 = arith.constant 0 : index
    %47 = vector.load %arg7[%c0_17, %c0_18, %c0_19] : memref<2x16x16xf32, #tpu.memory_space<vmem>>, vector<1x16x16xf32>
    %48 = vector.shape_cast %47 : vector<1x16x16xf32> to vector<16x16xf32>
    %49 = vector.shape_cast %48 : vector<16x16xf32> to vector<1x16x16xf32>
    %50 = vector.broadcast %49 : vector<1x16x16xf32> to vector<8x16x16xf32>
    %51 = arith.addf %46, %50 : vector<8x16x16xf32>
    %c0_20 = arith.constant 0 : index
    %c0_21 = arith.constant 0 : index
    %c0_22 = arith.constant 0 : index
    %52 = vector.load %arg8[%c0_20, %c0_21, %c0_22] : memref<8x16x16xf32, #tpu.memory_space<vmem>>, vector<8x16x16xf32>
    %53 = arith.addf %51, %52 : vector<8x16x16xf32>
    %cst_23 = arith.constant dense<0xFF800000> : vector<8x16xf32>
    %54 = vector.multi_reduction <maximumf>, %53, %cst_23 [2] : vector<8x16x16xf32> to vector<8x16xf32>
    %55 = vector.shape_cast %54 : vector<8x16xf32> to vector<8x16x1xf32>
    %56 = vector.broadcast %55 : vector<8x16x1xf32> to vector<8x16x16xf32>
    %57 = arith.subf %53, %56 : vector<8x16x16xf32>
    %58 = math.exp %57 : vector<8x16x16xf32>
    %cst_24 = arith.constant dense<0.000000e+00> : vector<8x16xf32>
    %59 = vector.multi_reduction <add>, %58, %cst_24 [2] : vector<8x16x16xf32> to vector<8x16xf32>
    %60 = vector.shape_cast %59 : vector<8x16xf32> to vector<8x16x1xf32>
    %61 = tpu.reciprocal %60 {approx = true} : vector<8x16x1xf32> -> vector<8x16x1xf32>
    %62 = vector.broadcast %61 : vector<8x16x1xf32> to vector<8x16x16xf32>
    %63 = arith.mulf %58, %62 : vector<8x16x16xf32>
    %64 = arith.truncf %63 : vector<8x16x16xf32> to vector<8x16x16xbf16>
    "tpu.trace_start"() <{level = 10 : i32, message = "wnm,wmd->wnd"}> : () -> ()
    %cst_25 = arith.constant dense<0.000000e+00> : vector<8x16x16xf32>
    %65 = tpu.matmul %64, %43, %cst_25 {dimension_numbers = #tpu.dot_dimension_numbers<[2], [1], [1], [2], [0, 0, 0, 1, 1, 2], [0], [0]>} : vector<8x16x16xbf16>, vector<8x16x16xbf16>, vector<8x16x16xf32> -> vector<8x16x16xf32>
    "tpu.trace_stop"() : () -> ()
    %66 = vector.extract_strided_slice %34 {offsets = [0, 16], sizes = [128, 16], strides = [1, 1]} : vector<128x96xf32> to vector<128x16xf32>
    %67 = vector.shape_cast %66 : vector<128x16xf32> to vector<8x16x16xf32>
    %68 = arith.truncf %67 : vector<8x16x16xf32> to vector<8x16x16xbf16>
    %69 = vector.extract_strided_slice %34 {offsets = [0, 48], sizes = [128, 16], strides = [1, 1]} : vector<128x96xf32> to vector<128x16xf32>
    %70 = vector.shape_cast %69 : vector<128x16xf32> to vector<8x16x16xf32>
    %71 = arith.truncf %70 : vector<8x16x16xf32> to vector<8x16x16xbf16>
    %72 = vector.extract_strided_slice %34 {offsets = [0, 80], sizes = [128, 16], strides = [1, 1]} : vector<128x96xf32> to vector<128x16xf32>
    %73 = vector.shape_cast %72 : vector<128x16xf32> to vector<8x16x16xf32>
    %74 = arith.truncf %73 : vector<8x16x16xf32> to vector<8x16x16xbf16>
    "tpu.trace_start"() <{level = 10 : i32, message = "wnd,wmd->wnm"}> : () -> ()
    %cst_26 = arith.constant dense<0.000000e+00> : vector<8x16x16xf32>
    %75 = tpu.matmul %68, %71, %cst_26 {dimension_numbers = #tpu.dot_dimension_numbers<[2], [2], [1], [1], [0, 0, 0, 1, 1, 1], [0], [0]>} : vector<8x16x16xbf16>, vector<8x16x16xbf16>, vector<8x16x16xf32> -> vector<8x16x16xf32>
    "tpu.trace_stop"() : () -> ()
    %cst_27 = arith.constant 2.500000e-01 : f32
    %76 = vector.broadcast %cst_27 : f32 to vector<8x16x16xf32>
    %77 = arith.mulf %75, %76 : vector<8x16x16xf32>
    %c1 = arith.constant 1 : index
    %c0_28 = arith.constant 0 : index
    %c0_29 = arith.constant 0 : index
    %78 = vector.load %arg7[%c1, %c0_28, %c0_29] : memref<2x16x16xf32, #tpu.memory_space<vmem>>, vector<1x16x16xf32>
    %79 = vector.shape_cast %78 : vector<1x16x16xf32> to vector<16x16xf32>
    %80 = vector.shape_cast %79 : vector<16x16xf32> to vector<1x16x16xf32>
    %81 = vector.broadcast %80 : vector<1x16x16xf32> to vector<8x16x16xf32>
    %82 = arith.addf %77, %81 : vector<8x16x16xf32>
    %c0_30 = arith.constant 0 : index
    %c0_31 = arith.constant 0 : index
    %c0_32 = arith.constant 0 : index
    %83 = vector.load %arg8[%c0_30, %c0_31, %c0_32] : memref<8x16x16xf32, #tpu.memory_space<vmem>>, vector<8x16x16xf32>
    %84 = arith.addf %82, %83 : vector<8x16x16xf32>
    %cst_33 = arith.constant dense<0xFF800000> : vector<8x16xf32>
    %85 = vector.multi_reduction <maximumf>, %84, %cst_33 [2] : vector<8x16x16xf32> to vector<8x16xf32>
    %86 = vector.shape_cast %85 : vector<8x16xf32> to vector<8x16x1xf32>
    %87 = vector.broadcast %86 : vector<8x16x1xf32> to vector<8x16x16xf32>
    %88 = arith.subf %84, %87 : vector<8x16x16xf32>
    %89 = math.exp %88 : vector<8x16x16xf32>
    %cst_34 = arith.constant dense<0.000000e+00> : vector<8x16xf32>
    %90 = vector.multi_reduction <add>, %89, %cst_34 [2] : vector<8x16x16xf32> to vector<8x16xf32>
    %91 = vector.shape_cast %90 : vector<8x16xf32> to vector<8x16x1xf32>
    %92 = tpu.reciprocal %91 {approx = true} : vector<8x16x1xf32> -> vector<8x16x1xf32>
    %93 = vector.broadcast %92 : vector<8x16x1xf32> to vector<8x16x16xf32>
    %94 = arith.mulf %89, %93 : vector<8x16x16xf32>
    %95 = arith.truncf %94 : vector<8x16x16xf32> to vector<8x16x16xbf16>
    "tpu.trace_start"() <{level = 10 : i32, message = "wnm,wmd->wnd"}> : () -> ()
    %cst_35 = arith.constant dense<0.000000e+00> : vector<8x16x16xf32>
    %96 = tpu.matmul %95, %74, %cst_35 {dimension_numbers = #tpu.dot_dimension_numbers<[2], [1], [1], [2], [0, 0, 0, 1, 1, 2], [0], [0]>} : vector<8x16x16xbf16>, vector<8x16x16xbf16>, vector<8x16x16xf32> -> vector<8x16x16xf32>
    "tpu.trace_stop"() : () -> ()
    %97 = tpu.concatenate %65, %96 in 2 : vector<8x16x16xf32>, vector<8x16x16xf32> -> vector<8x16x32xf32>
    %98 = vector.shape_cast %97 : vector<8x16x32xf32> to vector<128x32xf32>
    %99 = arith.truncf %98 : vector<128x32xf32> to vector<128x32xbf16>
    %c0_36 = arith.constant 0 : index
    %c0_37 = arith.constant 0 : index
    %100 = vector.load %arg9[%c0_36, %c0_37] : memref<32x32xf32, #tpu.memory_space<vmem>>, vector<32x32xf32>
    %101 = arith.truncf %100 : vector<32x32xf32> to vector<32x32xbf16>
    %cst_38 = arith.constant dense<0.000000e+00> : vector<128x32xf32>
    %102 = tpu.matmul %99, %101, %cst_38 {dimension_numbers = #tpu.dot_dimension_numbers<[1], [0], [0], [1], [0, 0, 1, 1], [], []>} : vector<128x32xbf16>, vector<32x32xbf16>, vector<128x32xf32> -> vector<128x32xf32>
    %c0_39 = arith.constant 0 : index
    %c0_40 = arith.constant 0 : index
    %103 = vector.load %arg10[%c0_39, %c0_40] : memref<1x32xf32, #tpu.memory_space<vmem>>, vector<1x32xf32>
    %104 = vector.broadcast %103 : vector<1x32xf32> to vector<128x32xf32>
    %105 = arith.addf %102, %104 : vector<128x32xf32>
    %c0_41 = arith.constant 0 : index
    %c0_42 = arith.constant 0 : index
    %c0_43 = arith.constant 0 : index
    %106 = vector.load %arg11[%c0_41, %c0_42, %c0_43] : memref<1x128x32xf32, #tpu.memory_space<vmem>>, vector<1x128x32xf32>
    %107 = vector.shape_cast %106 : vector<1x128x32xf32> to vector<128x32xf32>
    %108 = vector.shape_cast %105 : vector<128x32xf32> to vector<1x128x32xf32>
    tpu.vector_store %arg11[%c0_41, %c0_42, %c0_43], %108 {strides = array<i32>} : memref<1x128x32xf32, #tpu.memory_space<vmem>>, vector<1x128x32xf32>,
    return
  }
  func.func @transform_0(%arg0: i32, %arg1: i32) -> (i32, i32, i32) {
    %c0_i32 = arith.constant 0 : i32
    %c0_i32_0 = arith.constant 0 : i32
    return %arg0, %arg1, %c0_i32 : i32, i32, i32
  }
  func.func @transform_1(%arg0: i32, %arg1: i32) -> (i32, i32) {
    %c0_i32 = arith.constant 0 : i32
    %c0_i32_0 = arith.constant 0 : i32
    %c0_i32_1 = arith.constant 0 : i32
    return %c0_i32, %c0_i32_0 : i32, i32
  }
  func.func @transform_2(%arg0: i32, %arg1: i32) -> (i32, i32) {
    %c0_i32 = arith.constant 0 : i32
    %c0_i32_0 = arith.constant 0 : i32
    %c0_i32_1 = arith.constant 0 : i32
    return %c0_i32, %c0_i32_0 : i32, i32
  }
  func.func @transform_3(%arg0: i32, %arg1: i32) -> (i32, i32) {
    %c0_i32 = arith.constant 0 : i32
    %c0_i32_0 = arith.constant 0 : i32
    %c0_i32_1 = arith.constant 0 : i32
    return %c0_i32, %c0_i32_0 : i32, i32
  }
  func.func @transform_4(%arg0: i32, %arg1: i32) -> (i32, i32) {
    %c0_i32 = arith.constant 0 : i32
    %c0_i32_0 = arith.constant 0 : i32
    %c0_i32_1 = arith.constant 0 : i32
    return %c0_i32, %c0_i32_0 : i32, i32
  }
  func.func @transform_5(%arg0: i32, %arg1: i32) -> (i32, i32, i32) {
    %c0_i32 = arith.constant 0 : i32
    %c0_i32_0 = arith.constant 0 : i32
    %c0_i32_1 = arith.constant 0 : i32
    %c0_i32_2 = arith.constant 0 : i32
    return %c0_i32, %c0_i32_0, %c0_i32_1 : i32, i32, i32
  }
  func.func @transform_6(%arg0: i32, %arg1: i32) -> (i32, i32, i32) {
    %c0_i32 = arith.constant 0 : i32
    %c0_i32_0 = arith.constant 0 : i32
    %c0_i32_1 = arith.constant 0 : i32
    return %arg1, %c0_i32, %c0_i32_0 : i32, i32, i32
  }
  func.func @transform_7(%arg0: i32, %arg1: i32) -> (i32, i32) {
    %c0_i32 = arith.constant 0 : i32
    %c0_i32_0 = arith.constant 0 : i32
    %c0_i32_1 = arith.constant 0 : i32
    return %c0_i32, %c0_i32_0 : i32, i32
  }
  func.func @transform_8(%arg0: i32, %arg1: i32) -> (i32, i32) {
    %c0_i32 = arith.constant 0 : i32
    %c0_i32_0 = arith.constant 0 : i32
    %c0_i32_1 = arith.constant 0 : i32
    return %c0_i32, %c0_i32_0 : i32, i32
  }
  func.func @transform_9(%arg0: i32, %arg1: i32) -> (i32, i32, i32) {
    %c0_i32 = arith.constant 0 : i32
    %c0_i32_0 = arith.constant 0 : i32
    return %arg0, %arg1, %c0_i32 : i32, i32, i32
  }
}

module attributes {stable_mosaic.version = 11 : i64} {
  func.func @_ln_mlp_kernel(%arg0: i32, %arg1: i32, %arg2: memref<1x128x32xf32, #tpu.memory_space<vmem>>, %arg3: memref<1x32xf32, #tpu.memory_space<vmem>>, %arg4: memref<1x32xf32, #tpu.memory_space<vmem>>, %arg5: memref<32x64xf32, #tpu.memory_space<vmem>>, %arg6: memref<1x64xf32, #tpu.memory_space<vmem>>, %arg7: memref<64x32xf32, #tpu.memory_space<vmem>>, %arg8: memref<1x32xf32, #tpu.memory_space<vmem>>, %arg9: memref<1x128x32xf32, #tpu.memory_space<vmem>>) attributes {dimension_semantics = [#tpu.dimension_semantics<parallel>, #tpu.dimension_semantics<parallel>], iteration_bounds = array<i64: 2, 2>, scalar_prefetch = 0 : i64, scratch_operands = 0 : i64, tpu.core_type = #tpu.core_type<tc>, window_params = [{transform_indices = @transform_0, window_bounds = array<i64: 1, 128, 32>}, {pipeline_mode = #tpu.pipeline_mode<synchronous>, transform_indices = @transform_1, window_bounds = array<i64: 1, 32>}, {pipeline_mode = #tpu.pipeline_mode<synchronous>, transform_indices = @transform_2, window_bounds = array<i64: 1, 32>}, {pipeline_mode = #tpu.pipeline_mode<synchronous>, transform_indices = @transform_3, window_bounds = array<i64: 32, 64>}, {pipeline_mode = #tpu.pipeline_mode<synchronous>, transform_indices = @transform_4, window_bounds = array<i64: 1, 64>}, {pipeline_mode = #tpu.pipeline_mode<synchronous>, transform_indices = @transform_5, window_bounds = array<i64: 64, 32>}, {pipeline_mode = #tpu.pipeline_mode<synchronous>, transform_indices = @transform_6, window_bounds = array<i64: 1, 32>}, {transform_indices = @transform_7, window_bounds = array<i64: 1, 128, 32>}]} {
    %c0 = arith.constant 0 : index
    %c0_0 = arith.constant 0 : index
    %c0_1 = arith.constant 0 : index
    %0 = vector.load %arg2[%c0, %c0_0, %c0_1] : memref<1x128x32xf32, #tpu.memory_space<vmem>>, vector<1x128x32xf32>
    %1 = vector.shape_cast %0 : vector<1x128x32xf32> to vector<128x32xf32>
    %cst = arith.constant dense<0.000000e+00> : vector<128xf32>
    %2 = vector.multi_reduction <add>, %1, %cst [1] : vector<128x32xf32> to vector<128xf32>
    %3 = vector.shape_cast %2 : vector<128xf32> to vector<128x1xf32>
    %cst_2 = arith.constant 3.200000e+01 : f32
    %4 = vector.broadcast %cst_2 : f32 to vector<128x1xf32>
    %5 = arith.divf %3, %4 : vector<128x1xf32>
    %6 = vector.broadcast %5 : vector<128x1xf32> to vector<128x32xf32>
    %7 = arith.subf %1, %6 : vector<128x32xf32>
    %8 = vector.broadcast %5 : vector<128x1xf32> to vector<128x32xf32>
    %9 = arith.subf %1, %8 : vector<128x32xf32>
    %10 = arith.mulf %7, %9 : vector<128x32xf32>
    %cst_3 = arith.constant dense<0.000000e+00> : vector<128xf32>
    %11 = vector.multi_reduction <add>, %10, %cst_3 [1] : vector<128x32xf32> to vector<128xf32>
    %12 = vector.shape_cast %11 : vector<128xf32> to vector<128x1xf32>
    %cst_4 = arith.constant 3.200000e+01 : f32
    %13 = vector.broadcast %cst_4 : f32 to vector<128x1xf32>
    %14 = arith.divf %12, %13 : vector<128x1xf32>
    %15 = vector.broadcast %5 : vector<128x1xf32> to vector<128x32xf32>
    %16 = arith.subf %1, %15 : vector<128x32xf32>
    %cst_5 = arith.constant 9.99999974E-6 : f32
    %17 = vector.broadcast %cst_5 : f32 to vector<128x1xf32>
    %18 = arith.addf %14, %17 : vector<128x1xf32>
    %19 = math.rsqrt %18 : vector<128x1xf32>
    %20 = vector.broadcast %19 : vector<128x1xf32> to vector<128x32xf32>
    %21 = arith.mulf %16, %20 : vector<128x32xf32>
    %c0_6 = arith.constant 0 : index
    %c0_7 = arith.constant 0 : index
    %22 = vector.load %arg3[%c0_6, %c0_7] : memref<1x32xf32, #tpu.memory_space<vmem>>, vector<1x32xf32>
    %23 = vector.broadcast %22 : vector<1x32xf32> to vector<128x32xf32>
    %24 = arith.mulf %21, %23 : vector<128x32xf32>
    %c0_8 = arith.constant 0 : index
    %c0_9 = arith.constant 0 : index
    %25 = vector.load %arg4[%c0_8, %c0_9] : memref<1x32xf32, #tpu.memory_space<vmem>>, vector<1x32xf32>
    %26 = vector.broadcast %25 : vector<1x32xf32> to vector<128x32xf32>
    %27 = arith.addf %24, %26 : vector<128x32xf32>
    %28 = arith.truncf %27 : vector<128x32xf32> to vector<128x32xbf16>
    %c0_10 = arith.constant 0 : index
    %c0_11 = arith.constant 0 : index
    %29 = vector.load %arg5[%c0_10, %c0_11] : memref<32x64xf32, #tpu.memory_space<vmem>>, vector<32x64xf32>
    %30 = arith.truncf %29 : vector<32x64xf32> to vector<32x64xbf16>
    %cst_12 = arith.constant dense<0.000000e+00> : vector<128x64xf32>
    %31 = tpu.matmul %28, %30, %cst_12 {dimension_numbers = #tpu.dot_dimension_numbers<[1], [0], [0], [1], [0, 0, 1, 1], [], []>} : vector<128x32xbf16>, vector<32x64xbf16>, vector<128x64xf32> -> vector<128x64xf32>
    %c0_13 = arith.constant 0 : index
    %c0_14 = arith.constant 0 : index
    %32 = vector.load %arg6[%c0_13, %c0_14] : memref<1x64xf32, #tpu.memory_space<vmem>>, vector<1x64xf32>
    %33 = vector.broadcast %32 : vector<1x64xf32> to vector<128x64xf32>
    %34 = arith.addf %31, %33 : vector<128x64xf32>
    %cst_15 = arith.constant 5.000000e-01 : f32
    %35 = vector.broadcast %cst_15 : f32 to vector<128x64xf32>
    %36 = arith.mulf %35, %34 : vector<128x64xf32>
    %cst_16 = arith.constant 4.471500e-02 : f32
    %37 = vector.broadcast %cst_16 : f32 to vector<128x64xf32>
    %38 = arith.mulf %37, %34 : vector<128x64xf32>
    %39 = arith.mulf %38, %34 : vector<128x64xf32>
    %40 = arith.mulf %39, %34 : vector<128x64xf32>
    %41 = arith.addf %34, %40 : vector<128x64xf32>
    %cst_17 = arith.constant 0.797884583 : f32
    %42 = vector.broadcast %cst_17 : f32 to vector<128x64xf32>
    %43 = arith.mulf %42, %41 : vector<128x64xf32>
    %44 = math.tanh %43 : vector<128x64xf32>
    %cst_18 = arith.constant 1.000000e+00 : f32
    %45 = vector.broadcast %cst_18 : f32 to vector<128x64xf32>
    %46 = arith.addf %45, %44 : vector<128x64xf32>
    %47 = arith.mulf %36, %46 : vector<128x64xf32>
    %48 = arith.truncf %47 : vector<128x64xf32> to vector<128x64xbf16>
    %c0_19 = arith.constant 0 : index
    %c0_20 = arith.constant 0 : index
    %49 = vector.load %arg7[%c0_19, %c0_20] : memref<64x32xf32, #tpu.memory_space<vmem>>, vector<64x32xf32>
    %50 = arith.truncf %49 : vector<64x32xf32> to vector<64x32xbf16>
    %cst_21 = arith.constant dense<0.000000e+00> : vector<128x32xf32>
    %51 = tpu.matmul %48, %50, %cst_21 {dimension_numbers = #tpu.dot_dimension_numbers<[1], [0], [0], [1], [0, 0, 1, 1], [], []>} : vector<128x64xbf16>, vector<64x32xbf16>, vector<128x32xf32> -> vector<128x32xf32>
    %c0_22 = arith.constant 0 : index
    %c0_23 = arith.constant 0 : index
    %52 = vector.load %arg8[%c0_22, %c0_23] : memref<1x32xf32, #tpu.memory_space<vmem>>, vector<1x32xf32>
    %53 = vector.broadcast %52 : vector<1x32xf32> to vector<128x32xf32>
    %54 = arith.addf %51, %53 : vector<128x32xf32>
    %c0_24 = arith.constant 0 : index
    %c0_25 = arith.constant 0 : index
    %c0_26 = arith.constant 0 : index
    %55 = vector.load %arg9[%c0_24, %c0_25, %c0_26] : memref<1x128x32xf32, #tpu.memory_space<vmem>>, vector<1x128x32xf32>
    %56 = vector.shape_cast %55 : vector<1x128x32xf32> to vector<128x32xf32>
    %57 = vector.shape_cast %54 : vector<128x32xf32> to vector<1x128x32xf32>
    tpu.vector_store %arg9[%c0_24, %c0_25, %c0_26], %57 {strides = array<i32>} : memref<1x128x32xf32, #tpu.memory_space<vmem>>, vector<1x128x32xf32>,
    return
  }
  func.func @transform_0(%arg0: i32, %arg1: i32) -> (i32, i32, i32) {
    %c0_i32 = arith.constant 0 : i32
    %c0_i32_0 = arith.constant 0 : i32
    return %arg0, %arg1, %c0_i32 : i32, i32, i32
  }
  func.func @transform_1(%arg0: i32, %arg1: i32) -> (i32, i32) {
    %c0_i32 = arith.constant 0 : i32
    %c0_i32_0 = arith.constant 0 : i32
    %c0_i32_1 = arith.constant 0 : i32
    return %c0_i32, %c0_i32_0 : i32, i32
  }
  func.func @transform_2(%arg0: i32, %arg1: i32) -> (i32, i32) {
    %c0_i32 = arith.constant 0 : i32
    %c0_i32_0 = arith.constant 0 : i32
    %c0_i32_1 = arith.constant 0 : i32
    return %c0_i32, %c0_i32_0 : i32, i32
  }
  func.func @transform_3(%arg0: i32, %arg1: i32) -> (i32, i32) {
    %c0_i32 = arith.constant 0 : i32
    %c0_i32_0 = arith.constant 0 : i32
    %c0_i32_1 = arith.constant 0 : i32
    return %c0_i32, %c0_i32_0 : i32, i32
  }
  func.func @transform_4(%arg0: i32, %arg1: i32) -> (i32, i32) {
    %c0_i32 = arith.constant 0 : i32
    %c0_i32_0 = arith.constant 0 : i32
    %c0_i32_1 = arith.constant 0 : i32
    return %c0_i32, %c0_i32_0 : i32, i32
  }
  func.func @transform_5(%arg0: i32, %arg1: i32) -> (i32, i32) {
    %c0_i32 = arith.constant 0 : i32
    %c0_i32_0 = arith.constant 0 : i32
    %c0_i32_1 = arith.constant 0 : i32
    return %c0_i32, %c0_i32_0 : i32, i32
  }
  func.func @transform_6(%arg0: i32, %arg1: i32) -> (i32, i32) {
    %c0_i32 = arith.constant 0 : i32
    %c0_i32_0 = arith.constant 0 : i32
    %c0_i32_1 = arith.constant 0 : i32
    return %c0_i32, %c0_i32_0 : i32, i32
  }
  func.func @transform_7(%arg0: i32, %arg1: i32) -> (i32, i32, i32) {
    %c0_i32 = arith.constant 0 : i32
    %c0_i32_0 = arith.constant 0 : i32
    return %arg0, %arg1, %c0_i32 : i32, i32, i32
  }
}

</mosaic_0001>

<bundles_post_ra>
// kernel: _lambda_.8
= control target key start
LH: loop header
LB: loop body
LE: loop exit
PB: predicated region body
PF: predicated region fallthrough
CT: control target
= control target key end

     0   :  { %s3959_s30 = smov 0   ;;  %s3961_s10 = smov 0   ;;  %s5105_s0 = inlined_call_operand.vmem [shape: f32[2,256,32], index: 0, kind: input, shape index: {}]   ;;  %s5106_s1 = inlined_call_operand.vmem [shape: f32[1,32], index: 1, kind: input, shape index: {}]   ;;  %s5107_s2 = inlined_call_operand.vmem [shape: f32[1,32], index: 2, kind: input, shape index: {}]   ;;  %s5108_s3 = inlined_call_operand.vmem [shape: f32[32,96], index: 3, kind: input, shape index: {}]   ;;  %s5109_s4 = inlined_call_operand.vmem [shape: f32[1,96], index: 4, kind: input, shape index: {}]   ;;  %s5110_s5 = inlined_call_operand.vmem [shape: f32[2,16,16], index: 5, kind: input, shape index: {}]   ;;  %s5111_s6 = inlined_call_operand.vmem [shape: f32[16,16,16], index: 6, kind: input, shape index: {}]   ;;  %s5112_s7 = inlined_call_operand.vmem [shape: f32[32,32], index: 7, kind: input, shape index: {}]   ;;  %s5113_s8 = inlined_call_operand.vmem [shape: f32[1,32], index: 8, kind: input, shape index: {}]   ;;  %s5114_s9 = inlined_call_operand.vmem [shape: f32[2,256,32], index: 9, kind: output, shape index: {}]  }
   0x1   :  { %s3963_s11 = smov 0   ;;  %s3965_s12 = smov 0  }
   0x2   :  { %s3967_s13 = smov 0  }
   0x3 LB: > { %s28_s14 = sadd.s32 1, %s3891_s11  ;;  %s31_s15 = sadd.s32 1, %s3895_s12  ;;  %s3899_s13 = sphi %s3967_s13, %s19_s13   ;;  %s3895_s12 = sphi %s3965_s12, %s5118_s12   ;;  %s3891_s11 = sphi %s3963_s11, %s5117_s11   ;;  %s3887_s10 = sphi %s3961_s10, %s5116_s10   ;;  %s3883_s30 = sphi %s3959_s30, %s5115_s30  }
   0x4   : > { %p29_p0 = scmp.ge.s32.totalorder %s28_s14, 2  ;;  %p3226_p1 = scmp.ge.s32.totalorder %s3899_s13, 1 }
   0x5   : > { %p320_p2 = scmp.lt.s32.totalorder %s3899_s13, 5 }
   0x6   : > { %s5120_s14 = smov (%p29_p0, %s28_s14), 0  ;;  %s5122_s15 = smov (!%p29_p0, %s31_s15), %s3895_s12 }
   0x7   : > { %p321_p3 = pnand %p3226_p1, %p320_p2  ;;  %p33_p4 = scmp.ge.s32.totalorder %s5122_s15, 2 }
   0x8   : > { %s3227_s16 = sshll.u32 (!%p321_p3), %s3883_s30, 4  ;;  %p371_p5 = scmp.lt.s32.totalorder (!%p321_p3), %s3887_s10, 1 }
   0x9   : > { %s5124_s15 = smov (%p33_p4, %s5122_s15), 0  ;;  %324 = sbr.rel (%p321_p3) target bundleno = 2450 (0x992), region = 56 }
   0xa   : > { %p373_p6 = scmp.lt.s32.totalorder (!%p321_p3), %s3227_s16, 31  ;;  %s3903_s24 = smov (!%p321_p3), 96  }
   0xb   : > { %s3904_s25 = smov (!%p321_p3), 64   ;;  %s3230_s26 = sshll.u32 (!%p321_p3), %s3883_s30, 3 }
   0xc   : > { %p381_p7 = scmp.lt.s32.totalorder (!%p321_p3), %s3230_s26, 15  ;;  %s3905_s21 = smov (!%p321_p3), 80  }
   0xe   : > { %s5126_s10 = smov (!%p371_p5, %s3887_s10), 1  ;;  %s5128_s16 = smov (!%p373_p6, %s3227_s16), 31  ;;  %vm414_vm0 = vcmask 261120   ;;  %vm3902_vm1 = vmmov 0   ;;  %vm823_vm2 = vcmask 130048  }
   0xf   : > { %s3228_s17 = sshll.u32 %s5126_s10, 5  ;;  %s5130_s26 = smov (!%p381_p7, %s3230_s26), 15 }
  0x10   : > { %s3992_s18 = sadd.s32 %s3228_s17, %s5128_s16  ;;  %s3292_s27 = sshll.u32 %s5130_s26, 4 }
  0x11   : > { %s3229_s19 = sshll.u32 %s3992_s18, 3  ;;  %s4335_s10 = scalar_lea.vmem %s5111_s6, %s3292_s27 }
  0x12   : > { %s4000_s22 = scalar_lea.vmem %s5105_s0, %s3229_s19  ;;  %s3907_s27 = smov 48  }
  0x13   : > { %v398_v0 = vld [vmem:[%s4000_s22] sm:$0xff]  ;;  %v400_v1 = vld [vmem:[%s4000_s22 + $0x10] sm:$0xff]  ;;  %v399_v2 = vld [vmem:[%s4000_s22 + $0x8] sm:$0xff]  ;;  %s3908_s17 = smov 16  }
  0x14   : > { %v415_v3 = vsel %vm414_vm0, %v398_v0, 0.0  ;;  %v421_v4 = vsel %vm414_vm0, %v400_v1, 0.0  ;;  %v401_v5 = vld [vmem:[%s4000_s22 + $0x18] sm:$0xff]  ;;  %v418_v6 = vsel %vm414_vm0, %v399_v2, 0.0  ;;  %v402_v8 = vld [vmem:[%s4000_s22 + $0x20] sm:$0xff]  ;;  %v403_v9 = vld [vmem:[%s4000_s22 + $0x28] sm:$0xff] }
  0x15   : > { %416 = vadd.xlane.f32.xlu0 %v415_v3  ;;  %422 = vadd.xlane.f32.xlu1 %v421_v4  ;;  %v424_v7 = vsel %vm414_vm0, %v401_v5, 0.0  ;;  %v427_v10 = vsel %vm414_vm0, %v402_v8, 0.0  ;;  %v430_v11 = vsel %vm414_vm0, %v403_v9, 0.0  ;;  %v4015_v12 = vld [vmem:[%s4000_s22 + $0x30] sm:$0xff]  ;;  %v4018_v13 = vld [vmem:[%s4000_s22 + $0x38] sm:$0xff]  ;;  %v4025_v16 = vld [vmem:[%s4000_s22 + $0x40] sm:$0xff] }
  0x16   : > { %v433_v14 = vsel %vm414_vm0, %v4015_v12, 0.0  ;;  %v436_v15 = vsel %vm414_vm0, %v4018_v13, 0.0  ;;  %v4028_v17 = vld [vmem:[%s4000_s22 + $0x48] sm:$0xff]  ;;  %v439_v18 = vsel %vm414_vm0, %v4025_v16, 0.0  ;;  %v4035_v20 = vld [vmem:[%s4000_s22 + $0x50] sm:$0xff]  ;;  %v4038_v21 = vld [vmem:[%s4000_s22 + $0x58] sm:$0xff] }
  0x17   : > { %v442_v19 = vsel %vm414_vm0, %v4028_v17, 0.0  ;;  %v445_v22 = vsel %vm414_vm0, %v4035_v20, 0.0  ;;  %v448_v23 = vsel %vm414_vm0, %v4038_v21, 0.0  ;;  %v4045_v24 = vld [vmem:[%s4000_s22 + $0x60] sm:$0xff]  ;;  %v4048_v25 = vld [vmem:[%s4000_s22 + $0x68] sm:$0xff]  ;;  %v4055_v28 = vld [vmem:[%s4000_s22 + $0x70] sm:$0xff] }
  0x18   : > { %v451_v26 = vsel %vm414_vm0, %v4045_v24, 0.0  ;;  %v454_v27 = vsel %vm414_vm0, %v4048_v25, 0.0  ;;  %v4058_v29 = vld [vmem:[%s4000_s22 + $0x78] sm:$0xff]  ;;  %v457_v30 = vsel %vm414_vm0, %v4055_v28, 0.0  ;;  %s3906_s22 = smov 112  }
  0x19   : > { %419 = vadd.xlane.f32.xlu0 %v418_v6  ;;  %425 = vadd.xlane.f32.xlu1 %v424_v7  ;;  %v460_v31 = vsel %vm414_vm0, %v4058_v29, 0.0 }
  0x1d   : > { %428 = vadd.xlane.f32.xlu0 %v427_v10  ;;  %431 = vadd.xlane.f32.xlu1 %v430_v11 }
  0x21   : > { %434 = vadd.xlane.f32.xlu0 %v433_v14  ;;  %437 = vadd.xlane.f32.xlu1 %v436_v15 }
  0x25   : > { %440 = vadd.xlane.f32.xlu0 %v439_v18  ;;  %443 = vadd.xlane.f32.xlu1 %v442_v19 }
  0x29   : > { %446 = vadd.xlane.f32.xlu0 %v445_v22  ;;  %449 = vadd.xlane.f32.xlu1 %v448_v23 }
  0x2d   : > { %452 = vadd.xlane.f32.xlu0 %v451_v26  ;;  %455 = vadd.xlane.f32.xlu1 %v454_v27 }
  0x31   : > { %458 = vadd.xlane.f32.xlu0 %v457_v30  ;;  %461 = vadd.xlane.f32.xlu1 %v460_v31 }
  0x9e   : > { %v417_v32 = vpop.xlane.xlu0 %416  ;;  %v423_v33 = vpop.xlane.xlu1 %422 }
  0x9f   : > { %v464_v34 = vmul.f32 0.03125, %v417_v32  ;;  %v466_v35 = vmul.f32 0.03125, %v423_v33 }
  0xa1   : > { %v4064_v36 = vsub.f32 %v398_v0, %v464_v34  ;;  %v4066_v37 = vsub.f32 %v400_v1, %v466_v35 }
  0xa2   : > { %v420_v38 = vpop.xlane.xlu0 %419  ;;  %v426_v39 = vpop.xlane.xlu1 %425 }
  0xa3   : > { %v465_v40 = vmul.f32 0.03125, %v420_v38  ;;  %v467_v41 = vmul.f32 0.03125, %v426_v39  ;;  %v496_v42 = vmul.f32 %v4064_v36, %v4064_v36  ;;  %v498_v43 = vmul.f32 %v4066_v37, %v4066_v37 }
  0xa5   : > { %v4072_v44 = vsub.f32 %v399_v2, %v465_v40  ;;  %v4074_v45 = vsub.f32 %v401_v5, %v467_v41  ;;  %v512_v46 = vsel %vm414_vm0, %v496_v42, 0.0  ;;  %v518_v49 = vsel %vm414_vm0, %v498_v43, 0.0 }
  0xa6   : > { %513 = vadd.xlane.f32.xlu0 %v512_v46  ;;  %v429_v47 = vpop.xlane.xlu0 %428  ;;  %v432_v48 = vpop.xlane.xlu1 %431 }
  0xa7   : > { %v468_v50 = vmul.f32 0.03125, %v429_v47  ;;  %v469_v51 = vmul.f32 0.03125, %v432_v48  ;;  %v497_v52 = vmul.f32 %v4072_v44, %v4072_v44  ;;  %v499_v53 = vmul.f32 %v4074_v45, %v4074_v45 }
  0xa9   : > { %v4082_v54 = vsub.f32 %v402_v8, %v468_v50  ;;  %v4084_v55 = vsub.f32 %v403_v9, %v469_v51  ;;  %v515_v56 = vsel %vm414_vm0, %v497_v52, 0.0  ;;  %v521_v59 = vsel %vm414_vm0, %v499_v53, 0.0  ;;  %v681_v53 = vld [vmem:[%s5108_s3 + $0x18] sm:$0xff] }
  0xaa   : > { %519 = vadd.xlane.f32.xlu0 %v518_v49  ;;  %516 = vadd.xlane.f32.xlu1 %v515_v56  ;;  %v435_v57 = vpop.xlane.xlu0 %434  ;;  %v438_v58 = vpop.xlane.xlu1 %437 }
  0xab   : > { %v470_v60 = vmul.f32 0.03125, %v435_v57  ;;  %v471_v61 = vmul.f32 0.03125, %v438_v58  ;;  %v500_v62 = vmul.f32 %v4082_v54, %v4082_v54  ;;  %v501_v63 = vmul.f32 %v4084_v55, %v4084_v55  ;;  %v678_v57 = vld [vmem:[%s5108_s3] sm:$0xff]  ;;  %v679_v58 = vld [vmem:[%s5108_s3 + $0x8] sm:$0xff] }
  0xad   : > { %v4093_v0 = vsub.f32 %v4015_v12, %v470_v60  ;;  %v4096_v1 = vsub.f32 %v4018_v13, %v471_v61  ;;  %v524_v2 = vsel %vm414_vm0, %v500_v62, 0.0  ;;  %v527_v5 = vsel %vm414_vm0, %v501_v63, 0.0 }
  0xae   : > { %522 = vadd.xlane.f32.xlu1 %v521_v59  ;;  %525 = vadd.xlane.f32.xlu0 %v524_v2  ;;  %v441_v3 = vpop.xlane.xlu0 %440  ;;  %v444_v4 = vpop.xlane.xlu1 %443  ;;  %v682_v59 = vpack.c.bf16 %v679_v58, %v678_v57 }
  0xaf   : > { %v472_v6 = vmul.f32 0.03125, %v441_v3  ;;  %v473_v7 = vmul.f32 0.03125, %v444_v4  ;;  %v502_v8 = vmul.f32 %v4093_v0, %v4093_v0  ;;  %v503_v9 = vmul.f32 %v4096_v1, %v4096_v1 }
  0xb1   : > { %v4105_v10 = vsub.f32 %v4025_v16, %v472_v6  ;;  %v4108_v11 = vsub.f32 %v4028_v17, %v473_v7  ;;  %v530_v12 = vsel %vm414_vm0, %v502_v8, 0.0  ;;  %v533_v15 = vsel %vm414_vm0, %v503_v9, 0.0 }
  0xb2   : > { %528 = vadd.xlane.f32.xlu1 %v527_v5  ;;  %531 = vadd.xlane.f32.xlu0 %v530_v12  ;;  %v447_v13 = vpop.xlane.xlu0 %446  ;;  %v450_v14 = vpop.xlane.xlu1 %449 }
  0xb3   : > { %v474_v18 = vmul.f32 0.03125, %v447_v13  ;;  %v475_v19 = vmul.f32 0.03125, %v450_v14  ;;  %v504_v22 = vmul.f32 %v4105_v10, %v4105_v10  ;;  %v505_v16 = vmul.f32 %v4108_v11, %v4108_v11 }
  0xb5   : > { %v4117_v23 = vsub.f32 %v4035_v20, %v474_v18  ;;  %v4120_v17 = vsub.f32 %v4038_v21, %v475_v19  ;;  %v536_v26 = vsel %vm414_vm0, %v504_v22, 0.0  ;;  %v539_v31 = vsel %vm414_vm0, %v505_v16, 0.0 }
  0xb6   : > { %534 = vadd.xlane.f32.xlu1 %v533_v15  ;;  %537 = vadd.xlane.f32.xlu0 %v536_v26  ;;  %v453_v27 = vpop.xlane.xlu0 %452  ;;  %v456_v30 = vpop.xlane.xlu1 %455 }
  0xb7   : > { %v476_v32 = vmul.f32 0.03125, %v453_v27  ;;  %v477_v33 = vmul.f32 0.03125, %v456_v30  ;;  %v506_v34 = vmul.f32 %v4117_v23, %v4117_v23  ;;  %v507_v20 = vmul.f32 %v4120_v17, %v4120_v17 }
  0xb9   : > { %v4129_v35 = vsub.f32 %v4045_v24, %v476_v32  ;;  %v4132_v21 = vsub.f32 %v4048_v25, %v477_v33  ;;  %v542_v38 = vsel %vm414_vm0, %v506_v34, 0.0  ;;  %v545_v41 = vsel %vm414_vm0, %v507_v20, 0.0 }
  0xba   : > { %540 = vadd.xlane.f32.xlu1 %v539_v31  ;;  %543 = vadd.xlane.f32.xlu0 %v542_v38  ;;  %v459_v39 = vpop.xlane.xlu0 %458  ;;  %v462_v40 = vpop.xlane.xlu1 %461 }
  0xbb   : > { %v478_v42 = vmul.f32 0.03125, %v459_v39  ;;  %v479_v43 = vmul.f32 0.03125, %v462_v40  ;;  %v508_v46 = vmul.f32 %v4129_v35, %v4129_v35  ;;  %v509_v24 = vmul.f32 %v4132_v21, %v4132_v21  ;;  %v4170_v39 = vld [vmem:[%s5106_s1] ss:$0 sm:$0xff] }
  0xbd   : > { %v4141_v47 = vsub.f32 %v4055_v28, %v478_v42  ;;  %v4144_v25 = vsub.f32 %v4058_v29, %v479_v43  ;;  %v548_v48 = vsel %vm414_vm0, %v508_v46, 0.0  ;;  %v551_v49 = vsel %vm414_vm0, %v509_v24, 0.0  ;;  %v680_v29 = vld [vmem:[%s5108_s3 + $0x10] sm:$0xff] }
  0xbe   : > { %546 = vadd.xlane.f32.xlu1 %v545_v41  ;;  %549 = vadd.xlane.f32.xlu0 %v548_v48  ;;  %v683_v56 = vpack.c.bf16 %v681_v53, %v680_v29 }
  0xbf   : > { %v510_v50 = vmul.f32 %v4141_v47, %v4141_v47  ;;  %v511_v51 = vmul.f32 %v4144_v25, %v4144_v25 }
  0xc0   : > { %3377 = vmatprep.subr.bf16.mxu0 %v683_v56  ;;  %3609 = vmatprep.subr.bf16.mxu1 %v683_v56 }
  0xc1   : > { %v554_v52 = vsel %vm414_vm0, %v510_v50, 0.0  ;;  %v557_v28 = vsel %vm414_vm0, %v511_v51, 0.0  ;;  %3378 = vmatpush3.bf16.msra.mxu0 %v683_v56  ;;  %3611 = vmatpush3.bf16.msra.mxu1 %v683_v56 }
  0xc2   : > { %552 = vadd.xlane.f32.xlu1 %v551_v49  ;;  %555 = vadd.xlane.f32.xlu0 %v554_v52 }
  0xc3   : > { %3379 = vmatprep.subr.bf16.mxu0 %v682_v59  ;;  %3610 = vmatprep.subr.bf16.mxu1 %v682_v59 }
  0xc5   : > { %3380 = vmatpush3.bf16.msra.mxu0 %v682_v59  ;;  %3612 = vmatpush3.bf16.msra.mxu1 %v682_v59 }
  0xc6   : > { %558 = vadd.xlane.f32.xlu1 %v557_v28 }
 0x12f   : > { %v514_v60 = vpop.xlane.xlu0 %513 }
 0x130   : > { %v560_v61 = vmul.f32 0.03125, %v514_v60 }
 0x132   : > { %v576_v62 = vadd.f32 1e-05, %v560_v61 }
 0x133   : > { %v517_v63 = vpop.xlane.xlu1 %516  ;;  %v520_v2 = vpop.xlane.xlu0 %519 }
 0x134   : > { %3701 = vrsqrt.f32 %v576_v62  ;;  %v561_v3 = vmul.f32 0.03125, %v517_v63  ;;  %v562_v4 = vmul.f32 0.03125, %v520_v2 }
 0x136   : > { %v577_v5 = vadd.f32 1e-05, %v561_v3  ;;  %v578_v6 = vadd.f32 1e-05, %v562_v4 }
 0x137   : > { %v523_v7 = vpop.xlane.xlu1 %522  ;;  %v526_v8 = vpop.xlane.xlu0 %525 }
 0x138   : > { %3703 = vrsqrt.f32 %v577_v5  ;;  %v563_v9 = vmul.f32 0.03125, %v523_v7  ;;  %v564_v12 = vmul.f32 0.03125, %v526_v8 }
 0x139   : > { %3705 = vrsqrt.f32 %v578_v6 }
 0x13a   : > { %v579_v13 = vadd.f32 1e-05, %v563_v9  ;;  %v580_v14 = vadd.f32 1e-05, %v564_v12 }
 0x13b   : > { %v529_v15 = vpop.xlane.xlu1 %528  ;;  %v532_v18 = vpop.xlane.xlu0 %531 }
 0x13c   : > { %3707 = vrsqrt.f32 %v579_v13  ;;  %v565_v19 = vmul.f32 0.03125, %v529_v15  ;;  %v566_v22 = vmul.f32 0.03125, %v532_v18 }
 0x13d   : > { %3709 = vrsqrt.f32 %v580_v14 }
 0x13e   : > { %v581_v16 = vadd.f32 1e-05, %v565_v19  ;;  %v582_v26 = vadd.f32 1e-05, %v566_v22 }
 0x13f   : > { %v535_v27 = vpop.xlane.xlu1 %534  ;;  %v538_v30 = vpop.xlane.xlu0 %537 }
 0x140   : > { %3711 = vrsqrt.f32 %v581_v16  ;;  %v567_v31 = vmul.f32 0.03125, %v535_v27  ;;  %v568_v32 = vmul.f32 0.03125, %v538_v30 }
 0x141   : > { %v3702_v33 = vpop.eup %3701  ;;  %3713 = vrsqrt.f32 %v582_v26 }
 0x142   : > { %v583_v34 = vadd.f32 1e-05, %v567_v31  ;;  %v584_v20 = vadd.f32 1e-05, %v568_v32  ;;  %v608_v38 = vmul.f32 %v3702_v33, %v4064_v36  ;;  %v4177_v36 = vld [vmem:[%s5107_s2] ss:$0 sm:$0xff] }
 0x143   : > { %v541_v40 = vpop.xlane.xlu1 %540  ;;  %v544_v41 = vpop.xlane.xlu0 %543 }
 0x144   : > { %3715 = vrsqrt.f32 %v583_v34  ;;  %v569_v42 = vmul.f32 0.03125, %v541_v40  ;;  %v570_v43 = vmul.f32 0.03125, %v544_v41  ;;  %v631_v24 = vmul.f32 %v4170_v39, %v608_v38 }
 0x145   : > { %v3704_v46 = vpop.eup %3703  ;;  %3717 = vrsqrt.f32 %v584_v20 }
 0x146   : > { %v3706_v48 = vpop.eup %3705  ;;  %v585_v49 = vadd.f32 1e-05, %v569_v42  ;;  %v586_v50 = vadd.f32 1e-05, %v570_v43  ;;  %v609_v51 = vmul.f32 %v3704_v46, %v4072_v44  ;;  %v654_v59 = vadd.f32 %v4177_v36, %v631_v24 }
 0x147   : > { %v547_v52 = vpop.xlane.xlu1 %546  ;;  %v550_v28 = vpop.xlane.xlu0 %549  ;;  %v610_v29 = vmul.f32 %v3706_v48, %v4066_v37 }
 0x148   : > { %3719 = vrsqrt.f32 %v585_v49  ;;  %v571_v53 = vmul.f32 0.03125, %v547_v52  ;;  %v572_v56 = vmul.f32 0.03125, %v550_v28  ;;  %v632_v57 = vmul.f32 %v4170_v39, %v609_v51 }
 0x149   : > { %v3708_v58 = vpop.eup %3707  ;;  %3721 = vrsqrt.f32 %v586_v50  ;;  %v633_v37 = vmul.f32 %v4170_v39, %v610_v29 }
 0x14a   : > { %v3710_v60 = vpop.eup %3709  ;;  %v587_v44 = vadd.f32 1e-05, %v571_v53  ;;  %v588_v61 = vadd.f32 1e-05, %v572_v56  ;;  %v655_v62 = vadd.f32 %v4177_v36, %v632_v57  ;;  %v611_v63 = vmul.f32 %v3708_v58, %v4074_v45 }
 0x14b   : > { %v553_v2 = vpop.xlane.xlu1 %552  ;;  %v556_v3 = vpop.xlane.xlu0 %555  ;;  %v612_v4 = vmul.f32 %v3710_v60, %v4082_v54  ;;  %v656_v54 = vadd.f32 %v4177_v36, %v633_v37 }
 0x14c   : > { %3723 = vrsqrt.f32 %v587_v44  ;;  %v573_v5 = vmul.f32 0.03125, %v553_v2  ;;  %v574_v6 = vmul.f32 0.03125, %v556_v3  ;;  %v670_v7 = vpack.c.bf16 %v655_v62, %v654_v59 }
 0x14d   : > { %v3712_v8 = vpop.eup %3711  ;;  %3725 = vrsqrt.f32 %v588_v61  ;;  %v634_v9 = vmul.f32 %v4170_v39, %v611_v63  ;;  %v635_v12 = vmul.f32 %v4170_v39, %v612_v4 }
 0x14e   : > { %v3714_v13 = vpop.eup %3713  ;;  %v589_v14 = vadd.f32 1e-05, %v573_v5  ;;  %v590_v15 = vadd.f32 1e-05, %v574_v6  ;;  %3381 = vmatprep.mubr.msk.bf16.mxu0 %vm414_vm0, %v670_v7  ;;  %v613_v45 = vmul.f32 %v3712_v8, %v4084_v55  ;;  %v3901_v8 = vmov 0.0  }
 0x14f   : > { %v559_v18 = vpop.xlane.xlu1 %558  ;;  %v657_v19 = vadd.f32 %v4177_v36, %v634_v9  ;;  %v614_v22 = vmul.f32 %v3714_v13, %v4093_v0  ;;  %v658_v31 = vadd.f32 %v4177_v36, %v635_v12  ;;  %3397 = vmatprep.subr.bf16.mxu1 %v3901_v8  ;;  %3421 = vmatprep.subr.bf16.mxu0 %v3901_v8  ;;  %v3238_v9 = vld [vmem:[%s5109_s4] ss:$0 sm:$0xff] }
 0x150   : > { %3727 = vrsqrt.f32 %v589_v14  ;;  %v575_v16 = vmul.f32 0.03125, %v559_v18  ;;  %v636_v26 = vmul.f32 %v4170_v39, %v613_v45 }
 0x151   : > { %v3716_v27 = vpop.eup %3715  ;;  %3729 = vrsqrt.f32 %v590_v15  ;;  %v671_v30 = vpack.c.bf16 %v657_v19, %v656_v54  ;;  %v637_v20 = vmul.f32 %v4170_v39, %v614_v22 }
 0x152   : > { %v3718_v32 = vpop.eup %3717  ;;  %v591_v33 = vadd.f32 1e-05, %v575_v16  ;;  %v659_v55 = vadd.f32 %v4177_v36, %v636_v26  ;;  %v615_v34 = vmul.f32 %v3716_v27, %v4096_v1 }
 0x153   : > { %3382 = vmatmul.mubr.msk.bf16.vlgmr.msra.gmra.mxu0 %vm414_vm0, %v671_v30  ;;  %v616_v0 = vmul.f32 %v3718_v32, %v4105_v10  ;;  %v660_v43 = vadd.f32 %v4177_v36, %v637_v20 }
 0x154   : > { %3731 = vrsqrt.f32 %v591_v33  ;;  %v672_v38 = vpack.c.bf16 %v659_v55, %v658_v31  ;;  %v638_v40 = vmul.f32 %v4170_v39, %v615_v34 }
 0x155   : > { %v3720_v41 = vpop.eup %3719  ;;  %v639_v24 = vmul.f32 %v4170_v39, %v616_v0 }
 0x156   : > { %v3722_v42 = vpop.eup %3721  ;;  %3385 = vmatprep.mubr.msk.bf16.mxu0 %vm414_vm0, %v672_v38  ;;  %v661_v46 = vadd.f32 %v4177_v36, %v638_v40  ;;  %v617_v1 = vmul.f32 %v3720_v41, %v4108_v11 }
 0x157   : > { %v618_v48 = vmul.f32 %v3722_v42, %v4117_v23  ;;  %v662_v52 = vadd.f32 %v4177_v36, %v639_v24 }
 0x158   : > { %v673_v49 = vpack.c.bf16 %v661_v46, %v660_v43  ;;  %v640_v10 = vmul.f32 %v4170_v39, %v617_v1 }
 0x159   : > { %v3724_v50 = vpop.eup %3723  ;;  %v641_v53 = vmul.f32 %v4170_v39, %v618_v48 }
 0x15a   : > { %v3726_v51 = vpop.eup %3725  ;;  %v663_v28 = vadd.f32 %v4177_v36, %v640_v10  ;;  %v619_v29 = vmul.f32 %v3724_v50, %v4120_v17 }
 0x15b   : > { %3386 = vmatmul.mubr.msk.bf16.gmra.mxu0 %vm414_vm0, %v673_v49  ;;  %v620_v11 = vmul.f32 %v3726_v51, %v4129_v35  ;;  %v664_v59 = vadd.f32 %v4177_v36, %v641_v53 }
 0x15c   : > { %v674_v56 = vpack.c.bf16 %v663_v28, %v662_v52  ;;  %v642_v23 = vmul.f32 %v4170_v39, %v619_v29  ;;  %3423 = vmatprep.mubr.msk.bf16.mxu0 %vm3902_vm1, %v3901_v8 }
 0x15d   : > { %v3728_v57 = vpop.eup %3727  ;;  %v643_v17 = vmul.f32 %v4170_v39, %v620_v11 }
 0x15e   : > { %v3730_v58 = vpop.eup %3729  ;;  %3389 = vmatprep.mubr.msk.bf16.mxu1 %vm414_vm0, %v674_v56  ;;  %v665_v60 = vadd.f32 %v4177_v36, %v642_v23  ;;  %v621_v44 = vmul.f32 %v3728_v57, %v4132_v21 }
 0x15f   : > { %v622_v61 = vmul.f32 %v3730_v58, %v4141_v47  ;;  %v666_v2 = vadd.f32 %v4177_v36, %v643_v17 }
 0x160   : > { %v675_v62 = vpack.c.bf16 %v665_v60, %v664_v59  ;;  %v644_v35 = vmul.f32 %v4170_v39, %v621_v44 }
 0x161   : > { %v3732_v63 = vpop.eup %3731  ;;  %v645_v4 = vmul.f32 %v4170_v39, %v622_v61 }
 0x162   : > { %3390 = vmatmul.mubr.msk.bf16.vlgmr.msra.gmra.mxu1 %vm414_vm0, %v675_v62  ;;  %v667_v3 = vadd.f32 %v4177_v36, %v644_v35  ;;  %v623_v37 = vmul.f32 %v3732_v63, %v4144_v25 }
 0x163   : > { %v668_v47 = vadd.f32 %v4177_v36, %v645_v4 }
 0x164   : > { %v676_v5 = vpack.c.bf16 %v667_v3, %v666_v2  ;;  %v646_v21 = vmul.f32 %v4170_v39, %v623_v37 }
 0x166   : > { %3393 = vmatprep.mubr.msk.bf16.mxu1 %vm414_vm0, %v676_v5  ;;  %v669_v6 = vadd.f32 %v4177_v36, %v646_v21 }
 0x168   : > { %v677_v7 = vpack.c.bf16 %v669_v6, %v668_v47  ;;  %v4340_v47 = vld [vmem:[%s5110_s5] sm:$0xff] }
 0x16a   : > { %3394 = vmatmul.mubr.msk.bf16.gmra.mxu1 %vm414_vm0, %v677_v7 }
 0x16b   : > { %3399 = vmatprep.mubr.msk.bf16.mxu1 %vm3902_vm1, %v3901_v8 }
 0x213   : > { %v3383_v25 = vpop.f32.mrf.mxu0 }
 0x214   : > { %v758_v13 = vadd.f32 %v3383_v25, %v3238_v9  ;;  %v4343_v25 = vld [vmem:[%s4335_s10] sm:$0xff] }
 0x215   : > { %v749_v39 = vpop.f32.mrf.mxu0 }
 0x216   : > { %v750_v15 = vadd.f32 %v3238_v9, %v749_v39 }
 0x217   : > { %v3384_v12 = vpop.f32.mrf.mxu0 }
 0x218   : > { %v761_v14 = vadd.f32 %v3384_v12, %v3238_v9  ;;  %v4349_v12 = vld [vmem:[%s5110_s5 + $0x8] sm:$0xff] }
 0x219   : > { %v752_v36 = vpop.f32.mrf.mxu0 }
 0x21a   : > { %v4241_v45 = vpack.c.bf16 %v761_v14, %v758_v13  ;;  %v753_v18 = vadd.f32 %v3238_v9, %v752_v36 }
 0x21b   : > { %v3387_v54 = vpop.f32.mrf.mxu0 }
 0x21c   : > { %v4243_v19 = vpack.c.bf16 %v753_v18, %v750_v15  ;;  %872 = vrot.lane.b32.xlu1 %v4241_v45, %s3903_s24  ;;  %v774_v34 = vadd.f32 %v3387_v54, %v3238_v9  ;;  %v4355_v15 = vld [vmem:[%s4335_s10 + $0x8] sm:$0xff] }
 0x21d   : > { %v765_v22 = vpop.f32.mrf.mxu0 }
 0x21e   : > { %821 = vrot.lane.b32.xlu0 %v4243_v19, %s3903_s24  ;;  %v766_v27 = vadd.f32 %v3238_v9, %v765_v22 }
 0x21f   : > { %v3388_v16 = vpop.f32.mrf.mxu0 }
 0x220   : > { %v777_v32 = vadd.f32 %v3388_v16, %v3238_v9 }
 0x221   : > { %v768_v26 = vpop.f32.mrf.mxu0 }
 0x222   : > { %v769_v30 = vadd.f32 %v3238_v9, %v768_v26  ;;  %v3391_v31 = vpop.f32.mrf.mxu1  ;;  %v4253_v0 = vpack.c.bf16 %v777_v32, %v774_v34 }
 0x223   : > { %v790_v43 = vadd.f32 %v3391_v31, %v3238_v9 }
 0x224   : > { %v4249_v33 = vpack.c.bf16 %v769_v30, %v766_v27  ;;  %v781_v55 = vpop.f32.mrf.mxu1 }
 0x225   : > { %v782_v41 = vadd.f32 %v3238_v9, %v781_v55 }
 0x226   : > { %922 = vrot.lane.b32.xlu1 %v4249_v33, %s3903_s24  ;;  %v3392_v20 = vpop.f32.mrf.mxu1 }
 0x227   : > { %v793_v38 = vadd.f32 %v3392_v20, %v3238_v9 }
 0x228   : > { %v784_v40 = vpop.f32.mrf.mxu1 }
 0x229   : > { %v785_v42 = vadd.f32 %v3238_v9, %v784_v40  ;;  %v4259_v24 = vpack.c.bf16 %v793_v38, %v790_v43  ;;  %v4366_v40 = vld [vmem:[%s4335_s10 + $0x40] sm:$0xff] }
 0x22a   : > { %972 = vrot.lane.b32.xlu1 %v4253_v0, %s3903_s24  ;;  %v3395_v46 = vpop.f32.mrf.mxu1 }
 0x22b   : > { %v4257_v1 = vpack.c.bf16 %v785_v42, %v782_v41  ;;  %v806_v10 = vadd.f32 %v3395_v46, %v3238_v9 }
 0x22c   : > { %v797_v48 = vpop.f32.mrf.mxu1 }
 0x22d   : > { %1022 = vrot.lane.b32.xlu0 %v4257_v1, %s3903_s24  ;;  %v798_v52 = vadd.f32 %v3238_v9, %v797_v48  ;;  %v4371_v48 = vld [vmem:[%s4335_s10 + $0x10] sm:$0xff] }
 0x22e   : > { %1072 = vrot.lane.b32.xlu1 %v4259_v24, %s3903_s24  ;;  %v3396_v49 = vpop.f32.mrf.mxu1 }
 0x22f   : > { %v809_v50 = vadd.f32 %v3396_v49, %v3238_v9 }
 0x230   : > { %v800_v51 = vpop.f32.mrf.mxu1 }
 0x231   : > { %v4265_v28 = vpack.c.bf16 %v809_v50, %v806_v10  ;;  %v801_v29 = vadd.f32 %v3238_v9, %v800_v51 }
 0x233   : > { %v4267_v53 = vpack.c.bf16 %v801_v29, %v798_v52  ;;  %1172 = vrot.lane.b32.xlu1 %v4265_v28, %s3903_s24  ;;  %v4377_v29 = vld [vmem:[%s4335_s10 + $0x48] sm:$0xff] }
 0x235   : > { %1122 = vrot.lane.b32.xlu0 %v4267_v53, %s3903_s24 }
 0x237   : > { %1518 = vrot.lane.b32.xlu1 %v4241_v45, %s3904_s25 }
 0x239   : > { %1471 = vrot.lane.b32.xlu0 %v4243_v19, %s3904_s25 }
 0x23b   : > { %1612 = vrot.lane.b32.xlu1 %v4253_v0, %s3904_s25 }
 0x23f   : > { %1565 = vrot.lane.b32.xlu1 %v4249_v33, %s3904_s25 }
 0x28e   : > { %v873_v23 = vpop.permute.xlu1 %872 }
 0x28f   : > { %v878_v57 = vsel %vm823_vm2, %v873_v23, 0 }
 0x290   : > { %v822_v11 = vpop.permute.xlu0 %821 }
 0x291   : > { %v828_v56 = vsel %vm823_vm2, %v822_v11, 0 }
 0x292   : > { %3398 = vmatpush3.bf16.xpose.msra.mxu1 %v828_v56 }
 0x293   : > { %3403 = vmatprep.subr.bf16.mxu1 %v3901_v8 }
 0x298   : > { %v923_v58 = vpop.permute.xlu1 %922 }
 0x299   : > { %3400 = vmatmul.mubr.msk.bf16.vlgmr.msra.gmra.mxu1 %vm823_vm2, %v4243_v19  ;;  %v928_v44 = vsel %vm823_vm2, %v923_v58, 0 }
 0x29a   : > { %3404 = vmatpush3.bf16.xpose.msra.mxu1 %v878_v57  ;;  %3405 = vmatprep.mubr.msk.bf16.mxu1 %vm3902_vm1, %v3901_v8 }
 0x29b   : > { %3409 = vmatprep.subr.bf16.mxu1 %v3901_v8 }
 0x29c   : > { %v973_v17 = vpop.permute.xlu1 %972 }
 0x29d   : > { %v978_v35 = vsel %vm823_vm2, %v973_v17, 0 }
 0x29f   : > { %v1023_v59 = vpop.permute.xlu0 %1022 }
 0x2a0   : > { %v1028_v60 = vsel %vm823_vm2, %v1023_v59, 0  ;;  %v1073_v63 = vpop.permute.xlu1 %1072 }
 0x2a1   : > { %3406 = vmatmul.mubr.msk.bf16.vlgmr.msra.gmra.mxu1 %vm823_vm2, %v4241_v45  ;;  %3422 = vmatpush3.bf16.xpose.msra.mxu0 %v1028_v60  ;;  %v1078_v3 = vsel %vm823_vm2, %v1073_v63, 0  ;;  %v4390_v63 = vld [vmem:[%s4335_s10 + $0x60] sm:$0xff] }
 0x2a2   : > { %3410 = vmatpush3.bf16.xpose.msra.mxu1 %v928_v44  ;;  %3411 = vmatprep.mubr.msk.bf16.mxu1 %vm3902_vm1, %v3901_v8 }
 0x2a3   : > { %3415 = vmatprep.subr.bf16.mxu1 %v3901_v8  ;;  %3433 = vmatprep.subr.bf16.mxu0 %v3901_v8 }
 0x2a5   : > { %v1173_v37 = vpop.permute.xlu1 %1172 }
 0x2a6   : > { %v1178_v4 = vsel %vm823_vm2, %v1173_v37, 0 }
 0x2a7   : > { %v1123_v61 = vpop.permute.xlu0 %1122 }
 0x2a8   : > { %v1128_v62 = vsel %vm823_vm2, %v1123_v61, 0  ;;  %3424 = vmatmul.mubr.msk.bf16.vlgmr.msra.gmra.mxu0 %vm823_vm2, %v4257_v1 }
 0x2a9   : > { %3412 = vmatmul.mubr.msk.bf16.vlgmr.msra.gmra.mxu1 %vm823_vm2, %v4249_v33  ;;  %3434 = vmatpush3.bf16.xpose.msra.mxu0 %v1128_v62  ;;  %v1519_v5 = vpop.permute.xlu1 %1518 }
 0x2aa   : > { %3416 = vmatpush3.bf16.xpose.msra.mxu1 %v978_v35  ;;  %3417 = vmatprep.mubr.msk.bf16.mxu1 %vm3902_vm1, %v3901_v8 }
 0x2ab   : > { %3435 = vmatprep.mubr.msk.bf16.mxu0 %vm3902_vm1, %v3901_v8  ;;  %3427 = vmatprep.subr.bf16.mxu1 %v3901_v8  ;;  %v1472_v2 = vpop.permute.xlu0 %1471 }
 0x2ac   : > { %3445 = vmatprep.subr.bf16.mxu0 %v3901_v8 }
 0x2b0   : > { %3436 = vmatmul.mubr.msk.bf16.vlgmr.msra.gmra.mxu0 %vm823_vm2, %v4267_v53 }
 0x2b1   : > { %3418 = vmatmul.mubr.msk.bf16.vlgmr.msra.gmra.mxu1 %vm823_vm2, %v4253_v0  ;;  %3446 = vmatpush3.bf16.msra.mxu0 %v1472_v2 }
 0x2b2   : > { %3428 = vmatpush3.bf16.xpose.msra.mxu1 %v1078_v3  ;;  %3429 = vmatprep.mubr.msk.bf16.mxu1 %vm3902_vm1, %v3901_v8 }
 0x2b3   : > { %3439 = vmatprep.subr.bf16.mxu1 %v3901_v8  ;;  %3447 = vmatprep.mubr.msk.bf16.mxu0 %vm3902_vm1, %v3901_v8 }
 0x2b4   : > { %3457 = vmatprep.subr.bf16.mxu0 %v3901_v8 }
 0x2b9   : > { %3430 = vmatmul.mubr.msk.bf16.vlgmr.msra.gmra.mxu1 %vm823_vm2, %v4259_v24 }
 0x2ba   : > { %3440 = vmatpush3.bf16.xpose.msra.mxu1 %v1178_v4  ;;  %3441 = vmatprep.mubr.msk.bf16.mxu1 %vm3902_vm1, %v3901_v8 }
 0x2bb   : > { %3451 = vmatprep.subr.bf16.mxu1 %v3901_v8 }
 0x2c1   : > { %3442 = vmatmul.mubr.msk.bf16.vlgmr.msra.gmra.mxu1 %vm823_vm2, %v4265_v28 }
 0x2c2   : > { %3452 = vmatpush3.bf16.msra.mxu1 %v1519_v5  ;;  %3453 = vmatprep.mubr.msk.bf16.mxu1 %vm3902_vm1, %v3901_v8  ;;  %v4398_v5 = vld [vmem:[%s4335_s10 + $0x18] sm:$0xff] }
 0x2c3   : > { %3463 = vmatprep.subr.bf16.mxu1 %v3901_v8 }
 0x359   : > { %v864_v21 = vpop.f32.mrf.mxu1 }
 0x35a   : > { %v1221_v6 = vmul.f32 0.25, %v864_v21 }
 0x35b   : > { %v3401_v7 = vpop.f32.mrf.mxu1 }
 0x35c   : > { %v1239_v9 = vadd.f32 %v4340_v47, %v1221_v6 }
 0x35d   : > { %v867_v39 = vpop.f32.mrf.mxu1 }
 0x35e   : > { %v1222_v13 = vmul.f32 0.25, %v867_v39  ;;  %v4352_v14 = vadd.f32 %v4343_v25, %v1239_v9 }
 0x35f   : > { %v3402_v36 = vpop.f32.mrf.mxu1 }
 0x360   : > { %v1240_v18 = vadd.f32 %v4349_v12, %v1222_v13  ;;  %v1287_v54 = vsel %vm823_vm2, %v4352_v14, -inf }
 0x361   : > { %1288 = vmax.xlane.f32.xlu0 %v1287_v54  ;;  %v914_v22 = vpop.f32.mrf.mxu1  ;;  %v4409_v54 = vld [vmem:[%s4335_s10 + $0x68] sm:$0xff] }
 0x362   : > { %v4361_v16 = vadd.f32 %v4355_v15, %v1240_v18  ;;  %v1223_v31 = vmul.f32 0.25, %v914_v22 }
 0x363   : > { %v3407_v26 = vpop.f32.mrf.mxu1 }
 0x364   : > { %v1290_v27 = vsel %vm823_vm2, %v4361_v16, -inf  ;;  %v1241_v41 = vadd.f32 %v4340_v47, %v1223_v31 }
 0x365   : > { %1291 = vmax.xlane.f32.xlu1 %v1290_v27  ;;  %v917_v30 = vpop.f32.mrf.mxu1 }
 0x366   : > { %v1224_v51 = vmul.f32 0.25, %v917_v30  ;;  %v4383_v57 = vadd.f32 %v4371_v48, %v1241_v41 }
 0x367   : > { %v3408_v32 = vpop.f32.mrf.mxu1 }
 0x368   : > { %v1064_v55 = vpop.f32.mrf.mxu0  ;;  %v1242_v17 = vadd.f32 %v4349_v12, %v1224_v51  ;;  %v1293_v37 = vsel %vm823_vm2, %v4383_v57, -inf  ;;  %v4415_v32 = vld [vmem:[%s4335_s10 + $0x20] sm:$0xff] }
 0x369   : > { %v964_v34 = vpop.f32.mrf.mxu1  ;;  %v1229_v20 = vmul.f32 0.25, %v1064_v55  ;;  %v4418_v55 = vld [vmem:[%s4335_s10 + $0x28] sm:$0xff] }
 0x36a   : > { %v3425_v38 = vpop.f32.mrf.mxu0  ;;  %v1225_v61 = vmul.f32 0.25, %v964_v34  ;;  %v4406_v18 = vadd.f32 %v4398_v5, %v1242_v17 }
 0x36b   : > { %v1247_v42 = vadd.f32 %v4340_v47, %v1229_v20  ;;  %v3413_v43 = vpop.f32.mrf.mxu1 }
 0x36c   : > { %v1067_v46 = vpop.f32.mrf.mxu0  ;;  %v1243_v39 = vadd.f32 %v4340_v47, %v1225_v61  ;;  %v1296_v38 = vsel %vm823_vm2, %v4406_v18, -inf }
 0x36d   : > { %v967_v49 = vpop.f32.mrf.mxu1  ;;  %v1230_v10 = vmul.f32 0.25, %v1067_v46  ;;  %v4374_v50 = vadd.f32 %v4366_v40, %v1247_v42 }
 0x36e   : > { %v3426_v52 = vpop.f32.mrf.mxu0  ;;  %v1226_v62 = vmul.f32 0.25, %v967_v49  ;;  %v4426_v41 = vadd.f32 %v4415_v32, %v1243_v39 }
 0x36f   : > { %v1248_v11 = vadd.f32 %v4349_v12, %v1230_v10  ;;  %v3414_v56 = vpop.f32.mrf.mxu1  ;;  %v1311_v23 = vsel %vm823_vm2, %v4374_v50, -inf  ;;  %v4436_v52 = vld [vmem:[%s4335_s10 + $0x30] sm:$0xff] }
 0x370   : > { %1312 = vmax.xlane.f32.xlu0 %v1311_v23  ;;  %v1164_v58 = vpop.f32.mrf.mxu0  ;;  %v1244_v13 = vadd.f32 %v4349_v12, %v1226_v62 }
 0x371   : > { %v1014_v59 = vpop.f32.mrf.mxu1  ;;  %v1233_v60 = vmul.f32 0.25, %v1164_v58  ;;  %v4386_v44 = vadd.f32 %v4377_v29, %v1248_v11  ;;  %v4439_v11 = vld [vmem:[%s4335_s10 + $0x38] sm:$0xff]  ;;  %v1299_v58 = vsel %vm823_vm2, %v4426_v41, -inf }
 0x372   : > { %v3437_v35 = vpop.f32.mrf.mxu0  ;;  %v1227_v22 = vmul.f32 0.25, %v1014_v59  ;;  %v4429_v42 = vadd.f32 %v4418_v55, %v1244_v13 }
 0x373   : > { %v1251_v2 = vadd.f32 %v4340_v47, %v1233_v60  ;;  %v3419_v3 = vpop.f32.mrf.mxu1  ;;  %v1314_v4 = vsel %vm823_vm2, %v4386_v44, -inf }
 0x374   : > { %1294 = vmax.xlane.f32.xlu0 %v1293_v37  ;;  %1315 = vmax.xlane.f32.xlu1 %v1314_v4  ;;  %v1167_v21 = vpop.f32.mrf.mxu0  ;;  %v1245_v43 = vadd.f32 %v4340_v47, %v1227_v22  ;;  %v1302_v17 = vsel %vm823_vm2, %v4429_v42, -inf  ;;  %v4457_v3 = vld [vmem:[%s4335_s10 + $0x58] sm:$0xff]  ;;  %v4471_v22 = vld [vmem:[%s4335_s10 + $0x70] sm:$0xff] }
 0x375   : > { %v1017_v6 = vpop.f32.mrf.mxu1  ;;  %v1234_v7 = vmul.f32 0.25, %v1167_v21  ;;  %v4401_v9 = vadd.f32 %v4390_v63, %v1251_v2  ;;  %v4454_v2 = vld [vmem:[%s4335_s10 + $0x50] sm:$0xff] }
 0x376   : > { %v3438_v36 = vpop.f32.mrf.mxu0  ;;  %v1228_v26 = vmul.f32 0.25, %v1017_v6  ;;  %v4447_v61 = vadd.f32 %v4436_v52, %v1245_v43 }
 0x377   : > { %v1252_v27 = vadd.f32 %v4349_v12, %v1234_v7  ;;  %v3420_v30 = vpop.f32.mrf.mxu1  ;;  %v1323_v31 = vsel %vm823_vm2, %v4401_v9, -inf }
 0x378   : > { %1324 = vmax.xlane.f32.xlu0 %v1323_v31  ;;  %v1246_v46 = vadd.f32 %v4349_v12, %v1228_v26  ;;  %v1305_v6 = vsel %vm823_vm2, %v4447_v61, -inf }
 0x379   : > { %v1114_v34 = vpop.f32.mrf.mxu1  ;;  %v4421_v20 = vadd.f32 %v4409_v54, %v1252_v27 }
 0x37a   : > { %v1231_v49 = vmul.f32 0.25, %v1114_v34  ;;  %v4450_v62 = vadd.f32 %v4439_v11, %v1246_v46  ;;  %v4488_v46 = vld [vmem:[%s4335_s10 + $0x78] sm:$0xff] }
 0x37b   : > { %v3431_v10 = vpop.f32.mrf.mxu1  ;;  %v1326_v51 = vsel %vm823_vm2, %v4421_v20, -inf }
 0x37c   : > { %1297 = vmax.xlane.f32.xlu0 %v1296_v38  ;;  %1327 = vmax.xlane.f32.xlu1 %v1326_v51  ;;  %v1249_v59 = vadd.f32 %v4340_v47, %v1231_v49  ;;  %v1308_v7 = vsel %vm823_vm2, %v4450_v62, -inf  ;;  %v4495_v51 = vpop.permute.xlu1 %1612 }
 0x37d   : > { %v1117_v56 = vpop.f32.mrf.mxu1 }
 0x37e   : > { %v1232_v23 = vmul.f32 0.25, %v1117_v56  ;;  %v4464_v39 = vadd.f32 %v4454_v2, %v1249_v59 }
 0x37f   : > { %v3432_v60 = vpop.f32.mrf.mxu1 }
 0x380   : > { %v1250_v35 = vadd.f32 %v4349_v12, %v1232_v23  ;;  %1300 = vmax.xlane.f32.xlu0 %v1299_v58  ;;  %1303 = vmax.xlane.f32.xlu1 %v1302_v17  ;;  %v1317_v30 = vsel %vm823_vm2, %v4464_v39, -inf  ;;  %v4497_v56 = vpop.permute.xlu1 %1565 }
 0x381   : > { %v1214_v37 = vpop.f32.mrf.mxu1 }
 0x382   : > { %v1235_v4 = vmul.f32 0.25, %v1214_v37  ;;  %v4467_v13 = vadd.f32 %v4457_v3, %v1250_v35 }
 0x383   : > { %v3443_v21 = vpop.f32.mrf.mxu1 }
 0x384   : > { %v1253_v36 = vadd.f32 %v4340_v47, %v1235_v4  ;;  %1306 = vmax.xlane.f32.xlu0 %v1305_v6  ;;  %1309 = vmax.xlane.f32.xlu1 %v1308_v7  ;;  %v1320_v31 = vsel %vm823_vm2, %v4467_v13, -inf }
 0x385   : > { %v1217_v26 = vpop.f32.mrf.mxu1 }
 0x386   : > { %v4478_v34 = vadd.f32 %v4471_v22, %v1253_v36  ;;  %v1236_v38 = vmul.f32 0.25, %v1217_v26 }
 0x387   : > { %v3444_v27 = vpop.f32.mrf.mxu1 }
 0x388   : > { %1318 = vmax.xlane.f32.xlu0 %v1317_v30  ;;  %1321 = vmax.xlane.f32.xlu1 %v1320_v31  ;;  %v1329_v47 = vsel %vm823_vm2, %v4478_v34, -inf  ;;  %v1254_v43 = vadd.f32 %v4349_v12, %v1236_v38 }
 0x38a   : > { %v4491_v49 = vadd.f32 %v4488_v46, %v1254_v43 }
 0x38c   : > { %1330 = vmax.xlane.f32.xlu0 %v1329_v47  ;;  %v1332_v10 = vsel %vm823_vm2, %v4491_v49, -inf }
 0x399   : > { %1706 = vrot.lane.b32.xlu1 %v4259_v24, %s3904_s25 }
 0x3a2   : > { %1659 = vrot.lane.b32.xlu0 %v4257_v1, %s3904_s25 }
 0x3bd   : > { %1333 = vmax.xlane.f32.xlu1 %v1332_v10 }
 0x3ea   : > { %v1289_v23 = vpop.xlane.xlu0 %1288 }
 0x3eb   : > { %v1335_v58 = vsub.f32 %v4352_v14, %v1289_v23 }
 0x3ed   : > { %v1351_v59 = vmul.f32 1.442695, %v1335_v58 }
 0x3ee   : > { %v1292_v60 = vpop.xlane.xlu1 %1291 }
 0x3ef   : > { %3733 = vpow2.f32 %v1351_v59  ;;  %v1336_v12 = vsub.f32 %v4361_v16, %v1292_v60 }
 0x3f1   : > { %v1353_v17 = vmul.f32 1.442695, %v1336_v12 }
 0x3f3   : > { %3735 = vpow2.f32 %v1353_v17 }
 0x3f9   : > { %v1313_v35 = vpop.xlane.xlu0 %1312 }
 0x3fa   : > { %v1343_v37 = vsub.f32 %v4374_v50, %v1313_v35 }
 0x3fc   : > { %v4502_v4 = vpop.eup %3733  ;;  %v1367_v21 = vmul.f32 1.442695, %v1343_v37 }
 0x3fd   : > { %v1316_v6 = vpop.xlane.xlu1 %1315  ;;  %v1383_v7 = vsel %vm823_vm2, %v4502_v4, 0.0  ;;  %v1295_v36 = vpop.xlane.xlu0 %1294 }
 0x3fe   : > { %3737 = vpow2.f32 %v1367_v21  ;;  %v1344_v14 = vsub.f32 %v4386_v44, %v1316_v6  ;;  %1384 = vadd.xlane.f32.xlu0 %v1383_v7  ;;  %v1337_v26 = vsub.f32 %v4383_v57, %v1295_v36 }
 0x400   : > { %v4508_v16 = vpop.eup %3735  ;;  %v1369_v27 = vmul.f32 1.442695, %v1344_v14  ;;  %v1355_v30 = vmul.f32 1.442695, %v1337_v26 }
 0x401   : > { %v1386_v50 = vsel %vm823_vm2, %v4508_v16, 0.0  ;;  %v1325_v31 = vpop.xlane.xlu0 %1324 }
 0x402   : > { %3739 = vpow2.f32 %v1369_v27  ;;  %1387 = vadd.xlane.f32.xlu1 %v1386_v50  ;;  %v1347_v47 = vsub.f32 %v4401_v9, %v1325_v31 }
 0x403   : > { %3741 = vpow2.f32 %v1355_v30 }
 0x404   : > { %v1375_v38 = vmul.f32 1.442695, %v1347_v47 }
 0x405   : > { %v1328_v43 = vpop.xlane.xlu1 %1327  ;;  %v1298_v10 = vpop.xlane.xlu0 %1297 }
 0x406   : > { %3743 = vpow2.f32 %v1375_v38  ;;  %v1348_v44 = vsub.f32 %v4421_v20, %v1328_v43  ;;  %v1338_v57 = vsub.f32 %v4406_v18, %v1298_v10 }
 0x408   : > { %v1357_v23 = vmul.f32 1.442695, %v1338_v57  ;;  %v1377_v58 = vmul.f32 1.442695, %v1348_v44 }
 0x409   : > { %v1304_v59 = vpop.xlane.xlu1 %1303  ;;  %v1301_v60 = vpop.xlane.xlu0 %1300 }
 0x40a   : > { %v1340_v12 = vsub.f32 %v4429_v42, %v1304_v59  ;;  %v1339_v17 = vsub.f32 %v4426_v41, %v1301_v60  ;;  %3745 = vpow2.f32 %v1357_v23 }
 0x40b   : > { %v4517_v35 = vpop.eup %3737  ;;  %3747 = vpow2.f32 %v1377_v58 }
 0x40c   : > { %v1359_v9 = vmul.f32 1.442695, %v1339_v17  ;;  %v1407_v37 = vsel %vm823_vm2, %v4517_v35, 0.0  ;;  %v1361_v21 = vmul.f32 1.442695, %v1340_v12 }
 0x40d   : > { %v1310_v20 = vpop.xlane.xlu1 %1309  ;;  %1408 = vadd.xlane.f32.xlu0 %v1407_v37  ;;  %v1307_v18 = vpop.xlane.xlu0 %1306 }
 0x40e   : > { %v1342_v6 = vsub.f32 %v4450_v62, %v1310_v20  ;;  %v1341_v7 = vsub.f32 %v4447_v61, %v1307_v18  ;;  %3749 = vpow2.f32 %v1359_v9 }
 0x40f   : > { %v4523_v36 = vpop.eup %3739  ;;  %3751 = vpow2.f32 %v1361_v21 }
 0x410   : > { %v4525_v41 = vpop.eup %3741  ;;  %v1363_v42 = vmul.f32 1.442695, %v1341_v7  ;;  %v1410_v14 = vsel %vm823_vm2, %v4523_v36, 0.0  ;;  %v1365_v26 = vmul.f32 1.442695, %v1342_v6 }
 0x411   : > { %1411 = vadd.xlane.f32.xlu1 %v1410_v14  ;;  %v1389_v27 = vsel %vm823_vm2, %v4525_v41, 0.0  ;;  %v1319_v30 = vpop.xlane.xlu0 %1318  ;;  %v1322_v37 = vpop.xlane.xlu1 %1321 }
 0x412   : > { %1390 = vadd.xlane.f32.xlu0 %v1389_v27  ;;  %v1345_v62 = vsub.f32 %v4464_v39, %v1319_v30  ;;  %3753 = vpow2.f32 %v1363_v42  ;;  %v1346_v20 = vsub.f32 %v4467_v13, %v1322_v37 }
 0x413   : > { %v4532_v61 = vpop.eup %3743  ;;  %3755 = vpow2.f32 %v1365_v26 }
 0x414   : > { %v1371_v50 = vmul.f32 1.442695, %v1345_v62  ;;  %v1419_v31 = vsel %vm823_vm2, %v4532_v61, 0.0  ;;  %v1373_v6 = vmul.f32 1.442695, %v1346_v20 }
 0x415   : > { %v1331_v21 = vpop.xlane.xlu0 %1330  ;;  %v4580_v13 = vpop.permute.xlu1 %1706 }
 0x416   : > { %1420 = vadd.xlane.f32.xlu0 %v1419_v31  ;;  %3757 = vpow2.f32 %v1371_v50  ;;  %v1349_v18 = vsub.f32 %v4478_v34, %v1331_v21 }
 0x417   : > { %v4536_v47 = vpop.eup %3745  ;;  %3759 = vpow2.f32 %v1373_v6 }
 0x418   : > { %v1392_v38 = vsel %vm823_vm2, %v4536_v47, 0.0  ;;  %v4540_v43 = vpop.eup %3747  ;;  %v1379_v7 = vmul.f32 1.442695, %v1349_v18 }
 0x419   : > { %1393 = vadd.xlane.f32.xlu1 %v1392_v38  ;;  %v1422_v39 = vsel %vm823_vm2, %v4540_v43, 0.0  ;;  %v4593_v50 = vpop.permute.xlu0 %1659 }
 0x41a   : > { %3761 = vpow2.f32 %v1379_v7 }
 0x41b   : > { %v4542_v10 = vpop.eup %3749 }
 0x41c   : > { %v1395_v44 = vsel %vm823_vm2, %v4542_v10, 0.0  ;;  %v4548_v57 = vpop.eup %3751 }
 0x41d   : > { %1423 = vadd.xlane.f32.xlu1 %v1422_v39  ;;  %1396 = vadd.xlane.f32.xlu0 %v1395_v44  ;;  %v1398_v58 = vsel %vm823_vm2, %v4548_v57, 0.0 }
 0x41f   : > { %v4550_v23 = vpop.eup %3753 }
 0x420   : > { %v1401_v59 = vsel %vm823_vm2, %v4550_v23, 0.0  ;;  %v4556_v60 = vpop.eup %3755 }
 0x421   : > { %1399 = vadd.xlane.f32.xlu1 %v1398_v58  ;;  %1402 = vadd.xlane.f32.xlu0 %v1401_v59  ;;  %v1404_v17 = vsel %vm823_vm2, %v4556_v60, 0.0 }
 0x423   : > { %v4558_v12 = vpop.eup %3757 }
 0x424   : > { %v1413_v9 = vsel %vm823_vm2, %v4558_v12, 0.0  ;;  %v4570_v42 = vpop.eup %3759 }
 0x425   : > { %1405 = vadd.xlane.f32.xlu1 %v1404_v17  ;;  %1414 = vadd.xlane.f32.xlu0 %v1413_v9  ;;  %v1416_v26 = vsel %vm823_vm2, %v4570_v42, 0.0 }
 0x427   : > { %v4572_v14 = vpop.eup %3761 }
 0x428   : > { %v1425_v27 = vsel %vm823_vm2, %v4572_v14, 0.0 }
 0x436   : > { %1800 = vrot.lane.b32.xlu1 %v4265_v28, %s3904_s25 }
 0x43b   : > { %1753 = vrot.lane.b32.xlu0 %v4267_v53, %s3904_s25 }
 0x446   : > { %v1334_v34 = vpop.xlane.xlu1 %1333 }
 0x447   : > { %v1350_v30 = vsub.f32 %v4491_v49, %v1334_v34 }
 0x449   : > { %v1381_v62 = vmul.f32 1.442695, %v1350_v30 }
 0x44b   : > { %3763 = vpow2.f32 %v1381_v62 }
 0x458   : > { %v4599_v38 = vpop.eup %3763 }
 0x459   : > { %v1428_v39 = vsel %vm823_vm2, %v4599_v38, 0.0 }
 0x45a   : > { %1417 = vadd.xlane.f32.xlu1 %v1416_v26  ;;  %1426 = vadd.xlane.f32.xlu0 %v1425_v27 }
 0x46b   : > { %1900 = vrot.lane.b32.xlu1 %v4241_v45, %s3905_s21 }
 0x470   : > { %1849 = vrot.lane.b32.xlu0 %v4243_v19, %s3905_s21 }
 0x474   : > { %1847 = vrot.lane.b32.xlu0 %v4243_v19, %s3906_s22 }
 0x478   : > { %1898 = vrot.lane.b32.xlu0 %v4241_v45, %s3906_s22 }
 0x47c   : > { %1949 = vrot.lane.b32.xlu0 %v4249_v33, %s3906_s22 }
 0x480   : > { %2000 = vrot.lane.b32.xlu0 %v4253_v0, %s3906_s22 }
 0x484   : > { %2051 = vrot.lane.b32.xlu0 %v4257_v1, %s3906_s22 }
 0x487   : > { %v1385_v31 = vpop.xlane.xlu0 %1384 }
 0x488   : > { %2102 = vrot.lane.b32.xlu0 %v4259_v24, %s3906_s22  ;;  %3765 = vrcp.f32 %v1385_v31 }
 0x48b   : > { %v1388_v49 = vpop.xlane.xlu1 %1387 }
 0x48c   : > { %3767 = vrcp.f32 %v1388_v49  ;;  %2153 = vrot.lane.b32.xlu0 %v4267_v53, %s3906_s22 }
 0x48f   : > { %1429 = vadd.xlane.f32.xlu1 %v1428_v39 }
 0x495   : > { %v3766_v44 = vpop.eup %3765 }
 0x496   : > { %v1409_v58 = vpop.xlane.xlu0 %1408  ;;  %v1447_v17 = vmul.f32 %v3766_v44, %v4502_v4 }
 0x499   : > { %v3768_v59 = vpop.eup %3767 }
 0x49a   : > { %v1448_v9 = vmul.f32 %v3768_v59, %v4508_v16  ;;  %v1412_v20 = vpop.xlane.xlu1 %1411 }
 0x49b   : > { %v1391_v21 = vpop.xlane.xlu0 %1390 }
 0x49c   : > { %v1463_v37 = vpack.c.bf16 %v1448_v9, %v1447_v17  ;;  %3769 = vrcp.f32 %v1391_v21 }
 0x49e   : > { %3448 = vmatmul.mubr.msk.bf16.vlgmr.msra.gmra.mxu0 %vm823_vm2, %v1463_v37 }
 0x49f   : > { %3458 = vmatpush3.bf16.msra.mxu0 %v4497_v56  ;;  %3459 = vmatprep.mubr.msk.bf16.mxu0 %vm3902_vm1, %v3901_v8  ;;  %v1421_v18 = vpop.xlane.xlu0 %1420 }
 0x4a0   : > { %3469 = vmatprep.subr.bf16.mxu0 %v3901_v8  ;;  %1951 = vrot.lane.b32.xlu1 %v4249_v33, %s3905_s21 }
 0x4a2   : > { %v1394_v4 = vpop.xlane.xlu1 %1393 }
 0x4a3   : > { %3771 = vrcp.f32 %v1394_v4 }
 0x4a4   : > { %2002 = vrot.lane.b32.xlu1 %v4253_v0, %s3905_s21 }
 0x4a6   : > { %v1424_v16 = vpop.xlane.xlu1 %1423  ;;  %v1397_v6 = vpop.xlane.xlu0 %1396 }
 0x4a7   : > { %3773 = vrcp.f32 %v1397_v6 }
 0x4a8   : > { %2053 = vrot.lane.b32.xlu1 %v4257_v1, %s3905_s21 }
 0x4a9   : > { %v3770_v26 = vpop.eup %3769 }
 0x4aa   : > { %v1400_v56 = vpop.xlane.xlu1 %1399  ;;  %v1403_v7 = vpop.xlane.xlu0 %1402  ;;  %v1449_v30 = vmul.f32 %v3770_v26, %v4525_v41 }
 0x4ab   : > { %3775 = vrcp.f32 %v1400_v56 }
 0x4ac   : > { %2104 = vrot.lane.b32.xlu1 %v4259_v24, %s3905_s21  ;;  %3777 = vrcp.f32 %v1403_v7 }
 0x4ad   : > { %3779 = vrcp.f32 %v1412_v20 }
 0x4ae   : > { %v1406_v27 = vpop.xlane.xlu1 %1405  ;;  %v1415_v21 = vpop.xlane.xlu0 %1414 }
 0x4af   : > { %3781 = vrcp.f32 %v1406_v27 }
 0x4b0   : > { %v3772_v34 = vpop.eup %3771  ;;  %2155 = vrot.lane.b32.xlu1 %v4267_v53, %s3905_s21  ;;  %3783 = vrcp.f32 %v1409_v58 }
 0x4b1   : > { %v1450_v62 = vmul.f32 %v3772_v34, %v4536_v47  ;;  %3785 = vrcp.f32 %v1424_v16 }
 0x4b2   : > { %3787 = vrcp.f32 %v1421_v18  ;;  %v1801_v4 = vpop.permute.xlu1 %1800 }
 0x4b3   : > { %v1464_v31 = vpack.c.bf16 %v1450_v62, %v1449_v30  ;;  %3789 = vrcp.f32 %v1415_v21 }
 0x4b4   : > { %2206 = vrot.lane.b32.xlu1 %v4265_v28, %s3905_s21  ;;  %v3774_v49 = vpop.eup %3773 }
 0x4b5   : > { %3454 = vmatmul.mubr.msk.bf16.vlgmr.msra.gmra.mxu1 %vm823_vm2, %v1464_v31  ;;  %v1451_v41 = vmul.f32 %v3774_v49, %v4542_v10 }
 0x4b6   : > { %3464 = vmatpush3.bf16.msra.mxu1 %v4495_v51  ;;  %3465 = vmatprep.mubr.msk.bf16.mxu1 %vm3902_vm1, %v3901_v8 }
 0x4b7   : > { %3475 = vmatprep.subr.bf16.mxu1 %v3901_v8 }
 0x4b8   : > { %v3776_v39 = vpop.eup %3775  ;;  %2204 = vrot.lane.b32.xlu1 %v4265_v28, %s3906_s22 }
 0x4b9   : > { %v1452_v47 = vmul.f32 %v3776_v39, %v4548_v57  ;;  %v3778_v44 = vpop.eup %3777 }
 0x4ba   : > { %v3780_v58 = vpop.eup %3779  ;;  %v1453_v51 = vmul.f32 %v3778_v44, %v4550_v23 }
 0x4bb   : > { %v1465_v59 = vpack.c.bf16 %v1452_v47, %v1451_v41  ;;  %v1456_v57 = vmul.f32 %v3780_v58, %v4523_v36 }
 0x4bc   : > { %v3782_v17 = vpop.eup %3781 }
 0x4bd   : > { %3460 = vmatmul.mubr.msk.bf16.vlgmr.msra.gmra.mxu0 %vm823_vm2, %v1465_v59  ;;  %v1454_v9 = vmul.f32 %v3782_v17, %v4556_v60  ;;  %v3784_v37 = vpop.eup %3783 }
 0x4be   : > { %3470 = vmatpush3.bf16.msra.mxu0 %v4593_v50  ;;  %3471 = vmatprep.mubr.msk.bf16.mxu0 %vm3902_vm1, %v3901_v8  ;;  %v1455_v20 = vmul.f32 %v3784_v37, %v4517_v35  ;;  %v3786_v60 = vpop.eup %3785  ;;  %v1754_v50 = vpop.permute.xlu0 %1753 }
 0x4bf   : > { %v1466_v10 = vpack.c.bf16 %v1454_v9, %v1453_v51  ;;  %3481 = vmatprep.subr.bf16.mxu0 %v3901_v8  ;;  %v3788_v18 = vpop.eup %3787  ;;  %v1460_v36 = vmul.f32 %v3786_v60, %v4540_v43 }
 0x4c0   : > { %v1467_v23 = vpack.c.bf16 %v1456_v57, %v1455_v20  ;;  %v1459_v35 = vmul.f32 %v3788_v18, %v4532_v61  ;;  %v3790_v43 = vpop.eup %3789 }
 0x4c1   : > { %3466 = vmatmul.mubr.msk.bf16.vlgmr.msra.gmra.mxu1 %vm823_vm2, %v1466_v10  ;;  %v1457_v27 = vmul.f32 %v3790_v43, %v4558_v12 }
 0x4c2   : > { %3476 = vmatpush3.bf16.msra.mxu1 %v4580_v13  ;;  %3477 = vmatprep.mubr.msk.bf16.mxu1 %vm3902_vm1, %v3901_v8  ;;  %v1469_v13 = vpack.c.bf16 %v1460_v36, %v1459_v35 }
 0x4c3   : > { %3487 = vmatprep.subr.bf16.mxu1 %v3901_v8 }
 0x4c5   : > { %3472 = vmatmul.mubr.msk.bf16.vlgmr.msra.gmra.mxu0 %vm823_vm2, %v1467_v23 }
 0x4c6   : > { %3482 = vmatpush3.bf16.msra.mxu0 %v1754_v50  ;;  %3483 = vmatprep.mubr.msk.bf16.mxu0 %vm3902_vm1, %v3901_v8 }
 0x4c7   : > { %3493 = vmatprep.subr.bf16.mxu0 %v3901_v8 }
 0x4cd   : > { %3484 = vmatmul.mubr.msk.bf16.vlgmr.msra.gmra.mxu0 %vm823_vm2, %v1469_v13 }
 0x4ce   : > { %3495 = vmatprep.mubr.msk.bf16.mxu0 %vm3902_vm1, %v3901_v8 }
 0x4e3   : > { %v1418_v16 = vpop.xlane.xlu1 %1417  ;;  %v1427_v6 = vpop.xlane.xlu0 %1426 }
 0x4e4   : > { %3791 = vrcp.f32 %v1418_v16 }
 0x4e5   : > { %3793 = vrcp.f32 %v1427_v6 }
 0x4e7   : > { %v1850_v56 = vpop.permute.xlu0 %1849  ;;  %v1901_v62 = vpop.permute.xlu1 %1900 }
 0x4e8   : > { %v1855_v7 = vsel %vm823_vm2, %v1850_v56, 0  ;;  %v1906_v57 = vsel %vm823_vm2, %v1901_v62, 0 }
 0x4e9   : > { %3494 = vmatpush3.bf16.xpose.msra.mxu0 %v1855_v7 }
 0x4ea   : > { %3505 = vmatprep.subr.bf16.mxu0 %v3901_v8 }
 0x4eb   : > { %v1848_v26 = vpop.permute.xlu0 %1847 }
 0x4ef   : > { %v1899_v31 = vpop.permute.xlu0 %1898 }
 0x4f0   : > { %3496 = vmatmul.mubr.msk.bf16.vlgmr.msra.gmra.mxu0 %vm823_vm2, %v1848_v26 }
 0x4f1   : > { %v3792_v61 = vpop.eup %3791  ;;  %3507 = vmatprep.mubr.msk.bf16.mxu0 %vm3902_vm1, %v3901_v8 }
 0x4f2   : > { %v1458_v34 = vmul.f32 %v3792_v61, %v4570_v42  ;;  %v3794_v44 = vpop.eup %3793 }
 0x4f3   : > { %v1950_v39 = vpop.permute.xlu0 %1949  ;;  %v1461_v51 = vmul.f32 %v3794_v44, %v4572_v14 }
 0x4f4   : > { %v1468_v30 = vpack.c.bf16 %v1458_v34, %v1457_v27 }
 0x4f6   : > { %3478 = vmatmul.mubr.msk.bf16.vlgmr.msra.gmra.mxu1 %vm823_vm2, %v1468_v30 }
 0x4f7   : > { %3488 = vmatpush3.bf16.msra.mxu1 %v1801_v4  ;;  %3489 = vmatprep.mubr.msk.bf16.mxu1 %vm3902_vm1, %v3901_v8  ;;  %v2001_v47 = vpop.permute.xlu0 %2000 }
 0x4f8   : > { %3499 = vmatprep.subr.bf16.mxu1 %v3901_v8 }
 0x4fb   : > { %v2052_v37 = vpop.permute.xlu0 %2051 }
 0x4ff   : > { %v2103_v14 = vpop.permute.xlu0 %2102 }
 0x503   : > { %v2154_v60 = vpop.permute.xlu0 %2153 }
 0x518   : > { %v1430_v49 = vpop.xlane.xlu1 %1429 }
 0x519   : > { %3795 = vrcp.f32 %v1430_v49 }
 0x51c   : > { %v1952_v41 = vpop.permute.xlu1 %1951 }
 0x51d   : > { %v1957_v12 = vsel %vm823_vm2, %v1952_v41, 0 }
 0x51e   : > { %3506 = vmatpush3.bf16.xpose.msra.mxu0 %v1957_v12 }
 0x51f   : > { %3517 = vmatprep.subr.bf16.mxu0 %v3901_v8 }
 0x520   : > { %v2003_v42 = vpop.permute.xlu1 %2002 }
 0x524   : > { %v2054_v58 = vpop.permute.xlu1 %2053 }
 0x525   : > { %v2059_v59 = vsel %vm823_vm2, %v2054_v58, 0  ;;  %3508 = vmatmul.mubr.msk.bf16.vlgmr.msra.gmra.mxu0 %vm823_vm2, %v1950_v39 }
 0x526   : > { %v3796_v17 = vpop.eup %3795  ;;  %3518 = vmatpush3.bf16.xpose.msra.mxu0 %v2059_v59  ;;  %3519 = vmatprep.mubr.msk.bf16.mxu0 %vm3902_vm1, %v3901_v8 }
 0x527   : > { %v1462_v9 = vmul.f32 %v3796_v17, %v4599_v38  ;;  %3529 = vmatprep.subr.bf16.mxu0 %v3901_v8  ;;  %v2008_v38 = vsel %vm823_vm2, %v2003_v42, 0 }
 0x528   : > { %v2105_v21 = vpop.permute.xlu1 %2104 }
 0x529   : > { %v1470_v10 = vpack.c.bf16 %v1462_v9, %v1461_v51  ;;  %v2110_v50 = vsel %vm823_vm2, %v2105_v21, 0  ;;  %v4736_v9 = vld [vmem:[%s5110_s5 + $0x10] sm:$0xff] }
 0x52b   : > { %3490 = vmatmul.mubr.msk.bf16.vlgmr.msra.gmra.mxu1 %vm823_vm2, %v1470_v10 }
 0x52c   : > { %3500 = vmatpush3.bf16.xpose.msra.mxu1 %v1906_v57  ;;  %v2156_v20 = vpop.permute.xlu1 %2155  ;;  %3501 = vmatprep.mubr.msk.bf16.mxu1 %vm3902_vm1, %v3901_v8 }
 0x52d   : > { %v2161_v23 = vsel %vm823_vm2, %v2156_v20, 0  ;;  %3520 = vmatmul.mubr.msk.bf16.vlgmr.msra.gmra.mxu0 %vm823_vm2, %v2052_v37  ;;  %3511 = vmatprep.subr.bf16.mxu1 %v3901_v8  ;;  %v4742_v20 = vld [vmem:[%s5110_s5 + $0x18] sm:$0xff] }
 0x52e   : > { %3530 = vmatpush3.bf16.xpose.msra.mxu0 %v2161_v23  ;;  %3531 = vmatprep.mubr.msk.bf16.mxu0 %vm3902_vm1, %v3901_v8 }
 0x52f   : > { %3541 = vmatprep.subr.bf16.mxu0 %v3901_v8 }
 0x530   : > { %v2207_v18 = vpop.permute.xlu1 %2206 }
 0x531   : > { %v2212_v36 = vsel %vm823_vm2, %v2207_v18, 0 }
 0x533   : > { %3502 = vmatmul.mubr.msk.bf16.vlgmr.msra.gmra.mxu1 %vm823_vm2, %v1899_v31 }
 0x534   : > { %3512 = vmatpush3.bf16.xpose.msra.mxu1 %v2008_v38  ;;  %3513 = vmatprep.mubr.msk.bf16.mxu1 %vm3902_vm1, %v3901_v8  ;;  %v2205_v35 = vpop.permute.xlu1 %2204 }
 0x535   : > { %3532 = vmatmul.mubr.msk.bf16.vlgmr.msra.gmra.mxu0 %vm823_vm2, %v2154_v60  ;;  %3523 = vmatprep.subr.bf16.mxu1 %v3901_v8 }
 0x536   : > { %3543 = vmatprep.mubr.msk.bf16.mxu0 %vm3902_vm1, %v3901_v8 }
 0x53b   : > { %3514 = vmatmul.mubr.msk.bf16.vlgmr.msra.gmra.mxu1 %vm823_vm2, %v2001_v47 }
 0x53c   : > { %3524 = vmatpush3.bf16.xpose.msra.mxu1 %v2110_v50  ;;  %3525 = vmatprep.mubr.msk.bf16.mxu1 %vm3902_vm1, %v3901_v8 }
 0x53d   : > { %3535 = vmatprep.subr.bf16.mxu1 %v3901_v8 }
 0x543   : > { %3526 = vmatmul.mubr.msk.bf16.vlgmr.msra.gmra.mxu1 %vm823_vm2, %v2103_v14 }
 0x544   : > { %3536 = vmatpush3.bf16.xpose.msra.mxu1 %v2212_v36  ;;  %3537 = vmatprep.mubr.msk.bf16.mxu1 %vm3902_vm1, %v3901_v8 }
 0x545   : > { %3547 = vmatprep.subr.bf16.mxu1 %v3901_v8 }
 0x54b   : > { %3538 = vmatmul.mubr.msk.bf16.vlgmr.msra.gmra.mxu1 %vm823_vm2, %v2205_v35 }
 0x54c   : > { %3549 = vmatprep.mubr.msk.bf16.mxu1 %vm3902_vm1, %v3901_v8 }
 0x55e   : > { %v4709_v13 = vpop.f32.mrf.mxu0 }
 0x560   : > { %v3449_v4 = vpop.f32.mrf.mxu0 }
 0x562   : > { %v4711_v16 = vpop.f32.mrf.mxu0 }
 0x564   : > { %v3450_v6 = vpop.f32.mrf.mxu0 }
 0x575   : > { %v4713_v56 = vpop.f32.mrf.mxu1 }
 0x577   : > { %v3455_v7 = vpop.f32.mrf.mxu1 }
 0x579   : > { %v4715_v43 = vpop.f32.mrf.mxu1 }
 0x57b   : > { %v3456_v26 = vpop.f32.mrf.mxu1 }
 0x57d   : > { %v4717_v61 = vpop.f32.mrf.mxu0 }
 0x57f   : > { %v3461_v27 = vpop.f32.mrf.mxu0 }
 0x581   : > { %v4719_v34 = vpop.f32.mrf.mxu0  ;;  %v4721_v30 = vpop.f32.mrf.mxu1 }
 0x583   : > { %v3462_v62 = vpop.f32.mrf.mxu0  ;;  %v3467_v31 = vpop.f32.mrf.mxu1 }
 0x585   : > { %v4723_v49 = vpop.f32.mrf.mxu1  ;;  %v4725_v39 = vpop.f32.mrf.mxu0 }
 0x587   : > { %v3468_v41 = vpop.f32.mrf.mxu1  ;;  %v3473_v12 = vpop.f32.mrf.mxu0 }
 0x589   : > { %v4727_v42 = vpop.f32.mrf.mxu0 }
 0x58b   : > { %v3474_v47 = vpop.f32.mrf.mxu0 }
 0x58d   : > { %v4729_v44 = vpop.f32.mrf.mxu0 }
 0x58f   : > { %v3485_v58 = vpop.f32.mrf.mxu0 }
 0x591   : > { %v4731_v59 = vpop.f32.mrf.mxu0 }
 0x593   : > { %v3486_v17 = vpop.f32.mrf.mxu0 }
 0x5b0   : > { %v1891_v51 = vpop.f32.mrf.mxu0 }
 0x5b1   : > { %v2255_v37 = vmul.f32 0.25, %v1891_v51 }
 0x5b2   : > { %v3497_v21 = vpop.f32.mrf.mxu0 }
 0x5b3   : > { %v2274_v10 = vadd.f32 %v4736_v9, %v2255_v37 }
 0x5b4   : > { %v1894_v57 = vpop.f32.mrf.mxu0 }
 0x5b5   : > { %v2256_v23 = vmul.f32 0.25, %v1894_v57  ;;  %v4745_v14 = vadd.f32 %v2274_v10, %v4343_v25 }
 0x5b6   : > { %v4747_v38 = vpop.f32.mrf.mxu1  ;;  %v3498_v60 = vpop.f32.mrf.mxu0 }
 0x5b7   : > { %v2275_v50 = vadd.f32 %v4742_v20, %v2256_v23  ;;  %v2322_v18 = vsel %vm823_vm2, %v4745_v14, -inf }
 0x5b8   : > { %v3479_v36 = vpop.f32.mrf.mxu1  ;;  %2323 = vmax.xlane.f32.xlu0 %v2322_v18 }
 0x5b9   : > { %v4753_v35 = vadd.f32 %v2275_v50, %v4355_v15 }
 0x5ba   : > { %v4755_v4 = vpop.f32.mrf.mxu1 }
 0x5bb   : > { %v2325_v6 = vsel %vm823_vm2, %v4753_v35, -inf }
 0x5bc   : > { %v3480_v25 = vpop.f32.mrf.mxu1  ;;  %2326 = vmax.xlane.f32.xlu1 %v2325_v6 }
 0x5e5   : > { %v1993_v7 = vpop.f32.mrf.mxu0 }
 0x5e6   : > { %v2259_v36 = vmul.f32 0.25, %v1993_v7 }
 0x5e7   : > { %v3509_v26 = vpop.f32.mrf.mxu0 }
 0x5e9   : > { %v1996_v27 = vpop.f32.mrf.mxu0 }
 0x5ea   : > { %v2260_v62 = vmul.f32 0.25, %v1996_v27 }
 0x5eb   : > { %v4759_v31 = vpop.f32.mrf.mxu1  ;;  %v3510_v41 = vpop.f32.mrf.mxu0 }
 0x5ec   : > { %v2279_v12 = vadd.f32 %v4742_v20, %v2260_v62 }
 0x5ed   : > { %v3491_v47 = vpop.f32.mrf.mxu1  ;;  %v2095_v58 = vpop.f32.mrf.mxu0 }
 0x5ee   : > { %v4763_v15 = vadd.f32 %v2279_v12, %v4418_v55  ;;  %v2278_v12 = vadd.f32 %v4736_v9, %v2259_v36 }
 0x5ef   : > { %v4765_v17 = vpop.f32.mrf.mxu1  ;;  %v3521_v51 = vpop.f32.mrf.mxu0 }
 0x5f0   : > { %v2337_v37 = vsel %vm823_vm2, %v4763_v15, -inf }
 0x5f1   : > { %v3492_v21 = vpop.f32.mrf.mxu1  ;;  %2338 = vmax.xlane.f32.xlu1 %v2337_v37  ;;  %v2098_v10 = vpop.f32.mrf.mxu0 }
 0x5f3   : > { %v1942_v57 = vpop.f32.mrf.mxu1  ;;  %v3522_v23 = vpop.f32.mrf.mxu0 }
 0x5f4   : > { %v2257_v60 = vmul.f32 0.25, %v1942_v57  ;;  %v2263_v23 = vmul.f32 0.25, %v2095_v58 }
 0x5f5   : > { %v3503_v50 = vpop.f32.mrf.mxu1  ;;  %v2197_v18 = vpop.f32.mrf.mxu0 }
 0x5f6   : > { %v2276_v6 = vadd.f32 %v4736_v9, %v2257_v60  ;;  %v2264_v60 = vmul.f32 0.25, %v2098_v10 }
 0x5f7   : > { %v1945_v25 = vpop.f32.mrf.mxu1  ;;  %v3533_v55 = vpop.f32.mrf.mxu0 }
 0x5f8   : > { %v2258_v26 = vmul.f32 0.25, %v1945_v25  ;;  %v4771_v27 = vadd.f32 %v2276_v6, %v4371_v48  ;;  %v4784_v6 = vadd.f32 %v2278_v12, %v4415_v32 }
 0x5f9   : > { %v3504_v62 = vpop.f32.mrf.mxu1  ;;  %v2200_v41 = vpop.f32.mrf.mxu0 }
 0x5fa   : > { %v2277_v47 = vadd.f32 %v4742_v20, %v2258_v26  ;;  %v2328_v51 = vsel %vm823_vm2, %v4771_v27, -inf  ;;  %v2282_v26 = vadd.f32 %v4736_v9, %v2263_v23  ;;  %v2283_v62 = vadd.f32 %v4742_v20, %v2264_v60 }
 0x5fb   : > { %2329 = vmax.xlane.f32.xlu0 %v2328_v51  ;;  %v2044_v37 = vpop.f32.mrf.mxu1  ;;  %v3534_v7 = vpop.f32.mrf.mxu0  ;;  %v2334_v10 = vsel %vm823_vm2, %v4784_v6, -inf  ;;  %v2268_v60 = vmul.f32 0.25, %v2200_v41 }
 0x5fc   : > { %v2261_v21 = vmul.f32 0.25, %v2044_v37  ;;  %v4778_v57 = vadd.f32 %v2277_v47, %v4398_v5  ;;  %v2267_v37 = vmul.f32 0.25, %v2197_v18  ;;  %v4801_v23 = vadd.f32 %v2283_v62, %v4377_v29 }
 0x5fd   : > { %v3515_v48 = vpop.f32.mrf.mxu1  ;;  %v2287_v41 = vadd.f32 %v4742_v20, %v2268_v60 }
 0x5fe   : > { %v2280_v50 = vadd.f32 %v4736_v9, %v2261_v21  ;;  %v2331_v36 = vsel %vm823_vm2, %v4778_v57, -inf  ;;  %v4798_v21 = vadd.f32 %v2282_v26, %v4366_v40 }
 0x5ff   : > { %2332 = vmax.xlane.f32.xlu0 %v2331_v36  ;;  %v2047_v25 = vpop.f32.mrf.mxu1  ;;  %v2286_v36 = vadd.f32 %v4736_v9, %v2267_v37 }
 0x600   : > { %v2262_v55 = vmul.f32 0.25, %v2047_v25  ;;  %v4792_v47 = vadd.f32 %v2280_v50, %v4436_v52  ;;  %v2346_v29 = vsel %vm823_vm2, %v4798_v21, -inf }
 0x601   : > { %v3516_v5 = vpop.f32.mrf.mxu1 }
 0x602   : > { %v2281_v58 = vadd.f32 %v4742_v20, %v2262_v55  ;;  %v2340_v52 = vsel %vm823_vm2, %v4792_v47, -inf  ;;  %v2349_v55 = vsel %vm823_vm2, %v4801_v23, -inf }
 0x603   : > { %2335 = vmax.xlane.f32.xlu0 %v2334_v10  ;;  %v2146_v51 = vpop.f32.mrf.mxu1 }
 0x604   : > { %v2265_v32 = vmul.f32 0.25, %v2146_v51  ;;  %v4795_v12 = vadd.f32 %v2281_v58, %v4439_v11  ;;  %v4822_v51 = vadd.f32 %v2286_v36, %v4390_v63 }
 0x605   : > { %v3527_v7 = vpop.f32.mrf.mxu1 }
 0x606   : > { %v2284_v48 = vadd.f32 %v4736_v9, %v2265_v32  ;;  %v2343_v50 = vsel %vm823_vm2, %v4795_v12, -inf  ;;  %v4830_v7 = vadd.f32 %v2287_v41, %v4409_v54 }
 0x607   : > { %2341 = vmax.xlane.f32.xlu0 %v2340_v52  ;;  %2344 = vmax.xlane.f32.xlu1 %v2343_v50  ;;  %v2149_v11 = vpop.f32.mrf.mxu1 }
 0x608   : > { %v2266_v18 = vmul.f32 0.25, %v2149_v11  ;;  %v4816_v26 = vadd.f32 %v2284_v48, %v4454_v2  ;;  %v2358_v48 = vsel %vm823_vm2, %v4822_v51, -inf  ;;  %v2361_v63 = vsel %vm823_vm2, %v4830_v7, -inf }
 0x609   : > { %v3528_v40 = vpop.f32.mrf.mxu1 }
 0x60a   : > { %v2285_v25 = vadd.f32 %v4742_v20, %v2266_v18  ;;  %v2352_v37 = vsel %vm823_vm2, %v4816_v26, -inf }
 0x60b   : > { %2347 = vmax.xlane.f32.xlu0 %v2346_v29  ;;  %2350 = vmax.xlane.f32.xlu1 %v2349_v55  ;;  %v2248_v62 = vpop.f32.mrf.mxu1 }
 0x60c   : > { %v2269_v5 = vmul.f32 0.25, %v2248_v62  ;;  %v4819_v58 = vadd.f32 %v2285_v25, %v4457_v3 }
 0x60d   : > { %v3539_v10 = vpop.f32.mrf.mxu1 }
 0x60e   : > { %v2288_v32 = vadd.f32 %v4736_v9, %v2269_v5  ;;  %v2355_v2 = vsel %vm823_vm2, %v4819_v58, -inf }
 0x60f   : > { %2353 = vmax.xlane.f32.xlu0 %v2352_v37  ;;  %2356 = vmax.xlane.f32.xlu1 %v2355_v2  ;;  %v2251_v60 = vpop.f32.mrf.mxu1 }
 0x610   : > { %v4837_v9 = vadd.f32 %v2288_v32, %v4471_v22  ;;  %v2270_v50 = vmul.f32 0.25, %v2251_v60 }
 0x611   : > { %v3540_v3 = vpop.f32.mrf.mxu1 }
 0x612   : > { %v2364_v52 = vsel %vm823_vm2, %v4837_v9, -inf }
 0x613   : > { %2359 = vmax.xlane.f32.xlu0 %v2358_v48  ;;  %2362 = vmax.xlane.f32.xlu1 %v2361_v63 }
 0x617   : > { %2365 = vmax.xlane.f32.xlu0 %v2364_v52 }
 0x624   : > { %2553 = vrot.lane.b32.xlu1 %v4241_v45, %s3907_s27  ;;  %v2289_v45 = vadd.f32 %v4742_v20, %v2270_v50 }
 0x626   : > { %v4854_v18 = vadd.f32 %v2289_v45, %v4488_v46 }
 0x628   : > { %2600 = vrot.lane.b32.xlu1 %v4249_v33, %s3907_s27  ;;  %v2367_v33 = vsel %vm823_vm2, %v4854_v18, -inf }
 0x62c   : > { %2647 = vrot.lane.b32.xlu1 %v4253_v0, %s3907_s27 }
 0x62d   : > { %2506 = vrot.lane.b32.xlu0 %v4243_v19, %s3907_s27 }
 0x631   : > { %2694 = vrot.lane.b32.xlu0 %v4257_v1, %s3907_s27 }
 0x641   : > { %v2324_v54 = vpop.xlane.xlu0 %2323 }
 0x642   : > { %v2370_v22 = vsub.f32 %v4745_v14, %v2324_v54 }
 0x644   : > { %v2386_v11 = vmul.f32 1.442695, %v2370_v22 }
 0x645   : > { %v2327_v1 = vpop.xlane.xlu1 %2326 }
 0x646   : > { %3797 = vpow2.f32 %v2386_v11  ;;  %v2371_v14 = vsub.f32 %v4753_v35, %v2327_v1 }
 0x648   : > { %v2388_v20 = vmul.f32 1.442695, %v2371_v14 }
 0x64a   : > { %3799 = vpow2.f32 %v2388_v20 }
 0x650   : > { %2368 = vmax.xlane.f32.xlu1 %v2367_v33 }
 0x653   : > { %v4858_v0 = vpop.eup %3797 }
 0x654   : > { %v2418_v19 = vsel %vm823_vm2, %v4858_v0, 0.0 }
 0x655   : > { %2419 = vadd.xlane.f32.xlu0 %v2418_v19 }
 0x657   : > { %v4865_v46 = vpop.eup %3799 }
 0x658   : > { %v2421_v29 = vsel %vm823_vm2, %v4865_v46, 0.0 }
 0x661   : > { %2741 = vrot.lane.b32.xlu1 %v4259_v24, %s3907_s27 }
 0x67a   : > { %v2339_v36 = vpop.xlane.xlu1 %2338 }
 0x67b   : > { %v2375_v25 = vsub.f32 %v4763_v15, %v2339_v36 }
 0x67d   : > { %v2396_v35 = vmul.f32 1.442695, %v2375_v25 }
 0x684   : > { %v2330_v40 = vpop.xlane.xlu0 %2329 }
 0x685   : > { %v2372_v41 = vsub.f32 %v4771_v27, %v2330_v40  ;;  %2422 = vadd.xlane.f32.xlu1 %v2421_v29 }
 0x687   : > { %v2390_v55 = vmul.f32 1.442695, %v2372_v41 }
 0x688   : > { %v2333_v62 = vpop.xlane.xlu0 %2332 }
 0x689   : > { %3801 = vpow2.f32 %v2390_v55  ;;  %v2373_v24 = vsub.f32 %v4778_v57, %v2333_v62 }
 0x68b   : > { %v2392_v5 = vmul.f32 1.442695, %v2373_v24 }
 0x68c   : > { %v2336_v10 = vpop.xlane.xlu0 %2335 }
 0x68d   : > { %3803 = vpow2.f32 %v2392_v5  ;;  %v2374_v32 = vsub.f32 %v4784_v6, %v2336_v10 }
 0x68e   : > { %3805 = vpow2.f32 %v2396_v35 }
 0x68f   : > { %v2394_v37 = vmul.f32 1.442695, %v2374_v32 }
 0x690   : > { %v2345_v2 = vpop.xlane.xlu1 %2344  ;;  %v2342_v60 = vpop.xlane.xlu0 %2341 }
 0x691   : > { %3807 = vpow2.f32 %v2394_v37  ;;  %v2377_v27 = vsub.f32 %v4795_v12, %v2345_v2  ;;  %v2376_v15 = vsub.f32 %v4792_v47, %v2342_v60 }
 0x693   : > { %v2400_v3 = vmul.f32 1.442695, %v2377_v27  ;;  %v2398_v48 = vmul.f32 1.442695, %v2376_v15 }
 0x694   : > { %v2351_v63 = vpop.xlane.xlu1 %2350  ;;  %v2348_v52 = vpop.xlane.xlu0 %2347 }
 0x695   : > { %3809 = vpow2.f32 %v2400_v3  ;;  %v2379_v57 = vsub.f32 %v4801_v23, %v2351_v63  ;;  %v2378_v54 = vsub.f32 %v4798_v21, %v2348_v52 }
 0x696   : > { %v4877_v22 = vpop.eup %3801  ;;  %3811 = vpow2.f32 %v2398_v48 }
 0x697   : > { %v2404_v6 = vmul.f32 1.442695, %v2379_v57  ;;  %v2402_v50 = vmul.f32 1.442695, %v2378_v54  ;;  %v2424_v11 = vsel %vm823_vm2, %v4877_v22, 0.0 }
 0x698   : > { %v2357_v12 = vpop.xlane.xlu1 %2356  ;;  %2425 = vadd.xlane.f32.xlu0 %v2424_v11  ;;  %v2354_v47 = vpop.xlane.xlu0 %2353 }
 0x699   : > { %3813 = vpow2.f32 %v2404_v6  ;;  %v2381_v45 = vsub.f32 %v4819_v58, %v2357_v12  ;;  %v2380_v33 = vsub.f32 %v4816_v26, %v2354_v47 }
 0x69a   : > { %v4883_v19 = vpop.eup %3803  ;;  %3815 = vpow2.f32 %v2402_v50 }
 0x69b   : > { %v2408_v21 = vmul.f32 1.442695, %v2381_v45  ;;  %v2406_v23 = vmul.f32 1.442695, %v2380_v33  ;;  %v2427_v1 = vsel %vm823_vm2, %v4883_v19, 0.0  ;;  %v4887_v14 = vpop.eup %3805 }
 0x69c   : > { %v2363_v20 = vpop.xlane.xlu1 %2362  ;;  %2428 = vadd.xlane.f32.xlu1 %v2427_v1  ;;  %v2360_v36 = vpop.xlane.xlu0 %2359  ;;  %v2433_v25 = vsel %vm823_vm2, %v4887_v14, 0.0 }
 0x69d   : > { %3817 = vpow2.f32 %v2408_v21  ;;  %v2383_v40 = vsub.f32 %v4830_v7, %v2363_v20  ;;  %v2382_v58 = vsub.f32 %v4822_v51, %v2360_v36 }
 0x69e   : > { %v4891_v29 = vpop.eup %3807  ;;  %3819 = vpow2.f32 %v2406_v23 }
 0x69f   : > { %v2412_v26 = vmul.f32 1.442695, %v2383_v40  ;;  %v2410_v41 = vmul.f32 1.442695, %v2382_v58  ;;  %v2430_v55 = vsel %vm823_vm2, %v4891_v29, 0.0 }
 0x6a0   : > { %v2554_v62 = vpop.permute.xlu1 %2553  ;;  %2434 = vadd.xlane.f32.xlu1 %v2433_v25  ;;  %2431 = vadd.xlane.f32.xlu0 %v2430_v55  ;;  %v2366_v24 = vpop.xlane.xlu0 %2365 }
 0x6a1   : > { %3821 = vpow2.f32 %v2412_v26  ;;  %v2384_v7 = vsub.f32 %v4837_v9, %v2366_v24  ;;  %3548 = vmatpush3.bf16.msra.mxu1 %v2554_v62 }
 0x6a2   : > { %v4898_v51 = vpop.eup %3809  ;;  %3823 = vpow2.f32 %v2410_v41  ;;  %3559 = vmatprep.subr.bf16.mxu1 %v3901_v8 }
 0x6a3   : > { %v4901_v35 = vpop.eup %3811  ;;  %v2414_v5 = vmul.f32 1.442695, %v2384_v7  ;;  %v2439_v10 = vsel %vm823_vm2, %v4898_v51, 0.0 }
 0x6a4   : > { %2440 = vadd.xlane.f32.xlu1 %v2439_v10  ;;  %v2436_v32 = vsel %vm823_vm2, %v4901_v35, 0.0  ;;  %v2507_v37 = vpop.permute.xlu0 %2506  ;;  %v2601_v12 = vpop.permute.xlu1 %2600 }
 0x6a5   : > { %3825 = vpow2.f32 %v2414_v5  ;;  %2437 = vadd.xlane.f32.xlu0 %v2436_v32  ;;  %3542 = vmatpush3.bf16.msra.mxu0 %v2507_v37 }
 0x6a6   : > { %v4907_v9 = vpop.eup %3813  ;;  %3553 = vmatprep.subr.bf16.mxu0 %v3901_v8 }
 0x6a7   : > { %v4910_v2 = vpop.eup %3815  ;;  %v2445_v60 = vsel %vm823_vm2, %v4907_v9, 0.0 }
 0x6a8   : > { %2446 = vadd.xlane.f32.xlu1 %v2445_v60  ;;  %v2442_v27 = vsel %vm823_vm2, %v4910_v2, 0.0  ;;  %v2648_v47 = vpop.permute.xlu1 %2647  ;;  %v2695_v20 = vpop.permute.xlu0 %2694 }
 0x6a9   : > { %2443 = vadd.xlane.f32.xlu0 %v2442_v27 }
 0x6aa   : > { %v4916_v15 = vpop.eup %3817 }
 0x6ab   : > { %v4918_v3 = vpop.eup %3819  ;;  %v2451_v48 = vsel %vm823_vm2, %v4916_v15, 0.0 }
 0x6ac   : > { %2452 = vadd.xlane.f32.xlu1 %v2451_v48  ;;  %v2448_v63 = vsel %vm823_vm2, %v4918_v3, 0.0 }
 0x6ad   : > { %2449 = vadd.xlane.f32.xlu0 %v2448_v63 }
 0x6ae   : > { %v4924_v52 = vpop.eup %3821 }
 0x6af   : > { %v4926_v57 = vpop.eup %3823  ;;  %v2457_v54 = vsel %vm823_vm2, %v4924_v52, 0.0 }
 0x6b0   : > { %2458 = vadd.xlane.f32.xlu1 %v2457_v54  ;;  %v2454_v6 = vsel %vm823_vm2, %v4926_v57, 0.0 }
 0x6b1   : > { %2455 = vadd.xlane.f32.xlu0 %v2454_v6 }
 0x6b2   : > { %v4932_v50 = vpop.eup %3825 }
 0x6b3   : > { %v2460_v11 = vsel %vm823_vm2, %v4932_v50, 0.0 }
 0x6b5   : > { %2461 = vadd.xlane.f32.xlu0 %v2460_v11 }
 0x6cb   : > { %2788 = vrot.lane.b32.xlu0 %v4267_v53, %s3907_s27 }
 0x6d9   : > { %v2369_v45 = vpop.xlane.xlu1 %2368 }
 0x6da   : > { %v2385_v33 = vsub.f32 %v4854_v18, %v2369_v45 }
 0x6dc   : > { %v2416_v21 = vmul.f32 1.442695, %v2385_v33 }
 0x6dd   : > { %v4945_v36 = vpop.permute.xlu1 %2741 }
 0x6de   : > { %3827 = vpow2.f32 %v2416_v21  ;;  %v2420_v53 = vpop.xlane.xlu0 %2419 }
 0x6df   : > { %3829 = vrcp.f32 %v2420_v53 }
 0x6eb   : > { %v4939_v23 = vpop.eup %3827 }
 0x6ec   : > { %v2463_v1 = vsel %vm823_vm2, %v4939_v23, 0.0  ;;  %v3830_v58 = vpop.eup %3829 }
 0x6ed   : > { %2464 = vadd.xlane.f32.xlu1 %v2463_v1  ;;  %v2482_v26 = vmul.f32 %v3830_v58, %v4858_v0 }
 0x6fe   : > { %2835 = vrot.lane.b32.xlu1 %v4265_v28, %s3907_s27  ;;  %s5056_s27 = scalar_lea.vmem %s5114_s9, %s3229_s19 }
 0x70e   : > { %v2423_v40 = vpop.xlane.xlu1 %2422 }
 0x70f   : > { %3831 = vrcp.f32 %v2423_v40 }
 0x71c   : > { %v3832_v18 = vpop.eup %3831 }
 0x71d   : > { %v2483_v41 = vmul.f32 %v3832_v18, %v4865_v46 }
 0x71f   : > { %v2498_v25 = vpack.c.bf16 %v2483_v41, %v2482_v26 }
 0x721   : > { %3544 = vmatmul.mubr.msk.bf16.vlgmr.msra.gmra.mxu0 %vm823_vm2, %v2498_v25  ;;  %v2426_v55 = vpop.xlane.xlu0 %2425 }
 0x722   : > { %3554 = vmatpush3.bf16.msra.mxu0 %v2601_v12  ;;  %3555 = vmatprep.mubr.msk.bf16.mxu0 %vm3902_vm1, %v3901_v8  ;;  %3833 = vrcp.f32 %v2426_v55 }
 0x723   : > { %3565 = vmatprep.subr.bf16.mxu0 %v3901_v8 }
 0x725   : > { %v2429_v28 = vpop.xlane.xlu1 %2428 }
 0x726   : > { %3835 = vrcp.f32 %v2429_v28 }
 0x729   : > { %v2435_v62 = vpop.xlane.xlu1 %2434  ;;  %v2432_v24 = vpop.xlane.xlu0 %2431 }
 0x72a   : > { %3837 = vrcp.f32 %v2435_v62 }
 0x72b   : > { %3839 = vrcp.f32 %v2432_v24 }
 0x72d   : > { %v2441_v0 = vpop.xlane.xlu1 %2440 }
 0x72e   : > { %3841 = vrcp.f32 %v2441_v0  ;;  %v2438_v46 = vpop.xlane.xlu0 %2437 }
 0x72f   : > { %3843 = vrcp.f32 %v2438_v46  ;;  %v3834_v7 = vpop.eup %3833 }
 0x730   : > { %v2484_v37 = vmul.f32 %v3834_v7, %v4877_v22 }
 0x731   : > { %v2447_v5 = vpop.xlane.xlu1 %2446 }
 0x732   : > { %3845 = vrcp.f32 %v2447_v5  ;;  %v2444_v10 = vpop.xlane.xlu0 %2443 }
 0x733   : > { %v3836_v32 = vpop.eup %3835  ;;  %3847 = vrcp.f32 %v2444_v10 }
 0x734   : > { %v2485_v60 = vmul.f32 %v3836_v32, %v4883_v19 }
 0x735   : > { %v2453_v27 = vpop.xlane.xlu1 %2452 }
 0x736   : > { %3849 = vrcp.f32 %v2453_v27  ;;  %v2450_v48 = vpop.xlane.xlu0 %2449  ;;  %v2499_v63 = vpack.c.bf16 %v2485_v60, %v2484_v37  ;;  %v2971_v27 = vld [vmem:[%s5112_s7 + $0x8] sm:$0xff] }
 0x737   : > { %v3838_v54 = vpop.eup %3837  ;;  %3851 = vrcp.f32 %v2450_v48 }
 0x738   : > { %v3840_v6 = vpop.eup %3839  ;;  %3550 = vmatmul.mubr.msk.bf16.vlgmr.msra.gmra.mxu1 %vm823_vm2, %v2499_v63  ;;  %v2487_v11 = vmul.f32 %v3838_v54, %v4887_v14 }
 0x739   : > { %3560 = vmatpush3.bf16.msra.mxu1 %v2648_v47  ;;  %v2459_v12 = vpop.xlane.xlu1 %2458  ;;  %v2486_v45 = vmul.f32 %v3840_v6, %v4891_v29  ;;  %3561 = vmatprep.mubr.msk.bf16.mxu1 %vm3902_vm1, %v3901_v8 }
 0x73a   : > { %3853 = vrcp.f32 %v2459_v12  ;;  %v2456_v22 = vpop.xlane.xlu0 %2455  ;;  %3571 = vmatprep.subr.bf16.mxu1 %v3901_v8 }
 0x73b   : > { %v3842_v19 = vpop.eup %3841  ;;  %3855 = vrcp.f32 %v2456_v22  ;;  %v2500_v33 = vpack.c.bf16 %v2487_v11, %v2486_v45 }
 0x73c   : > { %v3844_v21 = vpop.eup %3843  ;;  %v2489_v1 = vmul.f32 %v3842_v19, %v4898_v51 }
 0x73d   : > { %3556 = vmatmul.mubr.msk.bf16.vlgmr.msra.gmra.mxu0 %vm823_vm2, %v2500_v33  ;;  %v2488_v14 = vmul.f32 %v3844_v21, %v4901_v35 }
 0x73e   : > { %3566 = vmatpush3.bf16.msra.mxu0 %v2695_v20  ;;  %3567 = vmatprep.mubr.msk.bf16.mxu0 %vm3902_vm1, %v3901_v8  ;;  %v2462_v47 = vpop.xlane.xlu0 %2461 }
 0x73f   : > { %v3846_v29 = vpop.eup %3845  ;;  %v2501_v53 = vpack.c.bf16 %v2489_v1, %v2488_v14  ;;  %3577 = vmatprep.subr.bf16.mxu0 %v3901_v8  ;;  %3857 = vrcp.f32 %v2462_v47 }
 0x740   : > { %v3848_v40 = vpop.eup %3847  ;;  %v2491_v58 = vmul.f32 %v3846_v29, %v4907_v9 }
 0x741   : > { %3562 = vmatmul.mubr.msk.bf16.vlgmr.msra.gmra.mxu1 %vm823_vm2, %v2501_v53  ;;  %v2490_v51 = vmul.f32 %v3848_v40, %v4910_v2 }
 0x742   : > { %3572 = vmatpush3.bf16.msra.mxu1 %v4945_v36  ;;  %3573 = vmatprep.mubr.msk.bf16.mxu1 %vm3902_vm1, %v3901_v8  ;;  %v2789_v41 = vpop.permute.xlu0 %2788 }
 0x743   : > { %v3850_v35 = vpop.eup %3849  ;;  %v2502_v20 = vpack.c.bf16 %v2491_v58, %v2490_v51  ;;  %3583 = vmatprep.subr.bf16.mxu1 %v3901_v8 }
 0x744   : > { %v3852_v18 = vpop.eup %3851  ;;  %v2493_v26 = vmul.f32 %v3850_v35, %v4916_v15 }
 0x745   : > { %3568 = vmatmul.mubr.msk.bf16.vlgmr.msra.gmra.mxu0 %vm823_vm2, %v2502_v20  ;;  %v2492_v9 = vmul.f32 %v3852_v18, %v4918_v3 }
 0x746   : > { %3578 = vmatpush3.bf16.msra.mxu0 %v2789_v41  ;;  %3579 = vmatprep.mubr.msk.bf16.mxu0 %vm3902_vm1, %v3901_v8 }
 0x747   : > { %v3854_v2 = vpop.eup %3853  ;;  %v2503_v36 = vpack.c.bf16 %v2493_v26, %v2492_v9 }
 0x748   : > { %v3856_v25 = vpop.eup %3855  ;;  %v2495_v55 = vmul.f32 %v3854_v2, %v4924_v52 }
 0x749   : > { %3574 = vmatmul.mubr.msk.bf16.vlgmr.msra.gmra.mxu1 %vm823_vm2, %v2503_v36  ;;  %v2494_v28 = vmul.f32 %v3856_v25, %v4926_v57  ;;  %v2973_v57 = vld [vmem:[%s5112_s7 + $0x18] sm:$0xff] }
 0x74a   : > { %3585 = vmatprep.mubr.msk.bf16.mxu1 %vm3902_vm1, %v3901_v8  ;;  %v2972_v8 = vld [vmem:[%s5112_s7 + $0x10] sm:$0xff] }
 0x74b   : > { %v2504_v15 = vpack.c.bf16 %v2495_v55, %v2494_v28  ;;  %v2975_v10 = vpack.c.bf16 %v2973_v57, %v2972_v8 }
 0x74c   : > { %v3858_v24 = vpop.eup %3857 }
 0x74d   : > { %3580 = vmatmul.mubr.msk.bf16.vlgmr.msra.gmra.mxu0 %vm823_vm2, %v2504_v15  ;;  %v2496_v46 = vmul.f32 %v3858_v24, %v4932_v50  ;;  %3589 = vmatprep.subr.bf16.mxu0 %v2975_v10 }
 0x74e   : > { %3590 = vmatpush3.bf16.msra.mxu0 %v2975_v10 }
 0x776   : > { %v2465_v3 = vpop.xlane.xlu1 %2464 }
 0x777   : > { %3859 = vrcp.f32 %v2465_v3 }
 0x77a   : > { %v2836_v62 = vpop.permute.xlu1 %2835 }
 0x77b   : > { %3584 = vmatpush3.bf16.msra.mxu1 %v2836_v62 }
 0x784   : > { %v3860_v0 = vpop.eup %3859 }
 0x785   : > { %v2497_v52 = vmul.f32 %v3860_v0, %v4939_v23  ;;  %v2970_v23 = vld [vmem:[%s5112_s7] sm:$0xff] }
 0x786   : > { %v2974_v48 = vpack.c.bf16 %v2971_v27, %v2970_v23 }
 0x787   : > { %v2505_v7 = vpack.c.bf16 %v2497_v52, %v2496_v46 }
 0x788   : > { %3591 = vmatprep.subr.bf16.mxu0 %v2974_v48 }
 0x789   : > { %3586 = vmatmul.mubr.msk.bf16.vlgmr.msra.gmra.mxu1 %vm823_vm2, %v2505_v7  ;;  %3592 = vmatpush3.bf16.msra.mxu0 %v2974_v48 }
 0x7e1   : > { %v2546_v5 = vpop.f32.mrf.mxu0 }
 0x7e3   : > { %v3545_v32 = vpop.f32.mrf.mxu0 }
 0x7e5   : > { %v2549_v37 = vpop.f32.mrf.mxu0 }
 0x7e6   : > { %v3661_v50 = vpack.i.bf16 %v2549_v37, %v2546_v5 }
 0x7e7   : > { %v3546_v60 = vpop.f32.mrf.mxu0 }
 0x7e8   : > { %3662 = vrot.lane.b32.xlu0 %v3661_v50, %s3908_s17 }
 0x7f8   : > { %v2593_v63 = vpop.f32.mrf.mxu1 }
 0x7fa   : > { %v3551_v54 = vpop.f32.mrf.mxu1 }
 0x7fc   : > { %v2596_v6 = vpop.f32.mrf.mxu1 }
 0x7fd   : > { %v3666_v11 = vpack.i.bf16 %v2596_v6, %v2593_v63  ;;  %v2640_v12 = vpop.f32.mrf.mxu0 }
 0x7fe   : > { %v3552_v45 = vpop.f32.mrf.mxu1 }
 0x7ff   : > { %v3557_v22 = vpop.f32.mrf.mxu0  ;;  %3667 = vrot.lane.b32.xlu1 %v3666_v11, %s3908_s17 }
 0x801   : > { %v2643_v19 = vpop.f32.mrf.mxu0  ;;  %v2687_v33 = vpop.f32.mrf.mxu1 }
 0x802   : > { %v3671_v21 = vpack.i.bf16 %v2643_v19, %v2640_v12 }
 0x803   : > { %v3558_v1 = vpop.f32.mrf.mxu0  ;;  %v3563_v14 = vpop.f32.mrf.mxu1 }
 0x804   : > { %3672 = vrot.lane.b32.xlu0 %v3671_v21, %s3908_s17 }
 0x805   : > { %v2690_v29 = vpop.f32.mrf.mxu1  ;;  %v2734_v47 = vpop.f32.mrf.mxu0 }
 0x806   : > { %v3676_v53 = vpack.i.bf16 %v2690_v29, %v2687_v33 }
 0x807   : > { %v3564_v40 = vpop.f32.mrf.mxu1  ;;  %v3569_v58 = vpop.f32.mrf.mxu0 }
 0x808   : > { %3677 = vrot.lane.b32.xlu1 %v3676_v53, %s3908_s17 }
 0x809   : > { %v2737_v51 = vpop.f32.mrf.mxu0  ;;  %v2781_v35 = vpop.f32.mrf.mxu1 }
 0x80a   : > { %v3681_v20 = vpack.i.bf16 %v2737_v51, %v2734_v47 }
 0x80b   : > { %v3570_v18 = vpop.f32.mrf.mxu0  ;;  %v3575_v26 = vpop.f32.mrf.mxu1 }
 0x80c   : > { %3682 = vrot.lane.b32.xlu0 %v3681_v20, %s3908_s17 }
 0x80d   : > { %v2784_v41 = vpop.f32.mrf.mxu1  ;;  %v2828_v9 = vpop.f32.mrf.mxu0 }
 0x80e   : > { %v3686_v2 = vpack.i.bf16 %v2784_v41, %v2781_v35 }
 0x80f   : > { %v3576_v36 = vpop.f32.mrf.mxu1  ;;  %v3581_v25 = vpop.f32.mrf.mxu0 }
 0x810   : > { %3687 = vrot.lane.b32.xlu1 %v3686_v2, %s3908_s17 }
 0x811   : > { %v2831_v55 = vpop.f32.mrf.mxu0 }
 0x812   : > { %v3691_v28 = vpack.i.bf16 %v2831_v55, %v2828_v9 }
 0x813   : > { %v3582_v15 = vpop.f32.mrf.mxu0 }
 0x814   : > { %3692 = vrot.lane.b32.xlu0 %v3691_v28, %s3908_s17 }
 0x849   : > { %v2875_v3 = vpop.f32.mrf.mxu1 }
 0x84b   : > { %v3587_v62 = vpop.f32.mrf.mxu1 }
 0x84d   : > { %v2878_v24 = vpop.f32.mrf.mxu1 }
 0x84e   : > { %v3696_v0 = vpack.i.bf16 %v2878_v24, %v2875_v3 }
 0x84f   : > { %v3588_v46 = vpop.f32.mrf.mxu1 }
 0x850   : > { %3697 = vrot.lane.b32.xlu1 %v3696_v0, %s3908_s17 }
 0x85a   : > { %v3663_v52 = vpop.permute.xlu0 %3662 }
 0x85b   : > { %v3665_v7 = vunpack.i.h.bf16 %v3663_v52  ;;  %v3664_v8 = vunpack.i.l.bf16 %v3663_v52 }
 0x85d   : > { %v2947_v57 = vsel %vm823_vm2, %v4711_v16, %v3665_v7  ;;  %v2946_v5 = vsel %vm823_vm2, %v4709_v13, %v3664_v8 }
 0x85e   : > { %v2962_v10 = vpack.c.bf16 %v2947_v57, %v2946_v5 }
 0x860   : > { %3593 = vmatprep.mubr.msk.bf16.mxu0 %vm414_vm0, %v2962_v10 }
 0x871   : > { %v3668_v32 = vpop.permute.xlu1 %3667 }
 0x872   : > { %v3670_v37 = vunpack.i.h.bf16 %v3668_v32  ;;  %v3669_v50 = vunpack.i.l.bf16 %v3668_v32 }
 0x874   : > { %v2949_v60 = vsel %vm823_vm2, %v4715_v43, %v3670_v37  ;;  %v2948_v23 = vsel %vm823_vm2, %v4713_v56, %v3669_v50 }
 0x875   : > { %v2963_v27 = vpack.c.bf16 %v2949_v60, %v2948_v23 }
 0x876   : > { %v3673_v48 = vpop.permute.xlu0 %3672 }
 0x877   : > { %v3675_v63 = vunpack.i.h.bf16 %v3673_v48  ;;  %v3674_v54 = vunpack.i.l.bf16 %v3673_v48  ;;  %3594 = vmatmul.mubr.msk.bf16.vlgmr.msra.gmra.mxu0 %vm414_vm0, %v2963_v27 }
 0x879   : > { %v2951_v13 = vsel %vm823_vm2, %v4719_v34, %v3675_v63  ;;  %v2950_v16 = vsel %vm823_vm2, %v4717_v61, %v3674_v54 }
 0x87a   : > { %v2964_v6 = vpack.c.bf16 %v2951_v13, %v2950_v16  ;;  %v3678_v11 = vpop.permute.xlu1 %3677 }
 0x87b   : > { %v3680_v12 = vunpack.i.h.bf16 %v3678_v11  ;;  %v3679_v45 = vunpack.i.l.bf16 %v3678_v11 }
 0x87c   : > { %3597 = vmatprep.mubr.msk.bf16.mxu0 %vm414_vm0, %v2964_v6 }
 0x87d   : > { %v2953_v56 = vsel %vm823_vm2, %v4723_v49, %v3680_v12  ;;  %v2952_v43 = vsel %vm823_vm2, %v4721_v30, %v3679_v45 }
 0x87e   : > { %v2965_v22 = vpack.c.bf16 %v2953_v56, %v2952_v43  ;;  %v3683_v19 = vpop.permute.xlu0 %3682 }
 0x87f   : > { %v3685_v33 = vunpack.i.h.bf16 %v3683_v19  ;;  %v3684_v21 = vunpack.i.l.bf16 %v3683_v19 }
 0x880   : > { %3598 = vmatmul.mubr.msk.bf16.gmra.mxu0 %vm414_vm0, %v2965_v22 }
 0x881   : > { %v2955_v61 = vsel %vm823_vm2, %v4727_v42, %v3685_v33  ;;  %v2954_v34 = vsel %vm823_vm2, %v4725_v39, %v3684_v21 }
 0x882   : > { %v2966_v1 = vpack.c.bf16 %v2955_v61, %v2954_v34  ;;  %v3688_v14 = vpop.permute.xlu1 %3687 }
 0x883   : > { %v3690_v29 = vunpack.i.h.bf16 %v3688_v14  ;;  %v3689_v47 = vunpack.i.l.bf16 %v3688_v14 }
 0x884   : > { %3601 = vmatprep.mubr.msk.bf16.mxu0 %vm414_vm0, %v2966_v1 }
 0x885   : > { %v2957_v30 = vsel %vm823_vm2, %v4755_v4, %v3690_v29  ;;  %v2956_v49 = vsel %vm823_vm2, %v4747_v38, %v3689_v47 }
 0x886   : > { %v2967_v53 = vpack.c.bf16 %v2957_v30, %v2956_v49  ;;  %v3693_v40 = vpop.permute.xlu0 %3692 }
 0x887   : > { %v3695_v58 = vunpack.i.h.bf16 %v3693_v40  ;;  %v3694_v42 = vunpack.i.l.bf16 %v3693_v40 }
 0x888   : > { %3602 = vmatmul.mubr.msk.bf16.gmra.mxu0 %vm414_vm0, %v2967_v53 }
 0x889   : > { %v2959_v39 = vsel %vm823_vm2, %v4731_v59, %v3695_v58  ;;  %v2958_v51 = vsel %vm823_vm2, %v4729_v44, %v3694_v42  ;;  %v3281_v59 = vld [vmem:[%s5113_s8] ss:$0 sm:$0xff] }
 0x88a   : > { %v2968_v35 = vpack.c.bf16 %v2959_v39, %v2958_v51 }
 0x88c   : > { %3605 = vmatprep.mubr.msk.bf16.mxu0 %vm414_vm0, %v2968_v35 }
 0x8c2   : > { %v3698_v4 = vpop.permute.xlu1 %3697 }
 0x8c3   : > { %v3700_v20 = vunpack.i.h.bf16 %v3698_v4  ;;  %v3699_v18 = vunpack.i.l.bf16 %v3698_v4 }
 0x8c5   : > { %v2961_v38 = vsel %vm823_vm2, %v4765_v17, %v3700_v20  ;;  %v2960_v26 = vsel %vm823_vm2, %v4759_v31, %v3699_v18 }
 0x8c6   : > { %v2969_v41 = vpack.c.bf16 %v2961_v38, %v2960_v26 }
 0x8c8   : > { %3606 = vmatmul.mubr.msk.bf16.gmra.mxu0 %vm414_vm0, %v2969_v41 }
 0x937   : > { %v3595_v44 = vpop.f32.mrf.mxu0 }
 0x938   : > { %v3050_v31 = vadd.f32 %v3595_v44, %v3281_v59 }
 0x939   : > { %v3041_v17 = vpop.f32.mrf.mxu0 }
 0x93a   : > { %3106 = vst.msk [vmem:[%s5056_s27 + $0x10] sm:$0xff] %vm414_vm0, %v3050_v31  ;;  %v3042_v9 = vadd.f32 %v3281_v59, %v3041_v17 }
 0x93b   : > { %v3596_v2 = vpop.f32.mrf.mxu0 }
 0x93c   : > { %3104 = vst.msk [vmem:[%s5056_s27] sm:$0xff] %vm414_vm0, %v3042_v9  ;;  %v3053_v36 = vadd.f32 %v3596_v2, %v3281_v59 }
 0x93d   : > { %v3044_v25 = vpop.f32.mrf.mxu0 }
 0x93e   : > { %3107 = vst.msk [vmem:[%s5056_s27 + $0x18] sm:$0xff] %vm414_vm0, %v3053_v36  ;;  %v3045_v55 = vadd.f32 %v3281_v59, %v3044_v25 }
 0x940   : > { %3105 = vst.msk [vmem:[%s5056_s27 + $0x8] sm:$0xff] %vm414_vm0, %v3045_v55  ;;  %v3599_v28 = vpop.f32.mrf.mxu0 }
 0x941   : > { %v3066_v15 = vadd.f32 %v3599_v28, %v3281_v59 }
 0x942   : > { %v3057_v3 = vpop.f32.mrf.mxu0 }
 0x943   : > { %3110 = vst.msk [vmem:[%s5056_s27 + $0x30] sm:$0xff] %vm414_vm0, %v3066_v15  ;;  %v3058_v62 = vadd.f32 %v3281_v59, %v3057_v3 }
 0x944   : > { %v3600_v24 = vpop.f32.mrf.mxu0 }
 0x945   : > { %3108 = vst.msk [vmem:[%s5056_s27 + $0x20] sm:$0xff] %vm414_vm0, %v3058_v62  ;;  %v3069_v0 = vadd.f32 %v3600_v24, %v3281_v59 }
 0x946   : > { %v3060_v46 = vpop.f32.mrf.mxu0 }
 0x947   : > { %3111 = vst.msk [vmem:[%s5056_s27 + $0x38] sm:$0xff] %vm414_vm0, %v3069_v0  ;;  %v3061_v52 = vadd.f32 %v3281_v59, %v3060_v46 }
 0x948   : > { %v3603_v7 = vpop.f32.mrf.mxu0 }
 0x949   : > { %3109 = vst.msk [vmem:[%s5056_s27 + $0x28] sm:$0xff] %vm414_vm0, %v3061_v52  ;;  %v3082_v8 = vadd.f32 %v3603_v7, %v3281_v59 }
 0x94a   : > { %v3073_v57 = vpop.f32.mrf.mxu0 }
 0x94b   : > { %3114 = vst.msk [vmem:[%s5056_s27 + $0x50] sm:$0xff] %vm414_vm0, %v3082_v8  ;;  %v3074_v5 = vadd.f32 %v3281_v59, %v3073_v57 }
 0x94c   : > { %v3604_v10 = vpop.f32.mrf.mxu0 }
 0x94d   : > { %3112 = vst.msk [vmem:[%s5056_s27 + $0x40] sm:$0xff] %vm414_vm0, %v3074_v5  ;;  %v3085_v32 = vadd.f32 %v3604_v10, %v3281_v59 }
 0x94e   : > { %v3076_v37 = vpop.f32.mrf.mxu0 }
 0x94f   : > { %3115 = vst.msk [vmem:[%s5056_s27 + $0x58] sm:$0xff] %vm414_vm0, %v3085_v32  ;;  %v3077_v50 = vadd.f32 %v3281_v59, %v3076_v37 }
 0x951   : > { %3113 = vst.msk [vmem:[%s5056_s27 + $0x48] sm:$0xff] %vm414_vm0, %v3077_v50 }
 0x988   : > { %v3607_v60 = vpop.f32.mrf.mxu0 }
 0x989   : > { %v3098_v23 = vadd.f32 %v3607_v60, %v3281_v59 }
 0x98a   : > { %v3089_v27 = vpop.f32.mrf.mxu0 }
 0x98b   : > { %3118 = vst.msk [vmem:[%s5056_s27 + $0x70] sm:$0xff] %vm414_vm0, %v3098_v23  ;;  %v3090_v48 = vadd.f32 %v3281_v59, %v3089_v27 }
 0x98c   : > { %v3608_v63 = vpop.f32.mrf.mxu0 }
 0x98d   : > { %3116 = vst.msk [vmem:[%s5056_s27 + $0x60] sm:$0xff] %vm414_vm0, %v3090_v48  ;;  %v3101_v54 = vadd.f32 %v3608_v63, %v3281_v59 }
 0x98e   : > { %v3092_v13 = vpop.f32.mrf.mxu0 }
 0x98f   : > { %3119 = vst.msk [vmem:[%s5056_s27 + $0x78] sm:$0xff] %vm414_vm0, %v3101_v54  ;;  %v3093_v16 = vadd.f32 %v3281_v59, %v3092_v13 }
 0x991   : > { %3117 = vst.msk [vmem:[%s5056_s27 + $0x68] sm:$0xff] %vm414_vm0, %v3093_v16 }
 0x992 PF: > { %s19_s13 = sadd.s32 1, %s3899_s13   ;;  %s5115_s30 = smov %s3891_s11 }
 0x993   : > { %p16_p8 = scmp.ge.s32.totalorder %s19_s13, 6   ;;  %s5116_s10 = smov %s3895_s12 }
 0x994   : > { %s5117_s11 = smov %s5120_s14  ;;  %s5118_s12 = smov %s5124_s15 }
 0x995   :  { %18 = sbr.rel (!%p16_p8) target bundleno = 3 (0x3), region = 90 }

// kernel: _lambda_.9
= control target key start
LH: loop header
LB: loop body
LE: loop exit
PB: predicated region body
PF: predicated region fallthrough
CT: control target
= control target key end

     0   :  { %s1415_s24 = smov 0   ;;  %s1417_s25 = smov 0   ;;  %s1903_s0 = inlined_call_operand.vmem [shape: f32[2,256,32], index: 0, kind: input, shape index: {}]   ;;  %s1904_s1 = inlined_call_operand.vmem [shape: f32[1,32], index: 1, kind: input, shape index: {}]   ;;  %s1905_s2 = inlined_call_operand.vmem [shape: f32[1,32], index: 2, kind: input, shape index: {}]   ;;  %s1906_s3 = inlined_call_operand.vmem [shape: f32[32,64], index: 3, kind: input, shape index: {}]   ;;  %s1907_s4 = inlined_call_operand.vmem [shape: f32[1,64], index: 4, kind: input, shape index: {}]   ;;  %s1908_s5 = inlined_call_operand.vmem [shape: f32[64,32], index: 5, kind: input, shape index: {}]   ;;  %s1909_s6 = inlined_call_operand.vmem [shape: f32[1,32], index: 6, kind: input, shape index: {}]   ;;  %s1910_s7 = inlined_call_operand.vmem [shape: f32[2,256,32], index: 7, kind: output, shape index: {}]  }
   0x1   :  { %s1419_s26 = smov 0   ;;  %s1421_s27 = smov 0  }
   0x2   :  { %s1423_s28 = smov 0  }
   0x3 LB: > { %s26_s29 = sadd.s32 1, %s1365_s26  ;;  %s29_s30 = sadd.s32 1, %s1369_s27  ;;  %s1373_s28 = sphi %s1423_s28, %s17_s28   ;;  %s1369_s27 = sphi %s1421_s27, %s1914_s27   ;;  %s1365_s26 = sphi %s1419_s26, %s1913_s26   ;;  %s1361_s25 = sphi %s1417_s25, %s1912_s25   ;;  %s1357_s24 = sphi %s1415_s24, %s1911_s24  }
   0x4   : > { %p27_p0 = scmp.ge.s32.totalorder %s26_s29, 2  ;;  %p1136_p1 = scmp.ge.s32.totalorder %s1373_s28, 1 }
   0x5   : > { %p258_p2 = scmp.lt.s32.totalorder %s1373_s28, 5 }
   0x6   : > { %s1916_s29 = smov (%p27_p0, %s26_s29), 0  ;;  %s1918_s30 = smov (!%p27_p0, %s29_s30), %s1369_s27 }
   0x7   : > { %p259_p3 = pnand %p1136_p1, %p258_p2  ;;  %p31_p4 = scmp.ge.s32.totalorder %s1918_s30, 2 }
   0x8   : > { %s1137_s8 = sshll.u32 (!%p259_p3), %s1357_s24, 4  ;;  %p299_p5 = scmp.lt.s32.totalorder (!%p259_p3), %s1361_s25, 1 }
   0x9   : > { %s1920_s30 = smov (%p31_p4, %s1918_s30), 0  ;;  %262 = sbr.rel (%p259_p3) target bundleno = 798 (0x31e), region = 48 }
   0xa   : > { %p301_p6 = scmp.lt.s32.totalorder (!%p259_p3), %s1137_s8, 31 }
   0xe   : > { %s1922_s25 = smov (!%p299_p5, %s1361_s25), 1  ;;  %s1924_s8 = smov (!%p301_p6, %s1137_s8), 31  ;;  %vm335_vm0 = vcmask 261120   ;;  %vm904_vm1 = vcmask 523264  }
   0xf   : > { %s1138_s9 = sshll.u32 %s1922_s25, 5 }
  0x10   : > { %s1445_s10 = sadd.s32 %s1138_s9, %s1924_s8 }
  0x11   : > { %s1139_s11 = sshll.u32 %s1445_s10, 3 }
  0x12   : > { %s1453_s14 = scalar_lea.vmem %s1903_s0, %s1139_s11  ;;  %s1854_s17 = scalar_lea.vmem %s1910_s7, %s1139_s11 }
  0x13   : > { %v319_v0 = vld [vmem:[%s1453_s14] sm:$0xff]  ;;  %v321_v1 = vld [vmem:[%s1453_s14 + $0x10] sm:$0xff]  ;;  %v320_v2 = vld [vmem:[%s1453_s14 + $0x8] sm:$0xff] }
  0x14   : > { %v336_v3 = vsel %vm335_vm0, %v319_v0, 0.0  ;;  %v342_v4 = vsel %vm335_vm0, %v321_v1, 0.0  ;;  %v322_v5 = vld [vmem:[%s1453_s14 + $0x18] sm:$0xff]  ;;  %v339_v6 = vsel %vm335_vm0, %v320_v2, 0.0  ;;  %v323_v8 = vld [vmem:[%s1453_s14 + $0x20] sm:$0xff]  ;;  %v324_v9 = vld [vmem:[%s1453_s14 + $0x28] sm:$0xff] }
  0x15   : > { %337 = vadd.xlane.f32.xlu0 %v336_v3  ;;  %343 = vadd.xlane.f32.xlu1 %v342_v4  ;;  %v345_v7 = vsel %vm335_vm0, %v322_v5, 0.0  ;;  %v348_v10 = vsel %vm335_vm0, %v323_v8, 0.0  ;;  %v351_v11 = vsel %vm335_vm0, %v324_v9, 0.0  ;;  %v1468_v12 = vld [vmem:[%s1453_s14 + $0x30] sm:$0xff]  ;;  %v1471_v13 = vld [vmem:[%s1453_s14 + $0x38] sm:$0xff]  ;;  %v1478_v16 = vld [vmem:[%s1453_s14 + $0x40] sm:$0xff] }
  0x16   : > { %v354_v14 = vsel %vm335_vm0, %v1468_v12, 0.0  ;;  %v357_v15 = vsel %vm335_vm0, %v1471_v13, 0.0  ;;  %v1481_v17 = vld [vmem:[%s1453_s14 + $0x48] sm:$0xff]  ;;  %v360_v18 = vsel %vm335_vm0, %v1478_v16, 0.0  ;;  %v1488_v20 = vld [vmem:[%s1453_s14 + $0x50] sm:$0xff]  ;;  %v1491_v21 = vld [vmem:[%s1453_s14 + $0x58] sm:$0xff] }
  0x17   : > { %v363_v19 = vsel %vm335_vm0, %v1481_v17, 0.0  ;;  %v366_v22 = vsel %vm335_vm0, %v1488_v20, 0.0  ;;  %v369_v23 = vsel %vm335_vm0, %v1491_v21, 0.0  ;;  %v1498_v24 = vld [vmem:[%s1453_s14 + $0x60] sm:$0xff]  ;;  %v1501_v25 = vld [vmem:[%s1453_s14 + $0x68] sm:$0xff]  ;;  %v1508_v28 = vld [vmem:[%s1453_s14 + $0x70] sm:$0xff] }
  0x18   : > { %v372_v26 = vsel %vm335_vm0, %v1498_v24, 0.0  ;;  %v375_v27 = vsel %vm335_vm0, %v1501_v25, 0.0  ;;  %v1511_v29 = vld [vmem:[%s1453_s14 + $0x78] sm:$0xff]  ;;  %v378_v30 = vsel %vm335_vm0, %v1508_v28, 0.0 }
  0x19   : > { %340 = vadd.xlane.f32.xlu0 %v339_v6  ;;  %346 = vadd.xlane.f32.xlu1 %v345_v7  ;;  %v381_v31 = vsel %vm335_vm0, %v1511_v29, 0.0 }
  0x1d   : > { %349 = vadd.xlane.f32.xlu0 %v348_v10  ;;  %352 = vadd.xlane.f32.xlu1 %v351_v11 }
  0x21   : > { %355 = vadd.xlane.f32.xlu0 %v354_v14  ;;  %358 = vadd.xlane.f32.xlu1 %v357_v15 }
  0x25   : > { %361 = vadd.xlane.f32.xlu0 %v360_v18  ;;  %364 = vadd.xlane.f32.xlu1 %v363_v19 }
  0x29   : > { %367 = vadd.xlane.f32.xlu0 %v366_v22  ;;  %370 = vadd.xlane.f32.xlu1 %v369_v23 }
  0x2d   : > { %373 = vadd.xlane.f32.xlu0 %v372_v26  ;;  %376 = vadd.xlane.f32.xlu1 %v375_v27 }
  0x31   : > { %379 = vadd.xlane.f32.xlu0 %v378_v30  ;;  %382 = vadd.xlane.f32.xlu1 %v381_v31 }
  0x9e   : > { %v338_v32 = vpop.xlane.xlu0 %337  ;;  %v344_v33 = vpop.xlane.xlu1 %343 }
  0x9f   : > { %v385_v34 = vmul.f32 0.03125, %v338_v32  ;;  %v387_v35 = vmul.f32 0.03125, %v344_v33 }
  0xa1   : > { %v1517_v36 = vsub.f32 %v319_v0, %v385_v34  ;;  %v1519_v37 = vsub.f32 %v321_v1, %v387_v35 }
  0xa2   : > { %v341_v38 = vpop.xlane.xlu0 %340  ;;  %v347_v39 = vpop.xlane.xlu1 %346 }
  0xa3   : > { %v386_v40 = vmul.f32 0.03125, %v341_v38  ;;  %v388_v41 = vmul.f32 0.03125, %v347_v39  ;;  %v417_v42 = vmul.f32 %v1517_v36, %v1517_v36  ;;  %v419_v43 = vmul.f32 %v1519_v37, %v1519_v37 }
  0xa5   : > { %v1525_v44 = vsub.f32 %v320_v2, %v386_v40  ;;  %v1527_v45 = vsub.f32 %v322_v5, %v388_v41  ;;  %v433_v46 = vsel %vm335_vm0, %v417_v42, 0.0  ;;  %v439_v49 = vsel %vm335_vm0, %v419_v43, 0.0 }
  0xa6   : > { %434 = vadd.xlane.f32.xlu0 %v433_v46  ;;  %v350_v47 = vpop.xlane.xlu0 %349  ;;  %v353_v48 = vpop.xlane.xlu1 %352 }
  0xa7   : > { %v389_v50 = vmul.f32 0.03125, %v350_v47  ;;  %v390_v51 = vmul.f32 0.03125, %v353_v48  ;;  %v418_v52 = vmul.f32 %v1525_v44, %v1525_v44  ;;  %v420_v53 = vmul.f32 %v1527_v45, %v1527_v45 }
  0xa9   : > { %v1535_v54 = vsub.f32 %v323_v8, %v389_v50  ;;  %v1537_v55 = vsub.f32 %v324_v9, %v390_v51  ;;  %v436_v56 = vsel %vm335_vm0, %v418_v52, 0.0  ;;  %v442_v59 = vsel %vm335_vm0, %v420_v53, 0.0  ;;  %v602_v53 = vld [vmem:[%s1906_s3 + $0x18] sm:$0xff] }
  0xaa   : > { %440 = vadd.xlane.f32.xlu0 %v439_v49  ;;  %437 = vadd.xlane.f32.xlu1 %v436_v56  ;;  %v356_v57 = vpop.xlane.xlu0 %355  ;;  %v359_v58 = vpop.xlane.xlu1 %358 }
  0xab   : > { %v391_v60 = vmul.f32 0.03125, %v356_v57  ;;  %v392_v61 = vmul.f32 0.03125, %v359_v58  ;;  %v421_v62 = vmul.f32 %v1535_v54, %v1535_v54  ;;  %v422_v63 = vmul.f32 %v1537_v55, %v1537_v55  ;;  %v599_v57 = vld [vmem:[%s1906_s3] sm:$0xff]  ;;  %v600_v58 = vld [vmem:[%s1906_s3 + $0x8] sm:$0xff] }
  0xad   : > { %v1546_v0 = vsub.f32 %v1468_v12, %v391_v60  ;;  %v1549_v1 = vsub.f32 %v1471_v13, %v392_v61  ;;  %v445_v2 = vsel %vm335_vm0, %v421_v62, 0.0  ;;  %v448_v5 = vsel %vm335_vm0, %v422_v63, 0.0 }
  0xae   : > { %443 = vadd.xlane.f32.xlu1 %v442_v59  ;;  %446 = vadd.xlane.f32.xlu0 %v445_v2  ;;  %v362_v3 = vpop.xlane.xlu0 %361  ;;  %v365_v4 = vpop.xlane.xlu1 %364  ;;  %v603_v59 = vpack.c.bf16 %v600_v58, %v599_v57 }
  0xaf   : > { %v393_v6 = vmul.f32 0.03125, %v362_v3  ;;  %v394_v7 = vmul.f32 0.03125, %v365_v4  ;;  %v423_v8 = vmul.f32 %v1546_v0, %v1546_v0  ;;  %v424_v9 = vmul.f32 %v1549_v1, %v1549_v1 }
  0xb1   : > { %v1558_v10 = vsub.f32 %v1478_v16, %v393_v6  ;;  %v1561_v11 = vsub.f32 %v1481_v17, %v394_v7  ;;  %v451_v12 = vsel %vm335_vm0, %v423_v8, 0.0  ;;  %v454_v15 = vsel %vm335_vm0, %v424_v9, 0.0 }
  0xb2   : > { %449 = vadd.xlane.f32.xlu1 %v448_v5  ;;  %452 = vadd.xlane.f32.xlu0 %v451_v12  ;;  %v368_v13 = vpop.xlane.xlu0 %367  ;;  %v371_v14 = vpop.xlane.xlu1 %370 }
  0xb3   : > { %v395_v18 = vmul.f32 0.03125, %v368_v13  ;;  %v396_v19 = vmul.f32 0.03125, %v371_v14  ;;  %v425_v22 = vmul.f32 %v1558_v10, %v1558_v10  ;;  %v426_v16 = vmul.f32 %v1561_v11, %v1561_v11 }
  0xb5   : > { %v1570_v23 = vsub.f32 %v1488_v20, %v395_v18  ;;  %v1573_v17 = vsub.f32 %v1491_v21, %v396_v19  ;;  %v457_v26 = vsel %vm335_vm0, %v425_v22, 0.0  ;;  %v460_v31 = vsel %vm335_vm0, %v426_v16, 0.0 }
  0xb6   : > { %455 = vadd.xlane.f32.xlu1 %v454_v15  ;;  %458 = vadd.xlane.f32.xlu0 %v457_v26  ;;  %v374_v27 = vpop.xlane.xlu0 %373  ;;  %v377_v30 = vpop.xlane.xlu1 %376 }
  0xb7   : > { %v397_v32 = vmul.f32 0.03125, %v374_v27  ;;  %v398_v33 = vmul.f32 0.03125, %v377_v30  ;;  %v427_v34 = vmul.f32 %v1570_v23, %v1570_v23  ;;  %v428_v20 = vmul.f32 %v1573_v17, %v1573_v17 }
  0xb9   : > { %v1582_v35 = vsub.f32 %v1498_v24, %v397_v32  ;;  %v1585_v21 = vsub.f32 %v1501_v25, %v398_v33  ;;  %v463_v38 = vsel %vm335_vm0, %v427_v34, 0.0  ;;  %v466_v41 = vsel %vm335_vm0, %v428_v20, 0.0 }
  0xba   : > { %461 = vadd.xlane.f32.xlu1 %v460_v31  ;;  %464 = vadd.xlane.f32.xlu0 %v463_v38  ;;  %v380_v39 = vpop.xlane.xlu0 %379  ;;  %v383_v40 = vpop.xlane.xlu1 %382 }
  0xbb   : > { %v399_v42 = vmul.f32 0.03125, %v380_v39  ;;  %v400_v43 = vmul.f32 0.03125, %v383_v40  ;;  %v429_v46 = vmul.f32 %v1582_v35, %v1582_v35  ;;  %v430_v24 = vmul.f32 %v1585_v21, %v1585_v21  ;;  %v1623_v39 = vld [vmem:[%s1904_s1] ss:$0 sm:$0xff] }
  0xbd   : > { %v1594_v47 = vsub.f32 %v1508_v28, %v399_v42  ;;  %v1597_v25 = vsub.f32 %v1511_v29, %v400_v43  ;;  %v469_v48 = vsel %vm335_vm0, %v429_v46, 0.0  ;;  %v472_v49 = vsel %vm335_vm0, %v430_v24, 0.0  ;;  %v601_v29 = vld [vmem:[%s1906_s3 + $0x10] sm:$0xff] }
  0xbe   : > { %467 = vadd.xlane.f32.xlu1 %v466_v41  ;;  %470 = vadd.xlane.f32.xlu0 %v469_v48  ;;  %v604_v56 = vpack.c.bf16 %v602_v53, %v601_v29 }
  0xbf   : > { %v431_v50 = vmul.f32 %v1594_v47, %v1594_v47  ;;  %v432_v51 = vmul.f32 %v1597_v25, %v1597_v25 }
  0xc0   : > { %1187 = vmatprep.subr.bf16.mxu0 %v604_v56 }
  0xc1   : > { %v475_v52 = vsel %vm335_vm0, %v431_v50, 0.0  ;;  %v478_v28 = vsel %vm335_vm0, %v432_v51, 0.0  ;;  %1188 = vmatpush3.bf16.msra.mxu0 %v604_v56 }
  0xc2   : > { %473 = vadd.xlane.f32.xlu1 %v472_v49  ;;  %476 = vadd.xlane.f32.xlu0 %v475_v52 }
  0xc3   : > { %1189 = vmatprep.subr.bf16.mxu0 %v603_v59 }
  0xc5   : > { %1190 = vmatpush3.bf16.msra.mxu0 %v603_v59 }
  0xc6   : > { %479 = vadd.xlane.f32.xlu1 %v478_v28 }
 0x12f   : > { %v435_v60 = vpop.xlane.xlu0 %434 }
 0x130   : > { %v481_v61 = vmul.f32 0.03125, %v435_v60 }
 0x132   : > { %v497_v62 = vadd.f32 1e-05, %v481_v61 }
 0x133   : > { %v438_v63 = vpop.xlane.xlu1 %437  ;;  %v441_v2 = vpop.xlane.xlu0 %440 }
 0x134   : > { %1271 = vrsqrt.f32 %v497_v62  ;;  %v482_v3 = vmul.f32 0.03125, %v438_v63  ;;  %v483_v4 = vmul.f32 0.03125, %v441_v2 }
 0x136   : > { %v498_v5 = vadd.f32 1e-05, %v482_v3  ;;  %v499_v6 = vadd.f32 1e-05, %v483_v4 }
 0x137   : > { %v444_v7 = vpop.xlane.xlu1 %443  ;;  %v447_v8 = vpop.xlane.xlu0 %446 }
 0x138   : > { %1273 = vrsqrt.f32 %v498_v5  ;;  %v484_v9 = vmul.f32 0.03125, %v444_v7  ;;  %v485_v12 = vmul.f32 0.03125, %v447_v8 }
 0x139   : > { %1275 = vrsqrt.f32 %v499_v6 }
 0x13a   : > { %v500_v13 = vadd.f32 1e-05, %v484_v9  ;;  %v501_v14 = vadd.f32 1e-05, %v485_v12 }
 0x13b   : > { %v450_v15 = vpop.xlane.xlu1 %449  ;;  %v453_v18 = vpop.xlane.xlu0 %452 }
 0x13c   : > { %1277 = vrsqrt.f32 %v500_v13  ;;  %v486_v19 = vmul.f32 0.03125, %v450_v15  ;;  %v487_v22 = vmul.f32 0.03125, %v453_v18 }
 0x13d   : > { %1279 = vrsqrt.f32 %v501_v14 }
 0x13e   : > { %v502_v16 = vadd.f32 1e-05, %v486_v19  ;;  %v503_v26 = vadd.f32 1e-05, %v487_v22 }
 0x13f   : > { %v456_v27 = vpop.xlane.xlu1 %455  ;;  %v459_v30 = vpop.xlane.xlu0 %458 }
 0x140   : > { %1281 = vrsqrt.f32 %v502_v16  ;;  %v488_v31 = vmul.f32 0.03125, %v456_v27  ;;  %v489_v32 = vmul.f32 0.03125, %v459_v30 }
 0x141   : > { %v1272_v33 = vpop.eup %1271  ;;  %1283 = vrsqrt.f32 %v503_v26 }
 0x142   : > { %v504_v34 = vadd.f32 1e-05, %v488_v31  ;;  %v505_v20 = vadd.f32 1e-05, %v489_v32  ;;  %v529_v38 = vmul.f32 %v1272_v33, %v1517_v36  ;;  %v1630_v36 = vld [vmem:[%s1905_s2] ss:$0 sm:$0xff] }
 0x143   : > { %v462_v40 = vpop.xlane.xlu1 %461  ;;  %v465_v41 = vpop.xlane.xlu0 %464 }
 0x144   : > { %1285 = vrsqrt.f32 %v504_v34  ;;  %v490_v42 = vmul.f32 0.03125, %v462_v40  ;;  %v491_v43 = vmul.f32 0.03125, %v465_v41  ;;  %v552_v24 = vmul.f32 %v1623_v39, %v529_v38 }
 0x145   : > { %v1274_v46 = vpop.eup %1273  ;;  %1287 = vrsqrt.f32 %v505_v20 }
 0x146   : > { %v1276_v48 = vpop.eup %1275  ;;  %v506_v49 = vadd.f32 1e-05, %v490_v42  ;;  %v507_v50 = vadd.f32 1e-05, %v491_v43  ;;  %v530_v51 = vmul.f32 %v1274_v46, %v1525_v44  ;;  %v575_v59 = vadd.f32 %v1630_v36, %v552_v24 }
 0x147   : > { %v468_v52 = vpop.xlane.xlu1 %467  ;;  %v471_v28 = vpop.xlane.xlu0 %470  ;;  %v531_v29 = vmul.f32 %v1276_v48, %v1519_v37 }
 0x148   : > { %1289 = vrsqrt.f32 %v506_v49  ;;  %v492_v53 = vmul.f32 0.03125, %v468_v52  ;;  %v493_v56 = vmul.f32 0.03125, %v471_v28  ;;  %v553_v57 = vmul.f32 %v1623_v39, %v530_v51 }
 0x149   : > { %v1278_v58 = vpop.eup %1277  ;;  %1291 = vrsqrt.f32 %v507_v50  ;;  %v554_v37 = vmul.f32 %v1623_v39, %v531_v29 }
 0x14a   : > { %v1280_v60 = vpop.eup %1279  ;;  %v508_v44 = vadd.f32 1e-05, %v492_v53  ;;  %v509_v61 = vadd.f32 1e-05, %v493_v56  ;;  %v576_v62 = vadd.f32 %v1630_v36, %v553_v57  ;;  %v532_v63 = vmul.f32 %v1278_v58, %v1527_v45 }
 0x14b   : > { %v474_v2 = vpop.xlane.xlu1 %473  ;;  %v477_v3 = vpop.xlane.xlu0 %476  ;;  %v533_v4 = vmul.f32 %v1280_v60, %v1535_v54  ;;  %v577_v54 = vadd.f32 %v1630_v36, %v554_v37 }
 0x14c   : > { %1293 = vrsqrt.f32 %v508_v44  ;;  %v494_v5 = vmul.f32 0.03125, %v474_v2  ;;  %v495_v6 = vmul.f32 0.03125, %v477_v3  ;;  %v591_v7 = vpack.c.bf16 %v576_v62, %v575_v59 }
 0x14d   : > { %v1282_v8 = vpop.eup %1281  ;;  %1295 = vrsqrt.f32 %v509_v61  ;;  %v555_v9 = vmul.f32 %v1623_v39, %v532_v63  ;;  %v556_v12 = vmul.f32 %v1623_v39, %v533_v4 }
 0x14e   : > { %v1284_v13 = vpop.eup %1283  ;;  %v510_v14 = vadd.f32 1e-05, %v494_v5  ;;  %v511_v15 = vadd.f32 1e-05, %v495_v6  ;;  %1191 = vmatprep.mubr.msk.bf16.mxu0 %vm335_vm0, %v591_v7  ;;  %v534_v45 = vmul.f32 %v1282_v8, %v1537_v55  ;;  %v892_v8 = vld [vmem:[%s1908_s5 + $0x38] sm:$0xff] }
 0x14f   : > { %v480_v18 = vpop.xlane.xlu1 %479  ;;  %v578_v19 = vadd.f32 %v1630_v36, %v555_v9  ;;  %v535_v22 = vmul.f32 %v1284_v13, %v1546_v0  ;;  %v579_v31 = vadd.f32 %v1630_v36, %v556_v12  ;;  %v887_v13 = vld [vmem:[%s1908_s5 + $0x10] sm:$0xff] }
 0x150   : > { %1297 = vrsqrt.f32 %v510_v14  ;;  %v496_v16 = vmul.f32 0.03125, %v480_v18  ;;  %v557_v26 = vmul.f32 %v1623_v39, %v534_v45  ;;  %v888_v14 = vld [vmem:[%s1908_s5 + $0x18] sm:$0xff]  ;;  %v885_v45 = vld [vmem:[%s1908_s5] sm:$0xff]  ;;  %v886_v18 = vld [vmem:[%s1908_s5 + $0x8] sm:$0xff] }
 0x151   : > { %v1286_v27 = vpop.eup %1285  ;;  %1299 = vrsqrt.f32 %v511_v15  ;;  %v592_v30 = vpack.c.bf16 %v578_v19, %v577_v54  ;;  %v558_v20 = vmul.f32 %v1623_v39, %v535_v22  ;;  %v894_v15 = vpack.c.bf16 %v888_v14, %v887_v13  ;;  %v1712_v19 = vld [vmem:[%s1907_s4] ss:$0 sm:$0xff] }
 0x152   : > { %v1288_v32 = vpop.eup %1287  ;;  %v512_v33 = vadd.f32 1e-05, %v496_v16  ;;  %v580_v55 = vadd.f32 %v1630_v36, %v557_v26  ;;  %v536_v34 = vmul.f32 %v1286_v27, %v1549_v1  ;;  %v893_v54 = vpack.c.bf16 %v886_v18, %v885_v45 }
 0x153   : > { %1192 = vmatmul.mubr.msk.bf16.vlgmr.msra.gmra.mxu0 %vm335_vm0, %v592_v30  ;;  %v537_v0 = vmul.f32 %v1288_v32, %v1558_v10  ;;  %v581_v43 = vadd.f32 %v1630_v36, %v558_v20 }
 0x154   : > { %1301 = vrsqrt.f32 %v512_v33  ;;  %v593_v38 = vpack.c.bf16 %v580_v55, %v579_v31  ;;  %v559_v40 = vmul.f32 %v1623_v39, %v536_v34 }
 0x155   : > { %v1290_v41 = vpop.eup %1289  ;;  %v560_v24 = vmul.f32 %v1623_v39, %v537_v0 }
 0x156   : > { %v1292_v42 = vpop.eup %1291  ;;  %1195 = vmatprep.mubr.msk.bf16.mxu0 %vm335_vm0, %v593_v38  ;;  %v582_v46 = vadd.f32 %v1630_v36, %v559_v40  ;;  %v538_v1 = vmul.f32 %v1290_v41, %v1561_v11 }
 0x157   : > { %v539_v48 = vmul.f32 %v1292_v42, %v1570_v23  ;;  %v583_v52 = vadd.f32 %v1630_v36, %v560_v24 }
 0x158   : > { %v594_v49 = vpack.c.bf16 %v582_v46, %v581_v43  ;;  %v561_v10 = vmul.f32 %v1623_v39, %v538_v1 }
 0x159   : > { %v1294_v50 = vpop.eup %1293  ;;  %v562_v53 = vmul.f32 %v1623_v39, %v539_v48 }
 0x15a   : > { %v1296_v51 = vpop.eup %1295  ;;  %v584_v28 = vadd.f32 %v1630_v36, %v561_v10  ;;  %v540_v29 = vmul.f32 %v1294_v50, %v1573_v17 }
 0x15b   : > { %1196 = vmatmul.mubr.msk.bf16.gmra.mxu0 %vm335_vm0, %v594_v49  ;;  %v541_v11 = vmul.f32 %v1296_v51, %v1582_v35  ;;  %v585_v59 = vadd.f32 %v1630_v36, %v562_v53 }
 0x15c   : > { %v595_v56 = vpack.c.bf16 %v584_v28, %v583_v52  ;;  %v563_v23 = vmul.f32 %v1623_v39, %v540_v29 }
 0x15d   : > { %v1298_v57 = vpop.eup %1297  ;;  %v564_v17 = vmul.f32 %v1623_v39, %v541_v11 }
 0x15e   : > { %v1300_v58 = vpop.eup %1299  ;;  %1199 = vmatprep.mubr.msk.bf16.mxu0 %vm335_vm0, %v595_v56  ;;  %v586_v60 = vadd.f32 %v1630_v36, %v563_v23  ;;  %v542_v44 = vmul.f32 %v1298_v57, %v1585_v21 }
 0x15f   : > { %v543_v61 = vmul.f32 %v1300_v58, %v1594_v47  ;;  %v587_v2 = vadd.f32 %v1630_v36, %v564_v17 }
 0x160   : > { %v596_v62 = vpack.c.bf16 %v586_v60, %v585_v59  ;;  %v565_v35 = vmul.f32 %v1623_v39, %v542_v44 }
 0x161   : > { %v1302_v63 = vpop.eup %1301  ;;  %v566_v4 = vmul.f32 %v1623_v39, %v543_v61 }
 0x162   : > { %v588_v3 = vadd.f32 %v1630_v36, %v565_v35  ;;  %v544_v37 = vmul.f32 %v1302_v63, %v1597_v25  ;;  %v891_v25 = vld [vmem:[%s1908_s5 + $0x30] sm:$0xff] }
 0x163   : > { %1200 = vmatmul.mubr.msk.bf16.gmra.mxu0 %vm335_vm0, %v596_v62  ;;  %v589_v47 = vadd.f32 %v1630_v36, %v566_v4  ;;  %v896_v9 = vpack.c.bf16 %v892_v8, %v891_v25 }
 0x164   : > { %v597_v5 = vpack.c.bf16 %v588_v3, %v587_v2  ;;  %v567_v21 = vmul.f32 %v1623_v39, %v544_v37  ;;  %v889_v39 = vld [vmem:[%s1908_s5 + $0x20] sm:$0xff] }
 0x165   : > { %1207 = vmatprep.subr.bf16.mxu1 %v896_v9 }
 0x166   : > { %1203 = vmatprep.mubr.msk.bf16.mxu0 %vm335_vm0, %v597_v5  ;;  %v590_v6 = vadd.f32 %v1630_v36, %v567_v21  ;;  %1208 = vmatpush3.bf16.msra.mxu1 %v896_v9  ;;  %v890_v36 = vld [vmem:[%s1908_s5 + $0x28] sm:$0xff] }
 0x167   : > { %v895_v12 = vpack.c.bf16 %v890_v36, %v889_v39 }
 0x168   : > { %v598_v7 = vpack.c.bf16 %v590_v6, %v589_v47 }
 0x169   : > { %1209 = vmatprep.subr.bf16.mxu1 %v895_v12 }
 0x16a   : > { %1210 = vmatpush3.bf16.msra.mxu1 %v895_v12 }
 0x16b   : > { %1204 = vmatmul.mubr.msk.bf16.gmra.mxu0 %vm335_vm0, %v598_v7  ;;  %1211 = vmatprep.subr.bf16.mxu1 %v894_v15 }
 0x16e   : > { %1212 = vmatpush3.bf16.msra.mxu1 %v894_v15 }
 0x16f   : > { %1213 = vmatprep.subr.bf16.mxu1 %v893_v54 }
 0x172   : > { %1214 = vmatpush3.bf16.msra.mxu1 %v893_v54 }
 0x213   : > { %v1193_v22 = vpop.f32.mrf.mxu0 }
 0x214   : > { %v679_v16 = vadd.f32 %v1193_v22, %v1712_v19 }
 0x215   : > { %v670_v26 = vpop.f32.mrf.mxu0 }
 0x216   : > { %v751_v27 = vmul.f32 0.044715, %v679_v16  ;;  %v1716_v30 = vadd.f32 %v1712_v19, %v670_v26  ;;  %v1771_v15 = vmul.f32 0.5, %v679_v16 }
 0x217   : > { %v1194_v31 = vpop.f32.mrf.mxu0 }
 0x218   : > { %v767_v32 = vmul.f32 %v751_v27, %v679_v16  ;;  %v749_v33 = vmul.f32 0.044715, %v1716_v30  ;;  %v1720_v55 = vadd.f32 %v1194_v31, %v1712_v19 }
 0x219   : > { %v673_v34 = vpop.f32.mrf.mxu0 }
 0x21a   : > { %v783_v20 = vmul.f32 %v767_v32, %v679_v16  ;;  %v765_v0 = vmul.f32 %v749_v33, %v1716_v30  ;;  %v752_v38 = vmul.f32 0.044715, %v1720_v55  ;;  %v1725_v40 = vadd.f32 %v1712_v19, %v673_v34 }
 0x21b   : > { %v1197_v41 = vpop.f32.mrf.mxu0 }
 0x21c   : > { %v799_v42 = vadd.f32 %v783_v20, %v679_v16  ;;  %v768_v43 = vmul.f32 %v752_v38, %v1720_v55  ;;  %v750_v46 = vmul.f32 0.044715, %v1725_v40  ;;  %v1730_v1 = vadd.f32 %v1197_v41, %v1712_v19 }
 0x21d   : > { %v686_v24 = vpop.f32.mrf.mxu0  ;;  %v781_v48 = vmul.f32 %v765_v0, %v1716_v30  ;;  %v733_v20 = vmul.f32 0.5, %v1716_v30 }
 0x21e   : > { %v815_v49 = vmul.f32 0.7978846, %v799_v42  ;;  %v784_v10 = vmul.f32 %v768_v43, %v1720_v55  ;;  %v766_v50 = vmul.f32 %v750_v46, %v1725_v40  ;;  %v755_v51 = vmul.f32 0.044715, %v1730_v1 }
 0x21f   : > { %v1737_v52 = vadd.f32 %v1712_v19, %v686_v24  ;;  %v1198_v28 = vpop.f32.mrf.mxu0  ;;  %v797_v29 = vadd.f32 %v781_v48, %v1716_v30  ;;  %v736_v48 = vmul.f32 0.5, %v1720_v55 }
 0x220   : > { %v800_v53 = vadd.f32 %v784_v10, %v1720_v55  ;;  %v771_v11 = vmul.f32 %v755_v51, %v1730_v1  ;;  %v1743_v56 = vadd.f32 %v1198_v28, %v1712_v19  ;;  %1303 = vtanh.f32 %v815_v49 }
 0x221   : > { %v753_v23 = vmul.f32 0.044715, %v1737_v52  ;;  %v689_v57 = vpop.f32.mrf.mxu0  ;;  %v782_v58 = vmul.f32 %v766_v50, %v1725_v40  ;;  %v813_v59 = vmul.f32 0.7978846, %v797_v29 }
 0x222   : > { %v816_v60 = vmul.f32 0.7978846, %v800_v53  ;;  %v787_v44 = vmul.f32 %v771_v11, %v1730_v1  ;;  %v756_v17 = vmul.f32 0.044715, %v1743_v56  ;;  %v1750_v61 = vadd.f32 %v1712_v19, %v689_v57 }
 0x223   : > { %v769_v62 = vmul.f32 %v753_v23, %v1737_v52  ;;  %v1201_v35 = vpop.f32.mrf.mxu0  ;;  %v798_v63 = vadd.f32 %v782_v58, %v1725_v40  ;;  %1305 = vtanh.f32 %v813_v59  ;;  %v734_v11 = vmul.f32 0.5, %v1725_v40 }
 0x224   : > { %1307 = vtanh.f32 %v816_v60  ;;  %v803_v2 = vadd.f32 %v787_v44, %v1730_v1  ;;  %v772_v3 = vmul.f32 %v756_v17, %v1743_v56  ;;  %v754_v37 = vmul.f32 0.044715, %v1750_v61 }
 0x225   : > { %v785_v4 = vmul.f32 %v769_v62, %v1737_v52  ;;  %v1759_v5 = vadd.f32 %v1201_v35, %v1712_v19  ;;  %v702_v21 = vpop.f32.mrf.mxu0  ;;  %v814_v47 = vmul.f32 0.7978846, %v798_v63 }
 0x226   : > { %v819_v6 = vmul.f32 0.7978846, %v803_v2  ;;  %v788_v7 = vmul.f32 %v772_v3, %v1743_v56  ;;  %v770_v25 = vmul.f32 %v754_v37, %v1750_v61  ;;  %v1764_v8 = vadd.f32 %v1712_v19, %v702_v21 }
 0x227   : > { %v801_v9 = vadd.f32 %v785_v4, %v1737_v52  ;;  %v759_v39 = vmul.f32 0.044715, %v1759_v5  ;;  %v1202_v36 = vpop.f32.mrf.mxu0  ;;  %1309 = vtanh.f32 %v814_v47 }
 0x228   : > { %v804_v12 = vadd.f32 %v788_v7, %v1743_v56  ;;  %v786_v13 = vmul.f32 %v770_v25, %v1750_v61  ;;  %v757_v14 = vmul.f32 0.044715, %v1764_v8  ;;  %1311 = vtanh.f32 %v819_v6 }
 0x229   : > { %v817_v45 = vmul.f32 0.7978846, %v801_v9  ;;  %v775_v18 = vmul.f32 %v759_v39, %v1759_v5  ;;  %v1775_v54 = vadd.f32 %v1202_v36, %v1712_v19  ;;  %v705_v22 = vpop.f32.mrf.mxu0 }
 0x22a   : > { %v820_v26 = vmul.f32 0.7978846, %v804_v12  ;;  %v802_v27 = vadd.f32 %v786_v13, %v1750_v61  ;;  %v773_v31 = vmul.f32 %v757_v14, %v1764_v8  ;;  %v1780_v32 = vadd.f32 %v1712_v19, %v705_v22 }
 0x22b   : > { %1313 = vtanh.f32 %v817_v45  ;;  %v791_v16 = vmul.f32 %v775_v18, %v1759_v5  ;;  %v760_v33 = vmul.f32 0.044715, %v1775_v54  ;;  %v1205_v34 = vpop.f32.mrf.mxu0 }
 0x22c   : > { %1315 = vtanh.f32 %v820_v26  ;;  %v818_v0 = vmul.f32 0.7978846, %v802_v27  ;;  %v789_v38 = vmul.f32 %v773_v31, %v1764_v8  ;;  %v758_v41 = vmul.f32 0.044715, %v1780_v32 }
 0x22d   : > { %v807_v42 = vadd.f32 %v791_v16, %v1759_v5  ;;  %v776_v43 = vmul.f32 %v760_v33, %v1775_v54  ;;  %v1790_v46 = vadd.f32 %v1205_v34, %v1712_v19  ;;  %v718_v24 = vpop.f32.mrf.mxu0  ;;  %v1304_v49 = vpop.eup %1303 }
 0x22e   : > { %1317 = vtanh.f32 %v818_v0  ;;  %v805_v30 = vadd.f32 %v789_v38, %v1764_v8  ;;  %v774_v10 = vmul.f32 %v758_v41, %v1780_v32  ;;  %v1796_v50 = vadd.f32 %v1712_v19, %v718_v24 }
 0x22f   : > { %v823_v51 = vmul.f32 0.7978846, %v807_v42  ;;  %v792_v28 = vmul.f32 %v776_v43, %v1775_v54  ;;  %v763_v29 = vmul.f32 0.044715, %v1790_v46  ;;  %v1206_v53 = vpop.f32.mrf.mxu0  ;;  %v847_v63 = vadd.f32 1.0, %v1304_v49 }
 0x230   : > { %v1306_v23 = vpop.eup %1305  ;;  %v821_v57 = vmul.f32 0.7978846, %v805_v30  ;;  %v790_v55 = vmul.f32 %v774_v10, %v1780_v32  ;;  %v761_v58 = vmul.f32 0.044715, %v1796_v50  ;;  %v1804_v59 = vadd.f32 %v1206_v53, %v1712_v19 }
 0x231   : > { %v1308_v60 = vpop.eup %1307  ;;  %v808_v44 = vadd.f32 %v792_v28, %v1775_v54  ;;  %v779_v17 = vmul.f32 %v763_v29, %v1790_v46  ;;  %v721_v62 = vpop.f32.mrf.mxu0  ;;  %v845_v35 = vadd.f32 1.0, %v1306_v23  ;;  %v863_v34 = vmul.f32 %v847_v63, %v1771_v15 }
 0x232   : > { %1319 = vtanh.f32 %v821_v57  ;;  %v806_v40 = vadd.f32 %v790_v55, %v1780_v32  ;;  %v777_v2 = vmul.f32 %v761_v58, %v1796_v50  ;;  %v764_v3 = vmul.f32 0.044715, %v1804_v59 }
 0x233   : > { %1321 = vtanh.f32 %v823_v51  ;;  %v824_v37 = vmul.f32 0.7978846, %v808_v44  ;;  %v795_v4 = vmul.f32 %v779_v17, %v1790_v46  ;;  %v1813_v21 = vadd.f32 %v1712_v19, %v721_v62 }
 0x234   : > { %v1310_v47 = vpop.eup %1309  ;;  %v822_v6 = vmul.f32 0.7978846, %v806_v40  ;;  %v793_v7 = vmul.f32 %v777_v2, %v1796_v50  ;;  %v780_v25 = vmul.f32 %v764_v3, %v1804_v59  ;;  %v848_v9 = vadd.f32 1.0, %v1308_v60 }
 0x235   : > { %1323 = vtanh.f32 %v824_v37  ;;  %v811_v39 = vadd.f32 %v795_v4, %v1790_v46  ;;  %v762_v36 = vmul.f32 0.044715, %v1813_v21  ;;  %v846_v12 = vadd.f32 1.0, %v1310_v47  ;;  %v1312_v13 = vpop.eup %1311 }
 0x236   : > { %1325 = vtanh.f32 %v822_v6  ;;  %v809_v14 = vadd.f32 %v793_v7, %v1796_v50  ;;  %v796_v19 = vmul.f32 %v780_v25, %v1804_v59  ;;  %v861_v45 = vmul.f32 %v845_v35, %v733_v20 }
 0x237   : > { %v827_v18 = vmul.f32 0.7978846, %v811_v39  ;;  %v778_v22 = vmul.f32 %v762_v36, %v1813_v21  ;;  %v862_v26 = vmul.f32 %v846_v12, %v734_v11  ;;  %v864_v27 = vmul.f32 %v848_v9, %v736_v48 }
 0x238   : > { %v1314_v31 = vpop.eup %1313  ;;  %v825_v16 = vmul.f32 0.7978846, %v809_v14  ;;  %v812_v33 = vadd.f32 %v796_v19, %v1804_v59  ;;  %v737_v30 = vmul.f32 0.5, %v1737_v52  ;;  %v740_v10 = vmul.f32 0.5, %v1743_v56 }
 0x239   : > { %v1316_v0 = vpop.eup %1315  ;;  %1327 = vtanh.f32 %v827_v18  ;;  %v794_v38 = vmul.f32 %v778_v22, %v1813_v21  ;;  %v877_v41 = vpack.c.bf16 %v862_v26, %v861_v45  ;;  %v878_v43 = vpack.c.bf16 %v864_v27, %v863_v34 }
 0x23a   : > { %v828_v42 = vmul.f32 0.7978846, %v812_v33  ;;  %v849_v20 = vadd.f32 1.0, %v1314_v31  ;;  %v852_v24 = vadd.f32 1.0, %v1316_v0  ;;  %1329 = vtanh.f32 %v825_v16 }
 0x23b   : > { %v1318_v49 = vpop.eup %1317  ;;  %v810_v48 = vadd.f32 %v794_v38, %v1813_v21  ;;  %1215 = vmatprep.mubr.msk.bf16.mxu1 %vm904_vm1, %v877_v41  ;;  %v738_v15 = vmul.f32 0.5, %v1750_v61  ;;  %v851_v28 = vadd.f32 1.0, %v1312_v13  ;;  %v739_v23 = vmul.f32 0.5, %v1730_v1 }
 0x23c   : > { %1331 = vtanh.f32 %v828_v42  ;;  %1216 = vmatmul.mubr.msk.bf16.vlgmr.msra.gmra.mxu1 %vm904_vm1, %v878_v43  ;;  %v850_v51 = vadd.f32 1.0, %v1318_v49  ;;  %v865_v53 = vmul.f32 %v849_v20, %v737_v30  ;;  %v868_v57 = vmul.f32 %v852_v24, %v740_v10 }
 0x23d   : > { %v826_v29 = vmul.f32 0.7978846, %v810_v48  ;;  %v867_v52 = vmul.f32 %v851_v28, %v739_v23  ;;  %v741_v61 = vmul.f32 0.5, %v1764_v8  ;;  %v742_v63 = vmul.f32 0.5, %v1780_v32 }
 0x23e   : > { %v866_v11 = vmul.f32 %v850_v51, %v738_v15  ;;  %v744_v40 = vmul.f32 0.5, %v1775_v54  ;;  %v743_v47 = vmul.f32 0.5, %v1759_v5  ;;  %v748_v54 = vmul.f32 0.5, %v1804_v59  ;;  %v1154_v59 = vld [vmem:[%s1909_s6] ss:$0 sm:$0xff] }
 0x23f   : > { %v1320_v55 = vpop.eup %1319  ;;  %1333 = vtanh.f32 %v826_v29  ;;  %v880_v56 = vpack.c.bf16 %v868_v57, %v867_v52  ;;  %v745_v14 = vmul.f32 0.5, %v1796_v50  ;;  %v746_v5 = vmul.f32 0.5, %v1813_v21 }
 0x240   : > { %v1322_v58 = vpop.eup %1321  ;;  %v879_v60 = vpack.c.bf16 %v866_v11, %v865_v53  ;;  %v853_v17 = vadd.f32 1.0, %v1320_v55  ;;  %v747_v45 = vmul.f32 0.5, %v1790_v46 }
 0x241   : > { %v855_v2 = vadd.f32 1.0, %v1322_v58 }
 0x242   : > { %v1324_v44 = vpop.eup %1323  ;;  %1219 = vmatprep.mubr.msk.bf16.mxu1 %vm904_vm1, %v879_v60  ;;  %v869_v37 = vmul.f32 %v853_v17, %v741_v61 }
 0x243   : > { %v1326_v62 = vpop.eup %1325  ;;  %v856_v35 = vadd.f32 1.0, %v1324_v44  ;;  %v871_v9 = vmul.f32 %v855_v2, %v743_v47 }
 0x244   : > { %1220 = vmatmul.mubr.msk.bf16.gmra.mxu1 %vm904_vm1, %v880_v56  ;;  %v854_v1 = vadd.f32 1.0, %v1326_v62 }
 0x245   : > { %v872_v6 = vmul.f32 %v856_v35, %v744_v40 }
 0x246   : > { %v1328_v3 = vpop.eup %1327  ;;  %v870_v4 = vmul.f32 %v854_v1, %v742_v63 }
 0x247   : > { %v1330_v7 = vpop.eup %1329  ;;  %v882_v8 = vpack.c.bf16 %v872_v6, %v871_v9  ;;  %v859_v13 = vadd.f32 1.0, %v1328_v3 }
 0x248   : > { %v881_v25 = vpack.c.bf16 %v870_v4, %v869_v37  ;;  %v857_v12 = vadd.f32 1.0, %v1330_v7 }
 0x249   : > { %v1332_v39 = vpop.eup %1331  ;;  %v875_v27 = vmul.f32 %v859_v13, %v747_v45 }
 0x24a   : > { %1223 = vmatprep.mubr.msk.bf16.mxu1 %vm904_vm1, %v881_v25  ;;  %v860_v36 = vadd.f32 1.0, %v1332_v39  ;;  %v873_v22 = vmul.f32 %v857_v12, %v745_v14 }
 0x24c   : > { %v1334_v32 = vpop.eup %1333  ;;  %1224 = vmatmul.mubr.msk.bf16.gmra.mxu1 %vm904_vm1, %v882_v8  ;;  %v876_v18 = vmul.f32 %v860_v36, %v748_v54 }
 0x24d   : > { %v858_v19 = vadd.f32 1.0, %v1334_v32 }
 0x24e   : > { %v884_v16 = vpack.c.bf16 %v876_v18, %v875_v27 }
 0x24f   : > { %v874_v26 = vmul.f32 %v858_v19, %v746_v5 }
 0x251   : > { %v883_v31 = vpack.c.bf16 %v874_v26, %v873_v22 }
 0x253   : > { %1227 = vmatprep.mubr.msk.bf16.mxu1 %vm904_vm1, %v883_v31 }
 0x254   : > { %1228 = vmatmul.mubr.msk.bf16.gmra.mxu1 %vm904_vm1, %v884_v16 }
 0x2fc   : > { %v1217_v46 = vpop.f32.mrf.mxu1 }
 0x2fd   : > { %v972_v50 = vadd.f32 %v1217_v46, %v1154_v59 }
 0x2fe   : > { %v963_v21 = vpop.f32.mrf.mxu1 }
 0x2ff   : > { %1028 = vst.msk [vmem:[%s1854_s17 + $0x10] sm:$0xff] %vm335_vm0, %v972_v50  ;;  %v964_v33 = vadd.f32 %v1154_v59, %v963_v21 }
 0x300   : > { %v1218_v34 = vpop.f32.mrf.mxu1 }
 0x301   : > { %1026 = vst.msk [vmem:[%s1854_s17] sm:$0xff] %vm335_vm0, %v964_v33  ;;  %v975_v0 = vadd.f32 %v1218_v34, %v1154_v59 }
 0x302   : > { %v966_v38 = vpop.f32.mrf.mxu1 }
 0x303   : > { %1029 = vst.msk [vmem:[%s1854_s17 + $0x18] sm:$0xff] %vm335_vm0, %v975_v0  ;;  %v967_v41 = vadd.f32 %v1154_v59, %v966_v38 }
 0x304   : > { %v1221_v42 = vpop.f32.mrf.mxu1 }
 0x305   : > { %1027 = vst.msk [vmem:[%s1854_s17 + $0x8] sm:$0xff] %vm335_vm0, %v967_v41  ;;  %v988_v43 = vadd.f32 %v1221_v42, %v1154_v59 }
 0x306   : > { %v979_v20 = vpop.f32.mrf.mxu1 }
 0x307   : > { %1032 = vst.msk [vmem:[%s1854_s17 + $0x30] sm:$0xff] %vm335_vm0, %v988_v43  ;;  %v980_v24 = vadd.f32 %v1154_v59, %v979_v20 }
 0x308   : > { %v1222_v49 = vpop.f32.mrf.mxu1 }
 0x309   : > { %1030 = vst.msk [vmem:[%s1854_s17 + $0x20] sm:$0xff] %vm335_vm0, %v980_v24  ;;  %v991_v48 = vadd.f32 %v1222_v49, %v1154_v59 }
 0x30a   : > { %v982_v30 = vpop.f32.mrf.mxu1 }
 0x30b   : > { %1033 = vst.msk [vmem:[%s1854_s17 + $0x38] sm:$0xff] %vm335_vm0, %v991_v48  ;;  %v983_v10 = vadd.f32 %v1154_v59, %v982_v30 }
 0x30c   : > { %v1225_v15 = vpop.f32.mrf.mxu1 }
 0x30d   : > { %1031 = vst.msk [vmem:[%s1854_s17 + $0x28] sm:$0xff] %vm335_vm0, %v983_v10  ;;  %v1004_v51 = vadd.f32 %v1225_v15, %v1154_v59 }
 0x30e   : > { %v995_v28 = vpop.f32.mrf.mxu1 }
 0x30f   : > { %1036 = vst.msk [vmem:[%s1854_s17 + $0x50] sm:$0xff] %vm335_vm0, %v1004_v51  ;;  %v996_v29 = vadd.f32 %v1154_v59, %v995_v28 }
 0x310   : > { %v1226_v53 = vpop.f32.mrf.mxu1 }
 0x311   : > { %1034 = vst.msk [vmem:[%s1854_s17 + $0x40] sm:$0xff] %vm335_vm0, %v996_v29  ;;  %v1007_v11 = vadd.f32 %v1226_v53, %v1154_v59 }
 0x312   : > { %v998_v23 = vpop.f32.mrf.mxu1 }
 0x313   : > { %1037 = vst.msk [vmem:[%s1854_s17 + $0x58] sm:$0xff] %vm335_vm0, %v1007_v11  ;;  %v999_v57 = vadd.f32 %v1154_v59, %v998_v23 }
 0x314   : > { %v1229_v55 = vpop.f32.mrf.mxu1 }
 0x315   : > { %1035 = vst.msk [vmem:[%s1854_s17 + $0x48] sm:$0xff] %vm335_vm0, %v999_v57  ;;  %v1020_v58 = vadd.f32 %v1229_v55, %v1154_v59 }
 0x316   : > { %v1011_v60 = vpop.f32.mrf.mxu1 }
 0x317   : > { %1040 = vst.msk [vmem:[%s1854_s17 + $0x70] sm:$0xff] %vm335_vm0, %v1020_v58  ;;  %v1012_v52 = vadd.f32 %v1154_v59, %v1011_v60 }
 0x318   : > { %v1230_v44 = vpop.f32.mrf.mxu1 }
 0x319   : > { %1038 = vst.msk [vmem:[%s1854_s17 + $0x60] sm:$0xff] %vm335_vm0, %v1012_v52  ;;  %v1023_v56 = vadd.f32 %v1230_v44, %v1154_v59 }
 0x31a   : > { %v1014_v17 = vpop.f32.mrf.mxu1 }
 0x31b   : > { %1041 = vst.msk [vmem:[%s1854_s17 + $0x78] sm:$0xff] %vm335_vm0, %v1023_v56  ;;  %v1015_v62 = vadd.f32 %v1154_v59, %v1014_v17 }
 0x31d   : > { %1039 = vst.msk [vmem:[%s1854_s17 + $0x68] sm:$0xff] %vm335_vm0, %v1015_v62 }
 0x31e PF: > { %s17_s28 = sadd.s32 1, %s1373_s28   ;;  %s1911_s24 = smov %s1365_s26 }
 0x31f   : > { %p14_p7 = scmp.ge.s32.totalorder %s17_s28, 6   ;;  %s1912_s25 = smov %s1369_s27 }
 0x320   : > { %s1913_s26 = smov %s1916_s29  ;;  %s1914_s27 = smov %s1920_s30 }
 0x321   :  { %16 = sbr.rel (!%p14_p7) target bundleno = 3 (0x3), region = 78 }

</bundles_post_ra>
